<compile_context>
chip_gen: v6e
topology: v6e:2x2x1
jax: 0.10.0
libtpu: 0.0.40
codegen_flags: <defaults>
</compile_context>

<pallas_src>
import numpy as np
import jax
import jax.numpy as jnp
from jax.experimental import pallas as pl
from jax.experimental.pallas import tpu as pltpu

F32 = jnp.float32
BF16 = jnp.bfloat16

# -------------------- problem sizes (small, consistent with the module) -----
B = 2          # batch
T = 8          # sequence length
V_F_LEN = 96   # opt.v_f_len
I_F_LEN = 32   # opt.i_f_len
F_LEN = V_F_LEN + I_F_LEN   # 128
H = 128        # opt.rnn_hidden_size
REG_MID = 128  # regressor hidden
POSE = 6
POSE_PAD = 128  # lane-dense padded pose output width


# ------------------------------ Pallas kernel -------------------------------
def pose_rnn_kernel(inp_ref, hc0_ref, w512_ref, w128_ref, bias_ref,
                    pose_ref, hcN_ref,
                    gates0_scr, out_scr):
    b = hc0_ref.shape[1]
    hid = hc0_ref.shape[2]
    tb = inp_ref.shape[1]
    f_len = inp_ref.shape[2]
    reg_mid = w128_ref.shape[1]
    pose_pad = pose_ref.shape[1]
    t_len = tb // b

    def mm(a, w):
        # bf16 operands (identical to default MXU precision), f32 accumulation
        return jnp.dot(a.astype(BF16), w, preferred_element_type=jnp.float32)

    def sig(x):  # one EUP push instead of exp + reciprocal
        return 0.5 * jnp.tanh(0.5 * x) + 0.5

    def cell_update(g, c):
        # PyTorch LSTM gate order: i, f, g, o (all math in f32)
        i_g = sig(g[:, 0:hid])
        f_g = sig(g[:, hid:2 * hid])
        g_g = jnp.tanh(g[:, 2 * hid:3 * hid])
        o_g = sig(g[:, 3 * hid:4 * hid])
        c_new = f_g * c + i_g * g_g
        return o_g * jnp.tanh(c_new), c_new

    # ---- hoisted, whole-sequence (T*B, K) compute ---------------------------
    a = inp_ref[0]           # [fv | fi]            (T*B, 128)
    bb = inp_ref[1]          # [fv_alter | 0]       (T*B, 128)
    m0 = inp_ref[2]          # [dec0 bcast | ones]  (T*B, 128)
    m1 = inp_ref[3]          # [dec1 bcast | zeros] (T*B, 128)
    feat = a * m0 + bb * m1                              # lane-dense FMA
    fused = feat * (mm(feat, w128_ref[0]) + bias_ref[2:3, 0:f_len])  # soft fuse
    # layer-0 input projection (both biases folded), all steps at once
    gates0_scr[...] = mm(fused, w512_ref[0]) + bias_ref[0:1, :]

    whh0 = w512_ref[1]
    wih1 = w512_ref[2]
    whh1 = w512_ref[3]
    bl1 = bias_ref[1:2, :]

    h1, h2 = hc0_ref[0], hc0_ref[1]
    c1, c2 = hc0_ref[2], hc0_ref[3]

    # ---- recurrence: only the h @ W_hh / h @ W_ih work is in the loop -------
    for t in range(t_len):                         # static unrolled, T = 8
        g0 = gates0_scr[pl.ds(t * b, b), :] + mm(h1, whh0)
        # recurrent half of layer-1 depends only on the previous h2, so it is
        # issued here and overlaps the EUP work of cell_update(g0) below.
        rec1 = mm(h2, whh1) + bl1
        h1, c1 = cell_update(g0, c1)
        g1 = mm(h1, wih1) + rec1
        h2, c2 = cell_update(g1, c2)
        out_scr[pl.ds(t * b, b), :] = h2

    # ---- regressor on all time steps at once; single lane-dense write -------
    out = out_scr[...]
    z = mm(out, w128_ref[1]) + bias_ref[3:4, 0:reg_mid]
    z = jnp.where(z > 0, z, 0.1 * z)               # LeakyReLU(0.1)
    pose_ref[...] = mm(z, w128_ref[2]) + bias_ref[4:5, 0:pose_pad]

    hcN_ref[0] = h1
    hcN_ref[1] = h2
    hcN_ref[2] = c1
    hcN_ref[3] = c2


# ------------------------------ wrapper --------------------------------------
@jax.jit
def pose_rnn_forward(fv, fv_alter, fi, dec, params, prev_h=None, prev_c=None):
    """fv/fv_alter: (B,T,V_F), fi: (B,T,I_F), dec: (B,T,2).
    prev_h/prev_c: (B, 2, H) or None.  Returns pose (B,T,6), (h, c) as (B,2,H)."""
    b, t_len, vf = fv.shape
    i_f = fi.shape[-1]
    f_len = vf + i_f
    hid = params["w_hh_l0"].shape[1]
    reg_mid = params["w_reg1"].shape[0]
    pose_dim = params["w_reg2"].shape[0]
    tb = t_len * b

    # time-major, flattened to (T*B, feat) so T folds into the matmul M dim
    def to_tm(x):
        return jnp.transpose(x, (1, 0, 2)).reshape(tb, -1).astype(F32)

    fv_f, fva_f, fi_f, dec_f = to_tm(fv), to_tm(fv_alter), to_tm(fi), to_tm(dec)

    # lane-dense input slab: feat = a*m0 + b*m1 inside the kernel
    a_sl = jnp.concatenate([fv_f, fi_f], axis=-1)                        # (TB, 128)
    b_sl = jnp.concatenate([fva_f, jnp.zeros((tb, i_f), F32)], axis=-1)
    m0 = jnp.concatenate([jnp.broadcast_to(dec_f[:, 0:1], (tb, vf)),
                          jnp.ones((tb, i_f), F32)], axis=-1)
    m1 = jnp.concatenate([jnp.broadcast_to(dec_f[:, -1:], (tb, vf)),
                          jnp.zeros((tb, i_f), F32)], axis=-1)
    inp = jnp.stack([a_sl, b_sl, m0, m1], axis=0)                        # (4, TB, 128)

    if prev_h is None:
        hc0 = jnp.zeros((4, b, hid), F32)
    else:
        h0 = jnp.transpose(prev_h, (1, 0, 2)).astype(F32)                # (2, B, H)
        c0 = jnp.transpose(prev_c, (1, 0, 2)).astype(F32)
        hc0 = jnp.concatenate([h0, c0], axis=0)                          # (4, B, H)

    # weight slabs, pre-transposed so the kernel does x @ W, shipped as bf16
    w512 = jnp.stack([params["w_ih_l0"].T, params["w_hh_l0"].T,
                      params["w_ih_l1"].T, params["w_hh_l1"].T],
                     axis=0).astype(BF16)                                # (4,128,512)
    wr2_pad = jnp.zeros((reg_mid, POSE_PAD), F32).at[:, :pose_dim].set(
        params["w_reg2"].T.astype(F32))
    w128 = jnp.stack([params["w_fuse"].T.astype(F32),
                      params["w_reg1"].T.astype(F32),
                      wr2_pad], axis=0).astype(BF16)                     # (3,128,128)

    # bias slab (f32): rows 0/1 = LSTM layer biases, 2 = fuse, 3 = reg1, 4 = reg2
    bias = jnp.zeros((8, 4 * hid), F32)
    bias = bias.at[0, :].set((params["b_ih_l0"] + params["b_hh_l0"]).astype(F32))
    bias = bias.at[1, :].set((params["b_ih_l1"] + params["b_hh_l1"]).astype(F32))
    bias = bias.at[2, :f_len].set(params["b_fuse"].astype(F32))
    bias = bias.at[3, :reg_mid].set(params["b_reg1"].astype(F32))
    bias = bias.at[4, :pose_dim].set(params["b_reg2"].astype(F32))

    full = lambda s: pl.BlockSpec(s, lambda i, _s=s: (0,) * len(_s))

    grid_spec = pltpu.PrefetchScalarGridSpec(
        num_scalar_prefetch=0,
        grid=(1,),                          # single invocation; loop in-kernel
        in_specs=[
            full((4, tb, f_len)),           # input slab
            full((4, b, hid)),              # hc0 slab [h1,h2,c1,c2]
            full((4, f_len, 4 * hid)),      # [Wih0,Whh0,Wih1,Whh1]^T  (bf16)
            full((3, reg_mid, POSE_PAD)),   # [Wfuse,Wreg1,Wreg2pad]^T (bf16)
            full((8, 4 * hid)),             # bias slab
        ],
        out_specs=[
            full((tb, POSE_PAD)),           # pose (padded, lane-dense)
            full((4, b, hid)),              # hcN slab [h1,h2,c1,c2]
        ],
        scratch_shapes=[
            pltpu.VMEM((tb, 4 * hid), F32),  # gates0 for all steps
            pltpu.VMEM((tb, hid), F32),      # h2 output sequence
        ],
    )

    pose_pad, hc_n = pl.pallas_call(
        pose_rnn_kernel,
        grid_spec=grid_spec,
        out_shape=[
            jax.ShapeDtypeStruct((tb, POSE_PAD), F32),
            jax.ShapeDtypeStruct((4, b, hid), F32),
        ],
        compiler_params=pltpu.CompilerParams(
            dimension_semantics=("arbitrary",)),
    )(inp, hc0, w512, w128, bias)

    pose = jnp.transpose(pose_pad.reshape(t_len, b, POSE_PAD),
                         (1, 0, 2))[..., :pose_dim]          # (B, T, 6)
    h_n = jnp.transpose(hc_n[0:2], (1, 0, 2))                # (B, 2, H)
    c_n = jnp.transpose(hc_n[2:4], (1, 0, 2))
    return pose, (h_n, c_n)


# ------------------------------ pure-JAX reference ---------------------------
def pose_rnn_reference(fv, fv_alter, fi, dec, params):
    hp = jax.lax.Precision.HIGHEST
    mm = lambda a, b_: jnp.matmul(a, b_, precision=hp)

    v_in = fv * dec[:, :, :1] + fv_alter * dec[:, :, -1:]
    feat = jnp.concatenate([v_in, fi], axis=-1)
    fuse_w = mm(feat, params["w_fuse"].T) + params["b_fuse"]
    fused = feat * fuse_w

    def lstm_layer(x_seq, w_ih, w_hh, b_ih, b_hh):
        b_, t_, _ = x_seq.shape
        hid = w_hh.shape[1]
        h = jnp.zeros((b_, hid), F32)
        c = jnp.zeros((b_, hid), F32)
        outs = []
        for s in range(t_):
            g = mm(x_seq[:, s], w_ih.T) + b_ih + mm(h, w_hh.T) + b_hh
            i_g, f_g, g_g, o_g = jnp.split(g, 4, axis=-1)
            i_g = jax.nn.sigmoid(i_g)
            f_g = jax.nn.sigmoid(f_g)
            g_g = jnp.tanh(g_g)
            o_g = jax.nn.sigmoid(o_g)
            c = f_g * c + i_g * g_g
            h = o_g * jnp.tanh(c)
            outs.append(h)
        return jnp.stack(outs, axis=1), h, c

    out1, h1, c1 = lstm_layer(fused, params["w_ih_l0"], params["w_hh_l0"],
                              params["b_ih_l0"], params["b_hh_l0"])
    out2, h2, c2 = lstm_layer(out1, params["w_ih_l1"], params["w_hh_l1"],
                              params["b_ih_l1"], params["b_hh_l1"])
    z = mm(out2, params["w_reg1"].T) + params["b_reg1"]
    z = jnp.where(z > 0, z, 0.1 * z)
    pose = mm(z, params["w_reg2"].T) + params["b_reg2"]
    h_n = jnp.stack([h1, h2], axis=1)   # (B, 2, H)
    c_n = jnp.stack([c1, c2], axis=1)
    return pose, (h_n, c_n)


# ------------------------------ main ------------------------------------------
if __name__ == "__main__":
    key = jax.random.PRNGKey(0)
    ks = jax.random.split(key, 20)

    def init(k, shape, scale):
        return (scale * jax.random.normal(k, shape)).astype(F32)

    params = {
        "w_fuse":  init(ks[0], (F_LEN, F_LEN), 0.05),
        "b_fuse":  init(ks[1], (F_LEN,), 0.05),
        "w_ih_l0": init(ks[2], (4 * H, F_LEN), 0.05),
        "w_hh_l0": init(ks[3], (4 * H, H), 0.05),
        "b_ih_l0": init(ks[4], (4 * H,), 0.05),
        "b_hh_l0": init(ks[5], (4 * H,), 0.05),
        "w_ih_l1": init(ks[6], (4 * H, H), 0.05),
        "w_hh_l1": init(ks[7], (4 * H, H), 0.05),
        "b_ih_l1": init(ks[8], (4 * H,), 0.05),
        "b_hh_l1": init(ks[9], (4 * H,), 0.05),
        "w_reg1":  init(ks[10], (REG_MID, H), 0.05),
        "b_reg1":  init(ks[11], (REG_MID,), 0.05),
        "w_reg2":  init(ks[12], (POSE, REG_MID), 0.05),
        "b_reg2":  init(ks[13], (POSE,), 0.05),
    }

    fv = init(ks[14], (B, T, V_F_LEN), 1.0)
    fv_alter = init(ks[15], (B, T, V_F_LEN), 1.0)
    fi = init(ks[16], (B, T, I_F_LEN), 1.0)
    dec = jax.nn.softmax(init(ks[17], (B, T, 2), 1.0), axis=-1).astype(F32)

    pose, (h_n, c_n) = pose_rnn_forward(fv, fv_alter, fi, dec, params)
    jax.block_until_ready((pose, h_n, c_n))

    pose_ref, (h_ref, c_ref) = pose_rnn_reference(fv, fv_alter, fi, dec, params)
    # Kernel uses bf16 MXU operands (== default single-pass MXU precision);
    # reference is full-f32 HIGHEST, so tolerances account for bf16 rounding
    # compounding through the 8-step recurrence.
    np.testing.assert_allclose(np.asarray(pose), np.asarray(pose_ref),
                               rtol=2e-2, atol=2e-2)
    np.testing.assert_allclose(np.asarray(h_n), np.asarray(h_ref),
                               rtol=2e-2, atol=2e-2)
    np.testing.assert_allclose(np.asarray(c_n), np.asarray(c_ref),
                               rtol=2e-2, atol=2e-2)

    print("KERNEL_OK")
</pallas_src>

<mosaic_0001>
module attributes {stable_mosaic.version = 11 : i64} {
  func.func @pose_rnn_kernel(%arg0: i32, %arg1: memref<4x16x128xf32, #tpu.memory_space<vmem>>, %arg2: memref<4x2x128xf32, #tpu.memory_space<vmem>>, %arg3: memref<4x128x512xbf16, #tpu.memory_space<vmem>>, %arg4: memref<3x128x128xbf16, #tpu.memory_space<vmem>>, %arg5: memref<8x512xf32, #tpu.memory_space<vmem>>, %arg6: memref<16x128xf32, #tpu.memory_space<vmem>>, %arg7: memref<4x2x128xf32, #tpu.memory_space<vmem>>, %arg8: memref<16x512xf32, #tpu.memory_space<vmem>>, %arg9: memref<16x128xf32, #tpu.memory_space<vmem>>) attributes {dimension_semantics = [#tpu.dimension_semantics<arbitrary>], iteration_bounds = array<i64: 1>, scalar_prefetch = 0 : i64, scratch_operands = 2 : i64, tpu.core_type = #tpu.core_type<tc>, window_params = [{pipeline_mode = #tpu.pipeline_mode<synchronous>, transform_indices = @transform_0, window_bounds = array<i64: 4, 16, 128>}, {pipeline_mode = #tpu.pipeline_mode<synchronous>, transform_indices = @transform_1, window_bounds = array<i64: 4, 2, 128>}, {pipeline_mode = #tpu.pipeline_mode<synchronous>, transform_indices = @transform_2, window_bounds = array<i64: 4, 128, 512>}, {pipeline_mode = #tpu.pipeline_mode<synchronous>, transform_indices = @transform_3, window_bounds = array<i64: 3, 128, 128>}, {pipeline_mode = #tpu.pipeline_mode<synchronous>, transform_indices = @transform_4, window_bounds = array<i64: 8, 512>}, {pipeline_mode = #tpu.pipeline_mode<synchronous>, transform_indices = @transform_5, window_bounds = array<i64: 16, 128>}, {pipeline_mode = #tpu.pipeline_mode<synchronous>, transform_indices = @transform_6, window_bounds = array<i64: 4, 2, 128>}]} {
    %c0 = arith.constant 0 : index
    %c0_0 = arith.constant 0 : index
    %c0_1 = arith.constant 0 : index
    %0 = vector.load %arg1[%c0, %c0_0, %c0_1] : memref<4x16x128xf32, #tpu.memory_space<vmem>>, vector<1x16x128xf32>
    %1 = vector.shape_cast %0 : vector<1x16x128xf32> to vector<16x128xf32>
    %c1 = arith.constant 1 : index
    %c0_2 = arith.constant 0 : index
    %c0_3 = arith.constant 0 : index
    %2 = vector.load %arg1[%c1, %c0_2, %c0_3] : memref<4x16x128xf32, #tpu.memory_space<vmem>>, vector<1x16x128xf32>
    %3 = vector.shape_cast %2 : vector<1x16x128xf32> to vector<16x128xf32>
    %c2 = arith.constant 2 : index
    %c0_4 = arith.constant 0 : index
    %c0_5 = arith.constant 0 : index
    %4 = vector.load %arg1[%c2, %c0_4, %c0_5] : memref<4x16x128xf32, #tpu.memory_space<vmem>>, vector<1x16x128xf32>
    %5 = vector.shape_cast %4 : vector<1x16x128xf32> to vector<16x128xf32>
    %c3 = arith.constant 3 : index
    %c0_6 = arith.constant 0 : index
    %c0_7 = arith.constant 0 : index
    %6 = vector.load %arg1[%c3, %c0_6, %c0_7] : memref<4x16x128xf32, #tpu.memory_space<vmem>>, vector<1x16x128xf32>
    %7 = vector.shape_cast %6 : vector<1x16x128xf32> to vector<16x128xf32>
    %8 = arith.mulf %1, %5 : vector<16x128xf32>
    %9 = arith.mulf %3, %7 : vector<16x128xf32>
    %10 = arith.addf %8, %9 : vector<16x128xf32>
    %c0_8 = arith.constant 0 : index
    %c0_9 = arith.constant 0 : index
    %c0_10 = arith.constant 0 : index
    %11 = vector.load %arg4[%c0_8, %c0_9, %c0_10] : memref<3x128x128xbf16, #tpu.memory_space<vmem>>, vector<1x128x128xbf16>
    %12 = vector.shape_cast %11 : vector<1x128x128xbf16> to vector<128x128xbf16>
    %13 = arith.truncf %10 : vector<16x128xf32> to vector<16x128xbf16>
    %cst = arith.constant dense<0.000000e+00> : vector<16x128xf32>
    %14 = tpu.matmul %13, %12, %cst {dimension_numbers = #tpu.dot_dimension_numbers<[1], [0], [0], [1], [0, 0, 1, 1], [], []>} : vector<16x128xbf16>, vector<128x128xbf16>, vector<16x128xf32> -> vector<16x128xf32>
    %c2_11 = arith.constant 2 : index
    %c0_12 = arith.constant 0 : index
    %15 = vector.load %arg5[%c2_11, %c0_12] : memref<8x512xf32, #tpu.memory_space<vmem>>, vector<1x128xf32>
    %16 = vector.broadcast %15 : vector<1x128xf32> to vector<16x128xf32>
    %17 = arith.addf %14, %16 : vector<16x128xf32>
    %18 = arith.mulf %10, %17 : vector<16x128xf32>
    %c0_13 = arith.constant 0 : index
    %c0_14 = arith.constant 0 : index
    %c0_15 = arith.constant 0 : index
    %19 = vector.load %arg3[%c0_13, %c0_14, %c0_15] : memref<4x128x512xbf16, #tpu.memory_space<vmem>>, vector<1x128x512xbf16>
    %20 = vector.shape_cast %19 : vector<1x128x512xbf16> to vector<128x512xbf16>
    %21 = arith.truncf %18 : vector<16x128xf32> to vector<16x128xbf16>
    %cst_16 = arith.constant dense<0.000000e+00> : vector<16x512xf32>
    %22 = tpu.matmul %21, %20, %cst_16 {dimension_numbers = #tpu.dot_dimension_numbers<[1], [0], [0], [1], [0, 0, 1, 1], [], []>} : vector<16x128xbf16>, vector<128x512xbf16>, vector<16x512xf32> -> vector<16x512xf32>
    %c0_17 = arith.constant 0 : index
    %c0_18 = arith.constant 0 : index
    %23 = vector.load %arg5[%c0_17, %c0_18] : memref<8x512xf32, #tpu.memory_space<vmem>>, vector<1x512xf32>
    %24 = vector.broadcast %23 : vector<1x512xf32> to vector<16x512xf32>
    %25 = arith.addf %22, %24 : vector<16x512xf32>
    %c0_19 = arith.constant 0 : index
    %c0_20 = arith.constant 0 : index
    %26 = vector.load %arg8[%c0_19, %c0_20] : memref<16x512xf32, #tpu.memory_space<vmem>>, vector<16x512xf32>
    tpu.vector_store %arg8[%c0_19, %c0_20], %25 {strides = array<i32>} : memref<16x512xf32, #tpu.memory_space<vmem>>, vector<16x512xf32>,
    %c1_21 = arith.constant 1 : index
    %c0_22 = arith.constant 0 : index
    %c0_23 = arith.constant 0 : index
    %27 = vector.load %arg3[%c1_21, %c0_22, %c0_23] : memref<4x128x512xbf16, #tpu.memory_space<vmem>>, vector<1x128x512xbf16>
    %28 = vector.shape_cast %27 : vector<1x128x512xbf16> to vector<128x512xbf16>
    %c2_24 = arith.constant 2 : index
    %c0_25 = arith.constant 0 : index
    %c0_26 = arith.constant 0 : index
    %29 = vector.load %arg3[%c2_24, %c0_25, %c0_26] : memref<4x128x512xbf16, #tpu.memory_space<vmem>>, vector<1x128x512xbf16>
    %30 = vector.shape_cast %29 : vector<1x128x512xbf16> to vector<128x512xbf16>
    %c3_27 = arith.constant 3 : index
    %c0_28 = arith.constant 0 : index
    %c0_29 = arith.constant 0 : index
    %31 = vector.load %arg3[%c3_27, %c0_28, %c0_29] : memref<4x128x512xbf16, #tpu.memory_space<vmem>>, vector<1x128x512xbf16>
    %32 = vector.shape_cast %31 : vector<1x128x512xbf16> to vector<128x512xbf16>
    %c1_30 = arith.constant 1 : index
    %c0_31 = arith.constant 0 : index
    %33 = vector.load %arg5[%c1_30, %c0_31] : memref<8x512xf32, #tpu.memory_space<vmem>>, vector<1x512xf32>
    %c0_32 = arith.constant 0 : index
    %c0_33 = arith.constant 0 : index
    %c0_34 = arith.constant 0 : index
    %34 = vector.load %arg2[%c0_32, %c0_33, %c0_34] : memref<4x2x128xf32, #tpu.memory_space<vmem>>, vector<1x2x128xf32>
    %35 = vector.shape_cast %34 : vector<1x2x128xf32> to vector<2x128xf32>
    %c1_35 = arith.constant 1 : index
    %c0_36 = arith.constant 0 : index
    %c0_37 = arith.constant 0 : index
    %36 = vector.load %arg2[%c1_35, %c0_36, %c0_37] : memref<4x2x128xf32, #tpu.memory_space<vmem>>, vector<1x2x128xf32>
    %37 = vector.shape_cast %36 : vector<1x2x128xf32> to vector<2x128xf32>
    %c2_38 = arith.constant 2 : index
    %c0_39 = arith.constant 0 : index
    %c0_40 = arith.constant 0 : index
    %38 = vector.load %arg2[%c2_38, %c0_39, %c0_40] : memref<4x2x128xf32, #tpu.memory_space<vmem>>, vector<1x2x128xf32>
    %39 = vector.shape_cast %38 : vector<1x2x128xf32> to vector<2x128xf32>
    %c3_41 = arith.constant 3 : index
    %c0_42 = arith.constant 0 : index
    %c0_43 = arith.constant 0 : index
    %40 = vector.load %arg2[%c3_41, %c0_42, %c0_43] : memref<4x2x128xf32, #tpu.memory_space<vmem>>, vector<1x2x128xf32>
    %41 = vector.shape_cast %40 : vector<1x2x128xf32> to vector<2x128xf32>
    %c0_44 = arith.constant 0 : index
    %c0_45 = arith.constant 0 : index
    %42 = vector.load %arg8[%c0_44, %c0_45] : memref<16x512xf32, #tpu.memory_space<vmem>>, vector<2x512xf32>
    %43 = arith.truncf %35 : vector<2x128xf32> to vector<2x128xbf16>
    %cst_46 = arith.constant dense<0.000000e+00> : vector<2x512xf32>
    %44 = tpu.matmul %43, %28, %cst_46 {dimension_numbers = #tpu.dot_dimension_numbers<[1], [0], [0], [1], [0, 0, 1, 1], [], []>} : vector<2x128xbf16>, vector<128x512xbf16>, vector<2x512xf32> -> vector<2x512xf32>
    %45 = arith.addf %42, %44 : vector<2x512xf32>
    %46 = arith.truncf %37 : vector<2x128xf32> to vector<2x128xbf16>
    %cst_47 = arith.constant dense<0.000000e+00> : vector<2x512xf32>
    %47 = tpu.matmul %46, %32, %cst_47 {dimension_numbers = #tpu.dot_dimension_numbers<[1], [0], [0], [1], [0, 0, 1, 1], [], []>} : vector<2x128xbf16>, vector<128x512xbf16>, vector<2x512xf32> -> vector<2x512xf32>
    %48 = vector.broadcast %33 : vector<1x512xf32> to vector<2x512xf32>
    %49 = arith.addf %47, %48 : vector<2x512xf32>
    %50 = vector.extract_strided_slice %45 {offsets = [0, 0], sizes = [2, 128], strides = [1, 1]} : vector<2x512xf32> to vector<2x128xf32>
    %cst_48 = arith.constant 5.000000e-01 : f32
    %51 = vector.broadcast %cst_48 : f32 to vector<2x128xf32>
    %52 = arith.mulf %51, %50 : vector<2x128xf32>
    %53 = math.tanh %52 : vector<2x128xf32>
    %cst_49 = arith.constant 5.000000e-01 : f32
    %54 = vector.broadcast %cst_49 : f32 to vector<2x128xf32>
    %55 = arith.mulf %54, %53 : vector<2x128xf32>
    %cst_50 = arith.constant 5.000000e-01 : f32
    %56 = vector.broadcast %cst_50 : f32 to vector<2x128xf32>
    %57 = arith.addf %55, %56 : vector<2x128xf32>
    %58 = vector.extract_strided_slice %45 {offsets = [0, 128], sizes = [2, 128], strides = [1, 1]} : vector<2x512xf32> to vector<2x128xf32>
    %cst_51 = arith.constant 5.000000e-01 : f32
    %59 = vector.broadcast %cst_51 : f32 to vector<2x128xf32>
    %60 = arith.mulf %59, %58 : vector<2x128xf32>
    %61 = math.tanh %60 : vector<2x128xf32>
    %cst_52 = arith.constant 5.000000e-01 : f32
    %62 = vector.broadcast %cst_52 : f32 to vector<2x128xf32>
    %63 = arith.mulf %62, %61 : vector<2x128xf32>
    %cst_53 = arith.constant 5.000000e-01 : f32
    %64 = vector.broadcast %cst_53 : f32 to vector<2x128xf32>
    %65 = arith.addf %63, %64 : vector<2x128xf32>
    %66 = vector.extract_strided_slice %45 {offsets = [0, 256], sizes = [2, 128], strides = [1, 1]} : vector<2x512xf32> to vector<2x128xf32>
    %67 = math.tanh %66 : vector<2x128xf32>
    %68 = vector.extract_strided_slice %45 {offsets = [0, 384], sizes = [2, 128], strides = [1, 1]} : vector<2x512xf32> to vector<2x128xf32>
    %cst_54 = arith.constant 5.000000e-01 : f32
    %69 = vector.broadcast %cst_54 : f32 to vector<2x128xf32>
    %70 = arith.mulf %69, %68 : vector<2x128xf32>
    %71 = math.tanh %70 : vector<2x128xf32>
    %cst_55 = arith.constant 5.000000e-01 : f32
    %72 = vector.broadcast %cst_55 : f32 to vector<2x128xf32>
    %73 = arith.mulf %72, %71 : vector<2x128xf32>
    %cst_56 = arith.constant 5.000000e-01 : f32
    %74 = vector.broadcast %cst_56 : f32 to vector<2x128xf32>
    %75 = arith.addf %73, %74 : vector<2x128xf32>
    %76 = arith.mulf %65, %39 : vector<2x128xf32>
    %77 = arith.mulf %57, %67 : vector<2x128xf32>
    %78 = arith.addf %76, %77 : vector<2x128xf32>
    %79 = math.tanh %78 : vector<2x128xf32>
    %80 = arith.mulf %75, %79 : vector<2x128xf32>
    %81 = arith.truncf %80 : vector<2x128xf32> to vector<2x128xbf16>
    %cst_57 = arith.constant dense<0.000000e+00> : vector<2x512xf32>
    %82 = tpu.matmul %81, %30, %cst_57 {dimension_numbers = #tpu.dot_dimension_numbers<[1], [0], [0], [1], [0, 0, 1, 1], [], []>} : vector<2x128xbf16>, vector<128x512xbf16>, vector<2x512xf32> -> vector<2x512xf32>
    %83 = arith.addf %82, %49 : vector<2x512xf32>
    %84 = vector.extract_strided_slice %83 {offsets = [0, 0], sizes = [2, 128], strides = [1, 1]} : vector<2x512xf32> to vector<2x128xf32>
    %cst_58 = arith.constant 5.000000e-01 : f32
    %85 = vector.broadcast %cst_58 : f32 to vector<2x128xf32>
    %86 = arith.mulf %85, %84 : vector<2x128xf32>
    %87 = math.tanh %86 : vector<2x128xf32>
    %cst_59 = arith.constant 5.000000e-01 : f32
    %88 = vector.broadcast %cst_59 : f32 to vector<2x128xf32>
    %89 = arith.mulf %88, %87 : vector<2x128xf32>
    %cst_60 = arith.constant 5.000000e-01 : f32
    %90 = vector.broadcast %cst_60 : f32 to vector<2x128xf32>
    %91 = arith.addf %89, %90 : vector<2x128xf32>
    %92 = vector.extract_strided_slice %83 {offsets = [0, 128], sizes = [2, 128], strides = [1, 1]} : vector<2x512xf32> to vector<2x128xf32>
    %cst_61 = arith.constant 5.000000e-01 : f32
    %93 = vector.broadcast %cst_61 : f32 to vector<2x128xf32>
    %94 = arith.mulf %93, %92 : vector<2x128xf32>
    %95 = math.tanh %94 : vector<2x128xf32>
    %cst_62 = arith.constant 5.000000e-01 : f32
    %96 = vector.broadcast %cst_62 : f32 to vector<2x128xf32>
    %97 = arith.mulf %96, %95 : vector<2x128xf32>
    %cst_63 = arith.constant 5.000000e-01 : f32
    %98 = vector.broadcast %cst_63 : f32 to vector<2x128xf32>
    %99 = arith.addf %97, %98 : vector<2x128xf32>
    %100 = vector.extract_strided_slice %83 {offsets = [0, 256], sizes = [2, 128], strides = [1, 1]} : vector<2x512xf32> to vector<2x128xf32>
    %101 = math.tanh %100 : vector<2x128xf32>
    %102 = vector.extract_strided_slice %83 {offsets = [0, 384], sizes = [2, 128], strides = [1, 1]} : vector<2x512xf32> to vector<2x128xf32>
    %cst_64 = arith.constant 5.000000e-01 : f32
    %103 = vector.broadcast %cst_64 : f32 to vector<2x128xf32>
    %104 = arith.mulf %103, %102 : vector<2x128xf32>
    %105 = math.tanh %104 : vector<2x128xf32>
    %cst_65 = arith.constant 5.000000e-01 : f32
    %106 = vector.broadcast %cst_65 : f32 to vector<2x128xf32>
    %107 = arith.mulf %106, %105 : vector<2x128xf32>
    %cst_66 = arith.constant 5.000000e-01 : f32
    %108 = vector.broadcast %cst_66 : f32 to vector<2x128xf32>
    %109 = arith.addf %107, %108 : vector<2x128xf32>
    %110 = arith.mulf %99, %41 : vector<2x128xf32>
    %111 = arith.mulf %91, %101 : vector<2x128xf32>
    %112 = arith.addf %110, %111 : vector<2x128xf32>
    %113 = math.tanh %112 : vector<2x128xf32>
    %114 = arith.mulf %109, %113 : vector<2x128xf32>
    %c0_67 = arith.constant 0 : index
    %c0_68 = arith.constant 0 : index
    %115 = vector.load %arg9[%c0_67, %c0_68] : memref<16x128xf32, #tpu.memory_space<vmem>>, vector<2x128xf32>
    tpu.vector_store %arg9[%c0_67, %c0_68], %114 {strides = array<i32>} : memref<16x128xf32, #tpu.memory_space<vmem>>, vector<2x128xf32>,
    %c2_69 = arith.constant 2 : index
    %c0_70 = arith.constant 0 : index
    %116 = vector.load %arg8[%c2_69, %c0_70] : memref<16x512xf32, #tpu.memory_space<vmem>>, vector<2x512xf32>
    %117 = arith.truncf %80 : vector<2x128xf32> to vector<2x128xbf16>
    %cst_71 = arith.constant dense<0.000000e+00> : vector<2x512xf32>
    %118 = tpu.matmul %117, %28, %cst_71 {dimension_numbers = #tpu.dot_dimension_numbers<[1], [0], [0], [1], [0, 0, 1, 1], [], []>} : vector<2x128xbf16>, vector<128x512xbf16>, vector<2x512xf32> -> vector<2x512xf32>
    %119 = arith.addf %116, %118 : vector<2x512xf32>
    %120 = arith.truncf %114 : vector<2x128xf32> to vector<2x128xbf16>
    %cst_72 = arith.constant dense<0.000000e+00> : vector<2x512xf32>
    %121 = tpu.matmul %120, %32, %cst_72 {dimension_numbers = #tpu.dot_dimension_numbers<[1], [0], [0], [1], [0, 0, 1, 1], [], []>} : vector<2x128xbf16>, vector<128x512xbf16>, vector<2x512xf32> -> vector<2x512xf32>
    %122 = vector.broadcast %33 : vector<1x512xf32> to vector<2x512xf32>
    %123 = arith.addf %121, %122 : vector<2x512xf32>
    %124 = vector.extract_strided_slice %119 {offsets = [0, 0], sizes = [2, 128], strides = [1, 1]} : vector<2x512xf32> to vector<2x128xf32>
    %cst_73 = arith.constant 5.000000e-01 : f32
    %125 = vector.broadcast %cst_73 : f32 to vector<2x128xf32>
    %126 = arith.mulf %125, %124 : vector<2x128xf32>
    %127 = math.tanh %126 : vector<2x128xf32>
    %cst_74 = arith.constant 5.000000e-01 : f32
    %128 = vector.broadcast %cst_74 : f32 to vector<2x128xf32>
    %129 = arith.mulf %128, %127 : vector<2x128xf32>
    %cst_75 = arith.constant 5.000000e-01 : f32
    %130 = vector.broadcast %cst_75 : f32 to vector<2x128xf32>
    %131 = arith.addf %129, %130 : vector<2x128xf32>
    %132 = vector.extract_strided_slice %119 {offsets = [0, 128], sizes = [2, 128], strides = [1, 1]} : vector<2x512xf32> to vector<2x128xf32>
    %cst_76 = arith.constant 5.000000e-01 : f32
    %133 = vector.broadcast %cst_76 : f32 to vector<2x128xf32>
    %134 = arith.mulf %133, %132 : vector<2x128xf32>
    %135 = math.tanh %134 : vector<2x128xf32>
    %cst_77 = arith.constant 5.000000e-01 : f32
    %136 = vector.broadcast %cst_77 : f32 to vector<2x128xf32>
    %137 = arith.mulf %136, %135 : vector<2x128xf32>
    %cst_78 = arith.constant 5.000000e-01 : f32
    %138 = vector.broadcast %cst_78 : f32 to vector<2x128xf32>
    %139 = arith.addf %137, %138 : vector<2x128xf32>
    %140 = vector.extract_strided_slice %119 {offsets = [0, 256], sizes = [2, 128], strides = [1, 1]} : vector<2x512xf32> to vector<2x128xf32>
    %141 = math.tanh %140 : vector<2x128xf32>
    %142 = vector.extract_strided_slice %119 {offsets = [0, 384], sizes = [2, 128], strides = [1, 1]} : vector<2x512xf32> to vector<2x128xf32>
    %cst_79 = arith.constant 5.000000e-01 : f32
    %143 = vector.broadcast %cst_79 : f32 to vector<2x128xf32>
    %144 = arith.mulf %143, %142 : vector<2x128xf32>
    %145 = math.tanh %144 : vector<2x128xf32>
    %cst_80 = arith.constant 5.000000e-01 : f32
    %146 = vector.broadcast %cst_80 : f32 to vector<2x128xf32>
    %147 = arith.mulf %146, %145 : vector<2x128xf32>
    %cst_81 = arith.constant 5.000000e-01 : f32
    %148 = vector.broadcast %cst_81 : f32 to vector<2x128xf32>
    %149 = arith.addf %147, %148 : vector<2x128xf32>
    %150 = arith.mulf %139, %78 : vector<2x128xf32>
    %151 = arith.mulf %131, %141 : vector<2x128xf32>
    %152 = arith.addf %150, %151 : vector<2x128xf32>
    %153 = math.tanh %152 : vector<2x128xf32>
    %154 = arith.mulf %149, %153 : vector<2x128xf32>
    %155 = arith.truncf %154 : vector<2x128xf32> to vector<2x128xbf16>
    %cst_82 = arith.constant dense<0.000000e+00> : vector<2x512xf32>
    %156 = tpu.matmul %155, %30, %cst_82 {dimension_numbers = #tpu.dot_dimension_numbers<[1], [0], [0], [1], [0, 0, 1, 1], [], []>} : vector<2x128xbf16>, vector<128x512xbf16>, vector<2x512xf32> -> vector<2x512xf32>
    %157 = arith.addf %156, %123 : vector<2x512xf32>
    %158 = vector.extract_strided_slice %157 {offsets = [0, 0], sizes = [2, 128], strides = [1, 1]} : vector<2x512xf32> to vector<2x128xf32>
    %cst_83 = arith.constant 5.000000e-01 : f32
    %159 = vector.broadcast %cst_83 : f32 to vector<2x128xf32>
    %160 = arith.mulf %159, %158 : vector<2x128xf32>
    %161 = math.tanh %160 : vector<2x128xf32>
    %cst_84 = arith.constant 5.000000e-01 : f32
    %162 = vector.broadcast %cst_84 : f32 to vector<2x128xf32>
    %163 = arith.mulf %162, %161 : vector<2x128xf32>
    %cst_85 = arith.constant 5.000000e-01 : f32
    %164 = vector.broadcast %cst_85 : f32 to vector<2x128xf32>
    %165 = arith.addf %163, %164 : vector<2x128xf32>
    %166 = vector.extract_strided_slice %157 {offsets = [0, 128], sizes = [2, 128], strides = [1, 1]} : vector<2x512xf32> to vector<2x128xf32>
    %cst_86 = arith.constant 5.000000e-01 : f32
    %167 = vector.broadcast %cst_86 : f32 to vector<2x128xf32>
    %168 = arith.mulf %167, %166 : vector<2x128xf32>
    %169 = math.tanh %168 : vector<2x128xf32>
    %cst_87 = arith.constant 5.000000e-01 : f32
    %170 = vector.broadcast %cst_87 : f32 to vector<2x128xf32>
    %171 = arith.mulf %170, %169 : vector<2x128xf32>
    %cst_88 = arith.constant 5.000000e-01 : f32
    %172 = vector.broadcast %cst_88 : f32 to vector<2x128xf32>
    %173 = arith.addf %171, %172 : vector<2x128xf32>
    %174 = vector.extract_strided_slice %157 {offsets = [0, 256], sizes = [2, 128], strides = [1, 1]} : vector<2x512xf32> to vector<2x128xf32>
    %175 = math.tanh %174 : vector<2x128xf32>
    %176 = vector.extract_strided_slice %157 {offsets = [0, 384], sizes = [2, 128], strides = [1, 1]} : vector<2x512xf32> to vector<2x128xf32>
    %cst_89 = arith.constant 5.000000e-01 : f32
    %177 = vector.broadcast %cst_89 : f32 to vector<2x128xf32>
    %178 = arith.mulf %177, %176 : vector<2x128xf32>
    %179 = math.tanh %178 : vector<2x128xf32>
    %cst_90 = arith.constant 5.000000e-01 : f32
    %180 = vector.broadcast %cst_90 : f32 to vector<2x128xf32>
    %181 = arith.mulf %180, %179 : vector<2x128xf32>
    %cst_91 = arith.constant 5.000000e-01 : f32
    %182 = vector.broadcast %cst_91 : f32 to vector<2x128xf32>
    %183 = arith.addf %181, %182 : vector<2x128xf32>
    %184 = arith.mulf %173, %112 : vector<2x128xf32>
    %185 = arith.mulf %165, %175 : vector<2x128xf32>
    %186 = arith.addf %184, %185 : vector<2x128xf32>
    %187 = math.tanh %186 : vector<2x128xf32>
    %188 = arith.mulf %183, %187 : vector<2x128xf32>
    %c2_92 = arith.constant 2 : index
    %c0_93 = arith.constant 0 : index
    %189 = vector.load %arg9[%c2_92, %c0_93] : memref<16x128xf32, #tpu.memory_space<vmem>>, vector<2x128xf32>
    tpu.vector_store %arg9[%c2_92, %c0_93], %188 {strides = array<i32>} : memref<16x128xf32, #tpu.memory_space<vmem>>, vector<2x128xf32>,
    %c4 = arith.constant 4 : index
    %c0_94 = arith.constant 0 : index
    %190 = vector.load %arg8[%c4, %c0_94] : memref<16x512xf32, #tpu.memory_space<vmem>>, vector<2x512xf32>
    %191 = arith.truncf %154 : vector<2x128xf32> to vector<2x128xbf16>
    %cst_95 = arith.constant dense<0.000000e+00> : vector<2x512xf32>
    %192 = tpu.matmul %191, %28, %cst_95 {dimension_numbers = #tpu.dot_dimension_numbers<[1], [0], [0], [1], [0, 0, 1, 1], [], []>} : vector<2x128xbf16>, vector<128x512xbf16>, vector<2x512xf32> -> vector<2x512xf32>
    %193 = arith.addf %190, %192 : vector<2x512xf32>
    %194 = arith.truncf %188 : vector<2x128xf32> to vector<2x128xbf16>
    %cst_96 = arith.constant dense<0.000000e+00> : vector<2x512xf32>
    %195 = tpu.matmul %194, %32, %cst_96 {dimension_numbers = #tpu.dot_dimension_numbers<[1], [0], [0], [1], [0, 0, 1, 1], [], []>} : vector<2x128xbf16>, vector<128x512xbf16>, vector<2x512xf32> -> vector<2x512xf32>
    %196 = vector.broadcast %33 : vector<1x512xf32> to vector<2x512xf32>
    %197 = arith.addf %195, %196 : vector<2x512xf32>
    %198 = vector.extract_strided_slice %193 {offsets = [0, 0], sizes = [2, 128], strides = [1, 1]} : vector<2x512xf32> to vector<2x128xf32>
    %cst_97 = arith.constant 5.000000e-01 : f32
    %199 = vector.broadcast %cst_97 : f32 to vector<2x128xf32>
    %200 = arith.mulf %199, %198 : vector<2x128xf32>
    %201 = math.tanh %200 : vector<2x128xf32>
    %cst_98 = arith.constant 5.000000e-01 : f32
    %202 = vector.broadcast %cst_98 : f32 to vector<2x128xf32>
    %203 = arith.mulf %202, %201 : vector<2x128xf32>
    %cst_99 = arith.constant 5.000000e-01 : f32
    %204 = vector.broadcast %cst_99 : f32 to vector<2x128xf32>
    %205 = arith.addf %203, %204 : vector<2x128xf32>
    %206 = vector.extract_strided_slice %193 {offsets = [0, 128], sizes = [2, 128], strides = [1, 1]} : vector<2x512xf32> to vector<2x128xf32>
    %cst_100 = arith.constant 5.000000e-01 : f32
    %207 = vector.broadcast %cst_100 : f32 to vector<2x128xf32>
    %208 = arith.mulf %207, %206 : vector<2x128xf32>
    %209 = math.tanh %208 : vector<2x128xf32>
    %cst_101 = arith.constant 5.000000e-01 : f32
    %210 = vector.broadcast %cst_101 : f32 to vector<2x128xf32>
    %211 = arith.mulf %210, %209 : vector<2x128xf32>
    %cst_102 = arith.constant 5.000000e-01 : f32
    %212 = vector.broadcast %cst_102 : f32 to vector<2x128xf32>
    %213 = arith.addf %211, %212 : vector<2x128xf32>
    %214 = vector.extract_strided_slice %193 {offsets = [0, 256], sizes = [2, 128], strides = [1, 1]} : vector<2x512xf32> to vector<2x128xf32>
    %215 = math.tanh %214 : vector<2x128xf32>
    %216 = vector.extract_strided_slice %193 {offsets = [0, 384], sizes = [2, 128], strides = [1, 1]} : vector<2x512xf32> to vector<2x128xf32>
    %cst_103 = arith.constant 5.000000e-01 : f32
    %217 = vector.broadcast %cst_103 : f32 to vector<2x128xf32>
    %218 = arith.mulf %217, %216 : vector<2x128xf32>
    %219 = math.tanh %218 : vector<2x128xf32>
    %cst_104 = arith.constant 5.000000e-01 : f32
    %220 = vector.broadcast %cst_104 : f32 to vector<2x128xf32>
    %221 = arith.mulf %220, %219 : vector<2x128xf32>
    %cst_105 = arith.constant 5.000000e-01 : f32
    %222 = vector.broadcast %cst_105 : f32 to vector<2x128xf32>
    %223 = arith.addf %221, %222 : vector<2x128xf32>
    %224 = arith.mulf %213, %152 : vector<2x128xf32>
    %225 = arith.mulf %205, %215 : vector<2x128xf32>
    %226 = arith.addf %224, %225 : vector<2x128xf32>
    %227 = math.tanh %226 : vector<2x128xf32>
    %228 = arith.mulf %223, %227 : vector<2x128xf32>
    %229 = arith.truncf %228 : vector<2x128xf32> to vector<2x128xbf16>
    %cst_106 = arith.constant dense<0.000000e+00> : vector<2x512xf32>
    %230 = tpu.matmul %229, %30, %cst_106 {dimension_numbers = #tpu.dot_dimension_numbers<[1], [0], [0], [1], [0, 0, 1, 1], [], []>} : vector<2x128xbf16>, vector<128x512xbf16>, vector<2x512xf32> -> vector<2x512xf32>
    %231 = arith.addf %230, %197 : vector<2x512xf32>
    %232 = vector.extract_strided_slice %231 {offsets = [0, 0], sizes = [2, 128], strides = [1, 1]} : vector<2x512xf32> to vector<2x128xf32>
    %cst_107 = arith.constant 5.000000e-01 : f32
    %233 = vector.broadcast %cst_107 : f32 to vector<2x128xf32>
    %234 = arith.mulf %233, %232 : vector<2x128xf32>
    %235 = math.tanh %234 : vector<2x128xf32>
    %cst_108 = arith.constant 5.000000e-01 : f32
    %236 = vector.broadcast %cst_108 : f32 to vector<2x128xf32>
    %237 = arith.mulf %236, %235 : vector<2x128xf32>
    %cst_109 = arith.constant 5.000000e-01 : f32
    %238 = vector.broadcast %cst_109 : f32 to vector<2x128xf32>
    %239 = arith.addf %237, %238 : vector<2x128xf32>
    %240 = vector.extract_strided_slice %231 {offsets = [0, 128], sizes = [2, 128], strides = [1, 1]} : vector<2x512xf32> to vector<2x128xf32>
    %cst_110 = arith.constant 5.000000e-01 : f32
    %241 = vector.broadcast %cst_110 : f32 to vector<2x128xf32>
    %242 = arith.mulf %241, %240 : vector<2x128xf32>
    %243 = math.tanh %242 : vector<2x128xf32>
    %cst_111 = arith.constant 5.000000e-01 : f32
    %244 = vector.broadcast %cst_111 : f32 to vector<2x128xf32>
    %245 = arith.mulf %244, %243 : vector<2x128xf32>
    %cst_112 = arith.constant 5.000000e-01 : f32
    %246 = vector.broadcast %cst_112 : f32 to vector<2x128xf32>
    %247 = arith.addf %245, %246 : vector<2x128xf32>
    %248 = vector.extract_strided_slice %231 {offsets = [0, 256], sizes = [2, 128], strides = [1, 1]} : vector<2x512xf32> to vector<2x128xf32>
    %249 = math.tanh %248 : vector<2x128xf32>
    %250 = vector.extract_strided_slice %231 {offsets = [0, 384], sizes = [2, 128], strides = [1, 1]} : vector<2x512xf32> to vector<2x128xf32>
    %cst_113 = arith.constant 5.000000e-01 : f32
    %251 = vector.broadcast %cst_113 : f32 to vector<2x128xf32>
    %252 = arith.mulf %251, %250 : vector<2x128xf32>
    %253 = math.tanh %252 : vector<2x128xf32>
    %cst_114 = arith.constant 5.000000e-01 : f32
    %254 = vector.broadcast %cst_114 : f32 to vector<2x128xf32>
    %255 = arith.mulf %254, %253 : vector<2x128xf32>
    %cst_115 = arith.constant 5.000000e-01 : f32
    %256 = vector.broadcast %cst_115 : f32 to vector<2x128xf32>
    %257 = arith.addf %255, %256 : vector<2x128xf32>
    %258 = arith.mulf %247, %186 : vector<2x128xf32>
    %259 = arith.mulf %239, %249 : vector<2x128xf32>
    %260 = arith.addf %258, %259 : vector<2x128xf32>
    %261 = math.tanh %260 : vector<2x128xf32>
    %262 = arith.mulf %257, %261 : vector<2x128xf32>
    %c4_116 = arith.constant 4 : index
    %c0_117 = arith.constant 0 : index
    %263 = vector.load %arg9[%c4_116, %c0_117] : memref<16x128xf32, #tpu.memory_space<vmem>>, vector<2x128xf32>
    tpu.vector_store %arg9[%c4_116, %c0_117], %262 {strides = array<i32>} : memref<16x128xf32, #tpu.memory_space<vmem>>, vector<2x128xf32>,
    %c6 = arith.constant 6 : index
    %c0_118 = arith.constant 0 : index
    %264 = vector.load %arg8[%c6, %c0_118] : memref<16x512xf32, #tpu.memory_space<vmem>>, vector<2x512xf32>
    %265 = arith.truncf %228 : vector<2x128xf32> to vector<2x128xbf16>
    %cst_119 = arith.constant dense<0.000000e+00> : vector<2x512xf32>
    %266 = tpu.matmul %265, %28, %cst_119 {dimension_numbers = #tpu.dot_dimension_numbers<[1], [0], [0], [1], [0, 0, 1, 1], [], []>} : vector<2x128xbf16>, vector<128x512xbf16>, vector<2x512xf32> -> vector<2x512xf32>
    %267 = arith.addf %264, %266 : vector<2x512xf32>
    %268 = arith.truncf %262 : vector<2x128xf32> to vector<2x128xbf16>
    %cst_120 = arith.constant dense<0.000000e+00> : vector<2x512xf32>
    %269 = tpu.matmul %268, %32, %cst_120 {dimension_numbers = #tpu.dot_dimension_numbers<[1], [0], [0], [1], [0, 0, 1, 1], [], []>} : vector<2x128xbf16>, vector<128x512xbf16>, vector<2x512xf32> -> vector<2x512xf32>
    %270 = vector.broadcast %33 : vector<1x512xf32> to vector<2x512xf32>
    %271 = arith.addf %269, %270 : vector<2x512xf32>
    %272 = vector.extract_strided_slice %267 {offsets = [0, 0], sizes = [2, 128], strides = [1, 1]} : vector<2x512xf32> to vector<2x128xf32>
    %cst_121 = arith.constant 5.000000e-01 : f32
    %273 = vector.broadcast %cst_121 : f32 to vector<2x128xf32>
    %274 = arith.mulf %273, %272 : vector<2x128xf32>
    %275 = math.tanh %274 : vector<2x128xf32>
    %cst_122 = arith.constant 5.000000e-01 : f32
    %276 = vector.broadcast %cst_122 : f32 to vector<2x128xf32>
    %277 = arith.mulf %276, %275 : vector<2x128xf32>
    %cst_123 = arith.constant 5.000000e-01 : f32
    %278 = vector.broadcast %cst_123 : f32 to vector<2x128xf32>
    %279 = arith.addf %277, %278 : vector<2x128xf32>
    %280 = vector.extract_strided_slice %267 {offsets = [0, 128], sizes = [2, 128], strides = [1, 1]} : vector<2x512xf32> to vector<2x128xf32>
    %cst_124 = arith.constant 5.000000e-01 : f32
    %281 = vector.broadcast %cst_124 : f32 to vector<2x128xf32>
    %282 = arith.mulf %281, %280 : vector<2x128xf32>
    %283 = math.tanh %282 : vector<2x128xf32>
    %cst_125 = arith.constant 5.000000e-01 : f32
    %284 = vector.broadcast %cst_125 : f32 to vector<2x128xf32>
    %285 = arith.mulf %284, %283 : vector<2x128xf32>
    %cst_126 = arith.constant 5.000000e-01 : f32
    %286 = vector.broadcast %cst_126 : f32 to vector<2x128xf32>
    %287 = arith.addf %285, %286 : vector<2x128xf32>
    %288 = vector.extract_strided_slice %267 {offsets = [0, 256], sizes = [2, 128], strides = [1, 1]} : vector<2x512xf32> to vector<2x128xf32>
    %289 = math.tanh %288 : vector<2x128xf32>
    %290 = vector.extract_strided_slice %267 {offsets = [0, 384], sizes = [2, 128], strides = [1, 1]} : vector<2x512xf32> to vector<2x128xf32>
    %cst_127 = arith.constant 5.000000e-01 : f32
    %291 = vector.broadcast %cst_127 : f32 to vector<2x128xf32>
    %292 = arith.mulf %291, %290 : vector<2x128xf32>
    %293 = math.tanh %292 : vector<2x128xf32>
    %cst_128 = arith.constant 5.000000e-01 : f32
    %294 = vector.broadcast %cst_128 : f32 to vector<2x128xf32>
    %295 = arith.mulf %294, %293 : vector<2x128xf32>
    %cst_129 = arith.constant 5.000000e-01 : f32
    %296 = vector.broadcast %cst_129 : f32 to vector<2x128xf32>
    %297 = arith.addf %295, %296 : vector<2x128xf32>
    %298 = arith.mulf %287, %226 : vector<2x128xf32>
    %299 = arith.mulf %279, %289 : vector<2x128xf32>
    %300 = arith.addf %298, %299 : vector<2x128xf32>
    %301 = math.tanh %300 : vector<2x128xf32>
    %302 = arith.mulf %297, %301 : vector<2x128xf32>
    %303 = arith.truncf %302 : vector<2x128xf32> to vector<2x128xbf16>
    %cst_130 = arith.constant dense<0.000000e+00> : vector<2x512xf32>
    %304 = tpu.matmul %303, %30, %cst_130 {dimension_numbers = #tpu.dot_dimension_numbers<[1], [0], [0], [1], [0, 0, 1, 1], [], []>} : vector<2x128xbf16>, vector<128x512xbf16>, vector<2x512xf32> -> vector<2x512xf32>
    %305 = arith.addf %304, %271 : vector<2x512xf32>
    %306 = vector.extract_strided_slice %305 {offsets = [0, 0], sizes = [2, 128], strides = [1, 1]} : vector<2x512xf32> to vector<2x128xf32>
    %cst_131 = arith.constant 5.000000e-01 : f32
    %307 = vector.broadcast %cst_131 : f32 to vector<2x128xf32>
    %308 = arith.mulf %307, %306 : vector<2x128xf32>
    %309 = math.tanh %308 : vector<2x128xf32>
    %cst_132 = arith.constant 5.000000e-01 : f32
    %310 = vector.broadcast %cst_132 : f32 to vector<2x128xf32>
    %311 = arith.mulf %310, %309 : vector<2x128xf32>
    %cst_133 = arith.constant 5.000000e-01 : f32
    %312 = vector.broadcast %cst_133 : f32 to vector<2x128xf32>
    %313 = arith.addf %311, %312 : vector<2x128xf32>
    %314 = vector.extract_strided_slice %305 {offsets = [0, 128], sizes = [2, 128], strides = [1, 1]} : vector<2x512xf32> to vector<2x128xf32>
    %cst_134 = arith.constant 5.000000e-01 : f32
    %315 = vector.broadcast %cst_134 : f32 to vector<2x128xf32>
    %316 = arith.mulf %315, %314 : vector<2x128xf32>
    %317 = math.tanh %316 : vector<2x128xf32>
    %cst_135 = arith.constant 5.000000e-01 : f32
    %318 = vector.broadcast %cst_135 : f32 to vector<2x128xf32>
    %319 = arith.mulf %318, %317 : vector<2x128xf32>
    %cst_136 = arith.constant 5.000000e-01 : f32
    %320 = vector.broadcast %cst_136 : f32 to vector<2x128xf32>
    %321 = arith.addf %319, %320 : vector<2x128xf32>
    %322 = vector.extract_strided_slice %305 {offsets = [0, 256], sizes = [2, 128], strides = [1, 1]} : vector<2x512xf32> to vector<2x128xf32>
    %323 = math.tanh %322 : vector<2x128xf32>
    %324 = vector.extract_strided_slice %305 {offsets = [0, 384], sizes = [2, 128], strides = [1, 1]} : vector<2x512xf32> to vector<2x128xf32>
    %cst_137 = arith.constant 5.000000e-01 : f32
    %325 = vector.broadcast %cst_137 : f32 to vector<2x128xf32>
    %326 = arith.mulf %325, %324 : vector<2x128xf32>
    %327 = math.tanh %326 : vector<2x128xf32>
    %cst_138 = arith.constant 5.000000e-01 : f32
    %328 = vector.broadcast %cst_138 : f32 to vector<2x128xf32>
    %329 = arith.mulf %328, %327 : vector<2x128xf32>
    %cst_139 = arith.constant 5.000000e-01 : f32
    %330 = vector.broadcast %cst_139 : f32 to vector<2x128xf32>
    %331 = arith.addf %329, %330 : vector<2x128xf32>
    %332 = arith.mulf %321, %260 : vector<2x128xf32>
    %333 = arith.mulf %313, %323 : vector<2x128xf32>
    %334 = arith.addf %332, %333 : vector<2x128xf32>
    %335 = math.tanh %334 : vector<2x128xf32>
    %336 = arith.mulf %331, %335 : vector<2x128xf32>
    %c6_140 = arith.constant 6 : index
    %c0_141 = arith.constant 0 : index
    %337 = vector.load %arg9[%c6_140, %c0_141] : memref<16x128xf32, #tpu.memory_space<vmem>>, vector<2x128xf32>
    tpu.vector_store %arg9[%c6_140, %c0_141], %336 {strides = array<i32>} : memref<16x128xf32, #tpu.memory_space<vmem>>, vector<2x128xf32>,
    %c8 = arith.constant 8 : index
    %c0_142 = arith.constant 0 : index
    %338 = vector.load %arg8[%c8, %c0_142] : memref<16x512xf32, #tpu.memory_space<vmem>>, vector<2x512xf32>
    %339 = arith.truncf %302 : vector<2x128xf32> to vector<2x128xbf16>
    %cst_143 = arith.constant dense<0.000000e+00> : vector<2x512xf32>
    %340 = tpu.matmul %339, %28, %cst_143 {dimension_numbers = #tpu.dot_dimension_numbers<[1], [0], [0], [1], [0, 0, 1, 1], [], []>} : vector<2x128xbf16>, vector<128x512xbf16>, vector<2x512xf32> -> vector<2x512xf32>
    %341 = arith.addf %338, %340 : vector<2x512xf32>
    %342 = arith.truncf %336 : vector<2x128xf32> to vector<2x128xbf16>
    %cst_144 = arith.constant dense<0.000000e+00> : vector<2x512xf32>
    %343 = tpu.matmul %342, %32, %cst_144 {dimension_numbers = #tpu.dot_dimension_numbers<[1], [0], [0], [1], [0, 0, 1, 1], [], []>} : vector<2x128xbf16>, vector<128x512xbf16>, vector<2x512xf32> -> vector<2x512xf32>
    %344 = vector.broadcast %33 : vector<1x512xf32> to vector<2x512xf32>
    %345 = arith.addf %343, %344 : vector<2x512xf32>
    %346 = vector.extract_strided_slice %341 {offsets = [0, 0], sizes = [2, 128], strides = [1, 1]} : vector<2x512xf32> to vector<2x128xf32>
    %cst_145 = arith.constant 5.000000e-01 : f32
    %347 = vector.broadcast %cst_145 : f32 to vector<2x128xf32>
    %348 = arith.mulf %347, %346 : vector<2x128xf32>
    %349 = math.tanh %348 : vector<2x128xf32>
    %cst_146 = arith.constant 5.000000e-01 : f32
    %350 = vector.broadcast %cst_146 : f32 to vector<2x128xf32>
    %351 = arith.mulf %350, %349 : vector<2x128xf32>
    %cst_147 = arith.constant 5.000000e-01 : f32
    %352 = vector.broadcast %cst_147 : f32 to vector<2x128xf32>
    %353 = arith.addf %351, %352 : vector<2x128xf32>
    %354 = vector.extract_strided_slice %341 {offsets = [0, 128], sizes = [2, 128], strides = [1, 1]} : vector<2x512xf32> to vector<2x128xf32>
    %cst_148 = arith.constant 5.000000e-01 : f32
    %355 = vector.broadcast %cst_148 : f32 to vector<2x128xf32>
    %356 = arith.mulf %355, %354 : vector<2x128xf32>
    %357 = math.tanh %356 : vector<2x128xf32>
    %cst_149 = arith.constant 5.000000e-01 : f32
    %358 = vector.broadcast %cst_149 : f32 to vector<2x128xf32>
    %359 = arith.mulf %358, %357 : vector<2x128xf32>
    %cst_150 = arith.constant 5.000000e-01 : f32
    %360 = vector.broadcast %cst_150 : f32 to vector<2x128xf32>
    %361 = arith.addf %359, %360 : vector<2x128xf32>
    %362 = vector.extract_strided_slice %341 {offsets = [0, 256], sizes = [2, 128], strides = [1, 1]} : vector<2x512xf32> to vector<2x128xf32>
    %363 = math.tanh %362 : vector<2x128xf32>
    %364 = vector.extract_strided_slice %341 {offsets = [0, 384], sizes = [2, 128], strides = [1, 1]} : vector<2x512xf32> to vector<2x128xf32>
    %cst_151 = arith.constant 5.000000e-01 : f32
    %365 = vector.broadcast %cst_151 : f32 to vector<2x128xf32>
    %366 = arith.mulf %365, %364 : vector<2x128xf32>
    %367 = math.tanh %366 : vector<2x128xf32>
    %cst_152 = arith.constant 5.000000e-01 : f32
    %368 = vector.broadcast %cst_152 : f32 to vector<2x128xf32>
    %369 = arith.mulf %368, %367 : vector<2x128xf32>
    %cst_153 = arith.constant 5.000000e-01 : f32
    %370 = vector.broadcast %cst_153 : f32 to vector<2x128xf32>
    %371 = arith.addf %369, %370 : vector<2x128xf32>
    %372 = arith.mulf %361, %300 : vector<2x128xf32>
    %373 = arith.mulf %353, %363 : vector<2x128xf32>
    %374 = arith.addf %372, %373 : vector<2x128xf32>
    %375 = math.tanh %374 : vector<2x128xf32>
    %376 = arith.mulf %371, %375 : vector<2x128xf32>
    %377 = arith.truncf %376 : vector<2x128xf32> to vector<2x128xbf16>
    %cst_154 = arith.constant dense<0.000000e+00> : vector<2x512xf32>
    %378 = tpu.matmul %377, %30, %cst_154 {dimension_numbers = #tpu.dot_dimension_numbers<[1], [0], [0], [1], [0, 0, 1, 1], [], []>} : vector<2x128xbf16>, vector<128x512xbf16>, vector<2x512xf32> -> vector<2x512xf32>
    %379 = arith.addf %378, %345 : vector<2x512xf32>
    %380 = vector.extract_strided_slice %379 {offsets = [0, 0], sizes = [2, 128], strides = [1, 1]} : vector<2x512xf32> to vector<2x128xf32>
    %cst_155 = arith.constant 5.000000e-01 : f32
    %381 = vector.broadcast %cst_155 : f32 to vector<2x128xf32>
    %382 = arith.mulf %381, %380 : vector<2x128xf32>
    %383 = math.tanh %382 : vector<2x128xf32>
    %cst_156 = arith.constant 5.000000e-01 : f32
    %384 = vector.broadcast %cst_156 : f32 to vector<2x128xf32>
    %385 = arith.mulf %384, %383 : vector<2x128xf32>
    %cst_157 = arith.constant 5.000000e-01 : f32
    %386 = vector.broadcast %cst_157 : f32 to vector<2x128xf32>
    %387 = arith.addf %385, %386 : vector<2x128xf32>
    %388 = vector.extract_strided_slice %379 {offsets = [0, 128], sizes = [2, 128], strides = [1, 1]} : vector<2x512xf32> to vector<2x128xf32>
    %cst_158 = arith.constant 5.000000e-01 : f32
    %389 = vector.broadcast %cst_158 : f32 to vector<2x128xf32>
    %390 = arith.mulf %389, %388 : vector<2x128xf32>
    %391 = math.tanh %390 : vector<2x128xf32>
    %cst_159 = arith.constant 5.000000e-01 : f32
    %392 = vector.broadcast %cst_159 : f32 to vector<2x128xf32>
    %393 = arith.mulf %392, %391 : vector<2x128xf32>
    %cst_160 = arith.constant 5.000000e-01 : f32
    %394 = vector.broadcast %cst_160 : f32 to vector<2x128xf32>
    %395 = arith.addf %393, %394 : vector<2x128xf32>
    %396 = vector.extract_strided_slice %379 {offsets = [0, 256], sizes = [2, 128], strides = [1, 1]} : vector<2x512xf32> to vector<2x128xf32>
    %397 = math.tanh %396 : vector<2x128xf32>
    %398 = vector.extract_strided_slice %379 {offsets = [0, 384], sizes = [2, 128], strides = [1, 1]} : vector<2x512xf32> to vector<2x128xf32>
    %cst_161 = arith.constant 5.000000e-01 : f32
    %399 = vector.broadcast %cst_161 : f32 to vector<2x128xf32>
    %400 = arith.mulf %399, %398 : vector<2x128xf32>
    %401 = math.tanh %400 : vector<2x128xf32>
    %cst_162 = arith.constant 5.000000e-01 : f32
    %402 = vector.broadcast %cst_162 : f32 to vector<2x128xf32>
    %403 = arith.mulf %402, %401 : vector<2x128xf32>
    %cst_163 = arith.constant 5.000000e-01 : f32
    %404 = vector.broadcast %cst_163 : f32 to vector<2x128xf32>
    %405 = arith.addf %403, %404 : vector<2x128xf32>
    %406 = arith.mulf %395, %334 : vector<2x128xf32>
    %407 = arith.mulf %387, %397 : vector<2x128xf32>
    %408 = arith.addf %406, %407 : vector<2x128xf32>
    %409 = math.tanh %408 : vector<2x128xf32>
    %410 = arith.mulf %405, %409 : vector<2x128xf32>
    %c8_164 = arith.constant 8 : index
    %c0_165 = arith.constant 0 : index
    %411 = vector.load %arg9[%c8_164, %c0_165] : memref<16x128xf32, #tpu.memory_space<vmem>>, vector<2x128xf32>
    tpu.vector_store %arg9[%c8_164, %c0_165], %410 {strides = array<i32>} : memref<16x128xf32, #tpu.memory_space<vmem>>, vector<2x128xf32>,
    %c10 = arith.constant 10 : index
    %c0_166 = arith.constant 0 : index
    %412 = vector.load %arg8[%c10, %c0_166] : memref<16x512xf32, #tpu.memory_space<vmem>>, vector<2x512xf32>
    %413 = arith.truncf %376 : vector<2x128xf32> to vector<2x128xbf16>
    %cst_167 = arith.constant dense<0.000000e+00> : vector<2x512xf32>
    %414 = tpu.matmul %413, %28, %cst_167 {dimension_numbers = #tpu.dot_dimension_numbers<[1], [0], [0], [1], [0, 0, 1, 1], [], []>} : vector<2x128xbf16>, vector<128x512xbf16>, vector<2x512xf32> -> vector<2x512xf32>
    %415 = arith.addf %412, %414 : vector<2x512xf32>
    %416 = arith.truncf %410 : vector<2x128xf32> to vector<2x128xbf16>
    %cst_168 = arith.constant dense<0.000000e+00> : vector<2x512xf32>
    %417 = tpu.matmul %416, %32, %cst_168 {dimension_numbers = #tpu.dot_dimension_numbers<[1], [0], [0], [1], [0, 0, 1, 1], [], []>} : vector<2x128xbf16>, vector<128x512xbf16>, vector<2x512xf32> -> vector<2x512xf32>
    %418 = vector.broadcast %33 : vector<1x512xf32> to vector<2x512xf32>
    %419 = arith.addf %417, %418 : vector<2x512xf32>
    %420 = vector.extract_strided_slice %415 {offsets = [0, 0], sizes = [2, 128], strides = [1, 1]} : vector<2x512xf32> to vector<2x128xf32>
    %cst_169 = arith.constant 5.000000e-01 : f32
    %421 = vector.broadcast %cst_169 : f32 to vector<2x128xf32>
    %422 = arith.mulf %421, %420 : vector<2x128xf32>
    %423 = math.tanh %422 : vector<2x128xf32>
    %cst_170 = arith.constant 5.000000e-01 : f32
    %424 = vector.broadcast %cst_170 : f32 to vector<2x128xf32>
    %425 = arith.mulf %424, %423 : vector<2x128xf32>
    %cst_171 = arith.constant 5.000000e-01 : f32
    %426 = vector.broadcast %cst_171 : f32 to vector<2x128xf32>
    %427 = arith.addf %425, %426 : vector<2x128xf32>
    %428 = vector.extract_strided_slice %415 {offsets = [0, 128], sizes = [2, 128], strides = [1, 1]} : vector<2x512xf32> to vector<2x128xf32>
    %cst_172 = arith.constant 5.000000e-01 : f32
    %429 = vector.broadcast %cst_172 : f32 to vector<2x128xf32>
    %430 = arith.mulf %429, %428 : vector<2x128xf32>
    %431 = math.tanh %430 : vector<2x128xf32>
    %cst_173 = arith.constant 5.000000e-01 : f32
    %432 = vector.broadcast %cst_173 : f32 to vector<2x128xf32>
    %433 = arith.mulf %432, %431 : vector<2x128xf32>
    %cst_174 = arith.constant 5.000000e-01 : f32
    %434 = vector.broadcast %cst_174 : f32 to vector<2x128xf32>
    %435 = arith.addf %433, %434 : vector<2x128xf32>
    %436 = vector.extract_strided_slice %415 {offsets = [0, 256], sizes = [2, 128], strides = [1, 1]} : vector<2x512xf32> to vector<2x128xf32>
    %437 = math.tanh %436 : vector<2x128xf32>
    %438 = vector.extract_strided_slice %415 {offsets = [0, 384], sizes = [2, 128], strides = [1, 1]} : vector<2x512xf32> to vector<2x128xf32>
    %cst_175 = arith.constant 5.000000e-01 : f32
    %439 = vector.broadcast %cst_175 : f32 to vector<2x128xf32>
    %440 = arith.mulf %439, %438 : vector<2x128xf32>
    %441 = math.tanh %440 : vector<2x128xf32>
    %cst_176 = arith.constant 5.000000e-01 : f32
    %442 = vector.broadcast %cst_176 : f32 to vector<2x128xf32>
    %443 = arith.mulf %442, %441 : vector<2x128xf32>
    %cst_177 = arith.constant 5.000000e-01 : f32
    %444 = vector.broadcast %cst_177 : f32 to vector<2x128xf32>
    %445 = arith.addf %443, %444 : vector<2x128xf32>
    %446 = arith.mulf %435, %374 : vector<2x128xf32>
    %447 = arith.mulf %427, %437 : vector<2x128xf32>
    %448 = arith.addf %446, %447 : vector<2x128xf32>
    %449 = math.tanh %448 : vector<2x128xf32>
    %450 = arith.mulf %445, %449 : vector<2x128xf32>
    %451 = arith.truncf %450 : vector<2x128xf32> to vector<2x128xbf16>
    %cst_178 = arith.constant dense<0.000000e+00> : vector<2x512xf32>
    %452 = tpu.matmul %451, %30, %cst_178 {dimension_numbers = #tpu.dot_dimension_numbers<[1], [0], [0], [1], [0, 0, 1, 1], [], []>} : vector<2x128xbf16>, vector<128x512xbf16>, vector<2x512xf32> -> vector<2x512xf32>
    %453 = arith.addf %452, %419 : vector<2x512xf32>
    %454 = vector.extract_strided_slice %453 {offsets = [0, 0], sizes = [2, 128], strides = [1, 1]} : vector<2x512xf32> to vector<2x128xf32>
    %cst_179 = arith.constant 5.000000e-01 : f32
    %455 = vector.broadcast %cst_179 : f32 to vector<2x128xf32>
    %456 = arith.mulf %455, %454 : vector<2x128xf32>
    %457 = math.tanh %456 : vector<2x128xf32>
    %cst_180 = arith.constant 5.000000e-01 : f32
    %458 = vector.broadcast %cst_180 : f32 to vector<2x128xf32>
    %459 = arith.mulf %458, %457 : vector<2x128xf32>
    %cst_181 = arith.constant 5.000000e-01 : f32
    %460 = vector.broadcast %cst_181 : f32 to vector<2x128xf32>
    %461 = arith.addf %459, %460 : vector<2x128xf32>
    %462 = vector.extract_strided_slice %453 {offsets = [0, 128], sizes = [2, 128], strides = [1, 1]} : vector<2x512xf32> to vector<2x128xf32>
    %cst_182 = arith.constant 5.000000e-01 : f32
    %463 = vector.broadcast %cst_182 : f32 to vector<2x128xf32>
    %464 = arith.mulf %463, %462 : vector<2x128xf32>
    %465 = math.tanh %464 : vector<2x128xf32>
    %cst_183 = arith.constant 5.000000e-01 : f32
    %466 = vector.broadcast %cst_183 : f32 to vector<2x128xf32>
    %467 = arith.mulf %466, %465 : vector<2x128xf32>
    %cst_184 = arith.constant 5.000000e-01 : f32
    %468 = vector.broadcast %cst_184 : f32 to vector<2x128xf32>
    %469 = arith.addf %467, %468 : vector<2x128xf32>
    %470 = vector.extract_strided_slice %453 {offsets = [0, 256], sizes = [2, 128], strides = [1, 1]} : vector<2x512xf32> to vector<2x128xf32>
    %471 = math.tanh %470 : vector<2x128xf32>
    %472 = vector.extract_strided_slice %453 {offsets = [0, 384], sizes = [2, 128], strides = [1, 1]} : vector<2x512xf32> to vector<2x128xf32>
    %cst_185 = arith.constant 5.000000e-01 : f32
    %473 = vector.broadcast %cst_185 : f32 to vector<2x128xf32>
    %474 = arith.mulf %473, %472 : vector<2x128xf32>
    %475 = math.tanh %474 : vector<2x128xf32>
    %cst_186 = arith.constant 5.000000e-01 : f32
    %476 = vector.broadcast %cst_186 : f32 to vector<2x128xf32>
    %477 = arith.mulf %476, %475 : vector<2x128xf32>
    %cst_187 = arith.constant 5.000000e-01 : f32
    %478 = vector.broadcast %cst_187 : f32 to vector<2x128xf32>
    %479 = arith.addf %477, %478 : vector<2x128xf32>
    %480 = arith.mulf %469, %408 : vector<2x128xf32>
    %481 = arith.mulf %461, %471 : vector<2x128xf32>
    %482 = arith.addf %480, %481 : vector<2x128xf32>
    %483 = math.tanh %482 : vector<2x128xf32>
    %484 = arith.mulf %479, %483 : vector<2x128xf32>
    %c10_188 = arith.constant 10 : index
    %c0_189 = arith.constant 0 : index
    %485 = vector.load %arg9[%c10_188, %c0_189] : memref<16x128xf32, #tpu.memory_space<vmem>>, vector<2x128xf32>
    tpu.vector_store %arg9[%c10_188, %c0_189], %484 {strides = array<i32>} : memref<16x128xf32, #tpu.memory_space<vmem>>, vector<2x128xf32>,
    %c12 = arith.constant 12 : index
    %c0_190 = arith.constant 0 : index
    %486 = vector.load %arg8[%c12, %c0_190] : memref<16x512xf32, #tpu.memory_space<vmem>>, vector<2x512xf32>
    %487 = arith.truncf %450 : vector<2x128xf32> to vector<2x128xbf16>
    %cst_191 = arith.constant dense<0.000000e+00> : vector<2x512xf32>
    %488 = tpu.matmul %487, %28, %cst_191 {dimension_numbers = #tpu.dot_dimension_numbers<[1], [0], [0], [1], [0, 0, 1, 1], [], []>} : vector<2x128xbf16>, vector<128x512xbf16>, vector<2x512xf32> -> vector<2x512xf32>
    %489 = arith.addf %486, %488 : vector<2x512xf32>
    %490 = arith.truncf %484 : vector<2x128xf32> to vector<2x128xbf16>
    %cst_192 = arith.constant dense<0.000000e+00> : vector<2x512xf32>
    %491 = tpu.matmul %490, %32, %cst_192 {dimension_numbers = #tpu.dot_dimension_numbers<[1], [0], [0], [1], [0, 0, 1, 1], [], []>} : vector<2x128xbf16>, vector<128x512xbf16>, vector<2x512xf32> -> vector<2x512xf32>
    %492 = vector.broadcast %33 : vector<1x512xf32> to vector<2x512xf32>
    %493 = arith.addf %491, %492 : vector<2x512xf32>
    %494 = vector.extract_strided_slice %489 {offsets = [0, 0], sizes = [2, 128], strides = [1, 1]} : vector<2x512xf32> to vector<2x128xf32>
    %cst_193 = arith.constant 5.000000e-01 : f32
    %495 = vector.broadcast %cst_193 : f32 to vector<2x128xf32>
    %496 = arith.mulf %495, %494 : vector<2x128xf32>
    %497 = math.tanh %496 : vector<2x128xf32>
    %cst_194 = arith.constant 5.000000e-01 : f32
    %498 = vector.broadcast %cst_194 : f32 to vector<2x128xf32>
    %499 = arith.mulf %498, %497 : vector<2x128xf32>
    %cst_195 = arith.constant 5.000000e-01 : f32
    %500 = vector.broadcast %cst_195 : f32 to vector<2x128xf32>
    %501 = arith.addf %499, %500 : vector<2x128xf32>
    %502 = vector.extract_strided_slice %489 {offsets = [0, 128], sizes = [2, 128], strides = [1, 1]} : vector<2x512xf32> to vector<2x128xf32>
    %cst_196 = arith.constant 5.000000e-01 : f32
    %503 = vector.broadcast %cst_196 : f32 to vector<2x128xf32>
    %504 = arith.mulf %503, %502 : vector<2x128xf32>
    %505 = math.tanh %504 : vector<2x128xf32>
    %cst_197 = arith.constant 5.000000e-01 : f32
    %506 = vector.broadcast %cst_197 : f32 to vector<2x128xf32>
    %507 = arith.mulf %506, %505 : vector<2x128xf32>
    %cst_198 = arith.constant 5.000000e-01 : f32
    %508 = vector.broadcast %cst_198 : f32 to vector<2x128xf32>
    %509 = arith.addf %507, %508 : vector<2x128xf32>
    %510 = vector.extract_strided_slice %489 {offsets = [0, 256], sizes = [2, 128], strides = [1, 1]} : vector<2x512xf32> to vector<2x128xf32>
    %511 = math.tanh %510 : vector<2x128xf32>
    %512 = vector.extract_strided_slice %489 {offsets = [0, 384], sizes = [2, 128], strides = [1, 1]} : vector<2x512xf32> to vector<2x128xf32>
    %cst_199 = arith.constant 5.000000e-01 : f32
    %513 = vector.broadcast %cst_199 : f32 to vector<2x128xf32>
    %514 = arith.mulf %513, %512 : vector<2x128xf32>
    %515 = math.tanh %514 : vector<2x128xf32>
    %cst_200 = arith.constant 5.000000e-01 : f32
    %516 = vector.broadcast %cst_200 : f32 to vector<2x128xf32>
    %517 = arith.mulf %516, %515 : vector<2x128xf32>
    %cst_201 = arith.constant 5.000000e-01 : f32
    %518 = vector.broadcast %cst_201 : f32 to vector<2x128xf32>
    %519 = arith.addf %517, %518 : vector<2x128xf32>
    %520 = arith.mulf %509, %448 : vector<2x128xf32>
    %521 = arith.mulf %501, %511 : vector<2x128xf32>
    %522 = arith.addf %520, %521 : vector<2x128xf32>
    %523 = math.tanh %522 : vector<2x128xf32>
    %524 = arith.mulf %519, %523 : vector<2x128xf32>
    %525 = arith.truncf %524 : vector<2x128xf32> to vector<2x128xbf16>
    %cst_202 = arith.constant dense<0.000000e+00> : vector<2x512xf32>
    %526 = tpu.matmul %525, %30, %cst_202 {dimension_numbers = #tpu.dot_dimension_numbers<[1], [0], [0], [1], [0, 0, 1, 1], [], []>} : vector<2x128xbf16>, vector<128x512xbf16>, vector<2x512xf32> -> vector<2x512xf32>
    %527 = arith.addf %526, %493 : vector<2x512xf32>
    %528 = vector.extract_strided_slice %527 {offsets = [0, 0], sizes = [2, 128], strides = [1, 1]} : vector<2x512xf32> to vector<2x128xf32>
    %cst_203 = arith.constant 5.000000e-01 : f32
    %529 = vector.broadcast %cst_203 : f32 to vector<2x128xf32>
    %530 = arith.mulf %529, %528 : vector<2x128xf32>
    %531 = math.tanh %530 : vector<2x128xf32>
    %cst_204 = arith.constant 5.000000e-01 : f32
    %532 = vector.broadcast %cst_204 : f32 to vector<2x128xf32>
    %533 = arith.mulf %532, %531 : vector<2x128xf32>
    %cst_205 = arith.constant 5.000000e-01 : f32
    %534 = vector.broadcast %cst_205 : f32 to vector<2x128xf32>
    %535 = arith.addf %533, %534 : vector<2x128xf32>
    %536 = vector.extract_strided_slice %527 {offsets = [0, 128], sizes = [2, 128], strides = [1, 1]} : vector<2x512xf32> to vector<2x128xf32>
    %cst_206 = arith.constant 5.000000e-01 : f32
    %537 = vector.broadcast %cst_206 : f32 to vector<2x128xf32>
    %538 = arith.mulf %537, %536 : vector<2x128xf32>
    %539 = math.tanh %538 : vector<2x128xf32>
    %cst_207 = arith.constant 5.000000e-01 : f32
    %540 = vector.broadcast %cst_207 : f32 to vector<2x128xf32>
    %541 = arith.mulf %540, %539 : vector<2x128xf32>
    %cst_208 = arith.constant 5.000000e-01 : f32
    %542 = vector.broadcast %cst_208 : f32 to vector<2x128xf32>
    %543 = arith.addf %541, %542 : vector<2x128xf32>
    %544 = vector.extract_strided_slice %527 {offsets = [0, 256], sizes = [2, 128], strides = [1, 1]} : vector<2x512xf32> to vector<2x128xf32>
    %545 = math.tanh %544 : vector<2x128xf32>
    %546 = vector.extract_strided_slice %527 {offsets = [0, 384], sizes = [2, 128], strides = [1, 1]} : vector<2x512xf32> to vector<2x128xf32>
    %cst_209 = arith.constant 5.000000e-01 : f32
    %547 = vector.broadcast %cst_209 : f32 to vector<2x128xf32>
    %548 = arith.mulf %547, %546 : vector<2x128xf32>
    %549 = math.tanh %548 : vector<2x128xf32>
    %cst_210 = arith.constant 5.000000e-01 : f32
    %550 = vector.broadcast %cst_210 : f32 to vector<2x128xf32>
    %551 = arith.mulf %550, %549 : vector<2x128xf32>
    %cst_211 = arith.constant 5.000000e-01 : f32
    %552 = vector.broadcast %cst_211 : f32 to vector<2x128xf32>
    %553 = arith.addf %551, %552 : vector<2x128xf32>
    %554 = arith.mulf %543, %482 : vector<2x128xf32>
    %555 = arith.mulf %535, %545 : vector<2x128xf32>
    %556 = arith.addf %554, %555 : vector<2x128xf32>
    %557 = math.tanh %556 : vector<2x128xf32>
    %558 = arith.mulf %553, %557 : vector<2x128xf32>
    %c12_212 = arith.constant 12 : index
    %c0_213 = arith.constant 0 : index
    %559 = vector.load %arg9[%c12_212, %c0_213] : memref<16x128xf32, #tpu.memory_space<vmem>>, vector<2x128xf32>
    tpu.vector_store %arg9[%c12_212, %c0_213], %558 {strides = array<i32>} : memref<16x128xf32, #tpu.memory_space<vmem>>, vector<2x128xf32>,
    %c14 = arith.constant 14 : index
    %c0_214 = arith.constant 0 : index
    %560 = vector.load %arg8[%c14, %c0_214] : memref<16x512xf32, #tpu.memory_space<vmem>>, vector<2x512xf32>
    %561 = arith.truncf %524 : vector<2x128xf32> to vector<2x128xbf16>
    %cst_215 = arith.constant dense<0.000000e+00> : vector<2x512xf32>
    %562 = tpu.matmul %561, %28, %cst_215 {dimension_numbers = #tpu.dot_dimension_numbers<[1], [0], [0], [1], [0, 0, 1, 1], [], []>} : vector<2x128xbf16>, vector<128x512xbf16>, vector<2x512xf32> -> vector<2x512xf32>
    %563 = arith.addf %560, %562 : vector<2x512xf32>
    %564 = arith.truncf %558 : vector<2x128xf32> to vector<2x128xbf16>
    %cst_216 = arith.constant dense<0.000000e+00> : vector<2x512xf32>
    %565 = tpu.matmul %564, %32, %cst_216 {dimension_numbers = #tpu.dot_dimension_numbers<[1], [0], [0], [1], [0, 0, 1, 1], [], []>} : vector<2x128xbf16>, vector<128x512xbf16>, vector<2x512xf32> -> vector<2x512xf32>
    %566 = vector.broadcast %33 : vector<1x512xf32> to vector<2x512xf32>
    %567 = arith.addf %565, %566 : vector<2x512xf32>
    %568 = vector.extract_strided_slice %563 {offsets = [0, 0], sizes = [2, 128], strides = [1, 1]} : vector<2x512xf32> to vector<2x128xf32>
    %cst_217 = arith.constant 5.000000e-01 : f32
    %569 = vector.broadcast %cst_217 : f32 to vector<2x128xf32>
    %570 = arith.mulf %569, %568 : vector<2x128xf32>
    %571 = math.tanh %570 : vector<2x128xf32>
    %cst_218 = arith.constant 5.000000e-01 : f32
    %572 = vector.broadcast %cst_218 : f32 to vector<2x128xf32>
    %573 = arith.mulf %572, %571 : vector<2x128xf32>
    %cst_219 = arith.constant 5.000000e-01 : f32
    %574 = vector.broadcast %cst_219 : f32 to vector<2x128xf32>
    %575 = arith.addf %573, %574 : vector<2x128xf32>
    %576 = vector.extract_strided_slice %563 {offsets = [0, 128], sizes = [2, 128], strides = [1, 1]} : vector<2x512xf32> to vector<2x128xf32>
    %cst_220 = arith.constant 5.000000e-01 : f32
    %577 = vector.broadcast %cst_220 : f32 to vector<2x128xf32>
    %578 = arith.mulf %577, %576 : vector<2x128xf32>
    %579 = math.tanh %578 : vector<2x128xf32>
    %cst_221 = arith.constant 5.000000e-01 : f32
    %580 = vector.broadcast %cst_221 : f32 to vector<2x128xf32>
    %581 = arith.mulf %580, %579 : vector<2x128xf32>
    %cst_222 = arith.constant 5.000000e-01 : f32
    %582 = vector.broadcast %cst_222 : f32 to vector<2x128xf32>
    %583 = arith.addf %581, %582 : vector<2x128xf32>
    %584 = vector.extract_strided_slice %563 {offsets = [0, 256], sizes = [2, 128], strides = [1, 1]} : vector<2x512xf32> to vector<2x128xf32>
    %585 = math.tanh %584 : vector<2x128xf32>
    %586 = vector.extract_strided_slice %563 {offsets = [0, 384], sizes = [2, 128], strides = [1, 1]} : vector<2x512xf32> to vector<2x128xf32>
    %cst_223 = arith.constant 5.000000e-01 : f32
    %587 = vector.broadcast %cst_223 : f32 to vector<2x128xf32>
    %588 = arith.mulf %587, %586 : vector<2x128xf32>
    %589 = math.tanh %588 : vector<2x128xf32>
    %cst_224 = arith.constant 5.000000e-01 : f32
    %590 = vector.broadcast %cst_224 : f32 to vector<2x128xf32>
    %591 = arith.mulf %590, %589 : vector<2x128xf32>
    %cst_225 = arith.constant 5.000000e-01 : f32
    %592 = vector.broadcast %cst_225 : f32 to vector<2x128xf32>
    %593 = arith.addf %591, %592 : vector<2x128xf32>
    %594 = arith.mulf %583, %522 : vector<2x128xf32>
    %595 = arith.mulf %575, %585 : vector<2x128xf32>
    %596 = arith.addf %594, %595 : vector<2x128xf32>
    %597 = math.tanh %596 : vector<2x128xf32>
    %598 = arith.mulf %593, %597 : vector<2x128xf32>
    %599 = arith.truncf %598 : vector<2x128xf32> to vector<2x128xbf16>
    %cst_226 = arith.constant dense<0.000000e+00> : vector<2x512xf32>
    %600 = tpu.matmul %599, %30, %cst_226 {dimension_numbers = #tpu.dot_dimension_numbers<[1], [0], [0], [1], [0, 0, 1, 1], [], []>} : vector<2x128xbf16>, vector<128x512xbf16>, vector<2x512xf32> -> vector<2x512xf32>
    %601 = arith.addf %600, %567 : vector<2x512xf32>
    %602 = vector.extract_strided_slice %601 {offsets = [0, 0], sizes = [2, 128], strides = [1, 1]} : vector<2x512xf32> to vector<2x128xf32>
    %cst_227 = arith.constant 5.000000e-01 : f32
    %603 = vector.broadcast %cst_227 : f32 to vector<2x128xf32>
    %604 = arith.mulf %603, %602 : vector<2x128xf32>
    %605 = math.tanh %604 : vector<2x128xf32>
    %cst_228 = arith.constant 5.000000e-01 : f32
    %606 = vector.broadcast %cst_228 : f32 to vector<2x128xf32>
    %607 = arith.mulf %606, %605 : vector<2x128xf32>
    %cst_229 = arith.constant 5.000000e-01 : f32
    %608 = vector.broadcast %cst_229 : f32 to vector<2x128xf32>
    %609 = arith.addf %607, %608 : vector<2x128xf32>
    %610 = vector.extract_strided_slice %601 {offsets = [0, 128], sizes = [2, 128], strides = [1, 1]} : vector<2x512xf32> to vector<2x128xf32>
    %cst_230 = arith.constant 5.000000e-01 : f32
    %611 = vector.broadcast %cst_230 : f32 to vector<2x128xf32>
    %612 = arith.mulf %611, %610 : vector<2x128xf32>
    %613 = math.tanh %612 : vector<2x128xf32>
    %cst_231 = arith.constant 5.000000e-01 : f32
    %614 = vector.broadcast %cst_231 : f32 to vector<2x128xf32>
    %615 = arith.mulf %614, %613 : vector<2x128xf32>
    %cst_232 = arith.constant 5.000000e-01 : f32
    %616 = vector.broadcast %cst_232 : f32 to vector<2x128xf32>
    %617 = arith.addf %615, %616 : vector<2x128xf32>
    %618 = vector.extract_strided_slice %601 {offsets = [0, 256], sizes = [2, 128], strides = [1, 1]} : vector<2x512xf32> to vector<2x128xf32>
    %619 = math.tanh %618 : vector<2x128xf32>
    %620 = vector.extract_strided_slice %601 {offsets = [0, 384], sizes = [2, 128], strides = [1, 1]} : vector<2x512xf32> to vector<2x128xf32>
    %cst_233 = arith.constant 5.000000e-01 : f32
    %621 = vector.broadcast %cst_233 : f32 to vector<2x128xf32>
    %622 = arith.mulf %621, %620 : vector<2x128xf32>
    %623 = math.tanh %622 : vector<2x128xf32>
    %cst_234 = arith.constant 5.000000e-01 : f32
    %624 = vector.broadcast %cst_234 : f32 to vector<2x128xf32>
    %625 = arith.mulf %624, %623 : vector<2x128xf32>
    %cst_235 = arith.constant 5.000000e-01 : f32
    %626 = vector.broadcast %cst_235 : f32 to vector<2x128xf32>
    %627 = arith.addf %625, %626 : vector<2x128xf32>
    %628 = arith.mulf %617, %556 : vector<2x128xf32>
    %629 = arith.mulf %609, %619 : vector<2x128xf32>
    %630 = arith.addf %628, %629 : vector<2x128xf32>
    %631 = math.tanh %630 : vector<2x128xf32>
    %632 = arith.mulf %627, %631 : vector<2x128xf32>
    %c14_236 = arith.constant 14 : index
    %c0_237 = arith.constant 0 : index
    %633 = vector.load %arg9[%c14_236, %c0_237] : memref<16x128xf32, #tpu.memory_space<vmem>>, vector<2x128xf32>
    tpu.vector_store %arg9[%c14_236, %c0_237], %632 {strides = array<i32>} : memref<16x128xf32, #tpu.memory_space<vmem>>, vector<2x128xf32>,
    %c0_238 = arith.constant 0 : index
    %c0_239 = arith.constant 0 : index
    %634 = vector.load %arg9[%c0_238, %c0_239] : memref<16x128xf32, #tpu.memory_space<vmem>>, vector<16x128xf32>
    %c1_240 = arith.constant 1 : index
    %c0_241 = arith.constant 0 : index
    %c0_242 = arith.constant 0 : index
    %635 = vector.load %arg4[%c1_240, %c0_241, %c0_242] : memref<3x128x128xbf16, #tpu.memory_space<vmem>>, vector<1x128x128xbf16>
    %636 = vector.shape_cast %635 : vector<1x128x128xbf16> to vector<128x128xbf16>
    %637 = arith.truncf %634 : vector<16x128xf32> to vector<16x128xbf16>
    %cst_243 = arith.constant dense<0.000000e+00> : vector<16x128xf32>
    %638 = tpu.matmul %637, %636, %cst_243 {dimension_numbers = #tpu.dot_dimension_numbers<[1], [0], [0], [1], [0, 0, 1, 1], [], []>} : vector<16x128xbf16>, vector<128x128xbf16>, vector<16x128xf32> -> vector<16x128xf32>
    %c3_244 = arith.constant 3 : index
    %c0_245 = arith.constant 0 : index
    %639 = vector.load %arg5[%c3_244, %c0_245] : memref<8x512xf32, #tpu.memory_space<vmem>>, vector<1x128xf32>
    %640 = vector.broadcast %639 : vector<1x128xf32> to vector<16x128xf32>
    %641 = arith.addf %638, %640 : vector<16x128xf32>
    %cst_246 = arith.constant 0.000000e+00 : f32
    %642 = vector.broadcast %cst_246 : f32 to vector<16x128xf32>
    %643 = arith.cmpf ogt, %641, %642 : vector<16x128xf32>
    %cst_247 = arith.constant 1.000000e-01 : f32
    %644 = vector.broadcast %cst_247 : f32 to vector<16x128xf32>
    %645 = arith.mulf %644, %641 : vector<16x128xf32>
    %646 = arith.select %643, %641, %645 : vector<16x128xi1>, vector<16x128xf32>
    %c2_248 = arith.constant 2 : index
    %c0_249 = arith.constant 0 : index
    %c0_250 = arith.constant 0 : index
    %647 = vector.load %arg4[%c2_248, %c0_249, %c0_250] : memref<3x128x128xbf16, #tpu.memory_space<vmem>>, vector<1x128x128xbf16>
    %648 = vector.shape_cast %647 : vector<1x128x128xbf16> to vector<128x128xbf16>
    %649 = arith.truncf %646 : vector<16x128xf32> to vector<16x128xbf16>
    %cst_251 = arith.constant dense<0.000000e+00> : vector<16x128xf32>
    %650 = tpu.matmul %649, %648, %cst_251 {dimension_numbers = #tpu.dot_dimension_numbers<[1], [0], [0], [1], [0, 0, 1, 1], [], []>} : vector<16x128xbf16>, vector<128x128xbf16>, vector<16x128xf32> -> vector<16x128xf32>
    %c4_252 = arith.constant 4 : index
    %c0_253 = arith.constant 0 : index
    %651 = vector.load %arg5[%c4_252, %c0_253] : memref<8x512xf32, #tpu.memory_space<vmem>>, vector<1x128xf32>
    %652 = vector.broadcast %651 : vector<1x128xf32> to vector<16x128xf32>
    %653 = arith.addf %650, %652 : vector<16x128xf32>
    %c0_254 = arith.constant 0 : index
    %c0_255 = arith.constant 0 : index
    %654 = vector.load %arg6[%c0_254, %c0_255] : memref<16x128xf32, #tpu.memory_space<vmem>>, vector<16x128xf32>
    tpu.vector_store %arg6[%c0_254, %c0_255], %653 {strides = array<i32>} : memref<16x128xf32, #tpu.memory_space<vmem>>, vector<16x128xf32>,
    %c0_256 = arith.constant 0 : index
    %c0_257 = arith.constant 0 : index
    %c0_258 = arith.constant 0 : index
    %655 = vector.load %arg7[%c0_256, %c0_257, %c0_258] : memref<4x2x128xf32, #tpu.memory_space<vmem>>, vector<1x2x128xf32>
    %656 = vector.shape_cast %655 : vector<1x2x128xf32> to vector<2x128xf32>
    %657 = vector.shape_cast %598 : vector<2x128xf32> to vector<1x2x128xf32>
    tpu.vector_store %arg7[%c0_256, %c0_257, %c0_258], %657 {strides = array<i32>} : memref<4x2x128xf32, #tpu.memory_space<vmem>>, vector<1x2x128xf32>,
    %c1_259 = arith.constant 1 : index
    %c0_260 = arith.constant 0 : index
    %c0_261 = arith.constant 0 : index
    %658 = vector.load %arg7[%c1_259, %c0_260, %c0_261] : memref<4x2x128xf32, #tpu.memory_space<vmem>>, vector<1x2x128xf32>
    %659 = vector.shape_cast %658 : vector<1x2x128xf32> to vector<2x128xf32>
    %660 = vector.shape_cast %632 : vector<2x128xf32> to vector<1x2x128xf32>
    tpu.vector_store %arg7[%c1_259, %c0_260, %c0_261], %660 {strides = array<i32>} : memref<4x2x128xf32, #tpu.memory_space<vmem>>, vector<1x2x128xf32>,
    %c2_262 = arith.constant 2 : index
    %c0_263 = arith.constant 0 : index
    %c0_264 = arith.constant 0 : index
    %661 = vector.load %arg7[%c2_262, %c0_263, %c0_264] : memref<4x2x128xf32, #tpu.memory_space<vmem>>, vector<1x2x128xf32>
    %662 = vector.shape_cast %661 : vector<1x2x128xf32> to vector<2x128xf32>
    %663 = vector.shape_cast %596 : vector<2x128xf32> to vector<1x2x128xf32>
    tpu.vector_store %arg7[%c2_262, %c0_263, %c0_264], %663 {strides = array<i32>} : memref<4x2x128xf32, #tpu.memory_space<vmem>>, vector<1x2x128xf32>,
    %c3_265 = arith.constant 3 : index
    %c0_266 = arith.constant 0 : index
    %c0_267 = arith.constant 0 : index
    %664 = vector.load %arg7[%c3_265, %c0_266, %c0_267] : memref<4x2x128xf32, #tpu.memory_space<vmem>>, vector<1x2x128xf32>
    %665 = vector.shape_cast %664 : vector<1x2x128xf32> to vector<2x128xf32>
    %666 = vector.shape_cast %630 : vector<2x128xf32> to vector<1x2x128xf32>
    tpu.vector_store %arg7[%c3_265, %c0_266, %c0_267], %666 {strides = array<i32>} : memref<4x2x128xf32, #tpu.memory_space<vmem>>, vector<1x2x128xf32>,
    return
  }
  func.func @transform_0(%arg0: i32) -> (i32, i32, i32) {
    %c0_i32 = arith.constant 0 : i32
    %c0_i32_0 = arith.constant 0 : i32
    %c0_i32_1 = arith.constant 0 : i32
    %c0_i32_2 = arith.constant 0 : i32
    return %c0_i32, %c0_i32_0, %c0_i32_1 : i32, i32, i32
  }
  func.func @transform_1(%arg0: i32) -> (i32, i32, i32) {
    %c0_i32 = arith.constant 0 : i32
    %c0_i32_0 = arith.constant 0 : i32
    %c0_i32_1 = arith.constant 0 : i32
    %c0_i32_2 = arith.constant 0 : i32
    return %c0_i32, %c0_i32_0, %c0_i32_1 : i32, i32, i32
  }
  func.func @transform_2(%arg0: i32) -> (i32, i32, i32) {
    %c0_i32 = arith.constant 0 : i32
    %c0_i32_0 = arith.constant 0 : i32
    %c0_i32_1 = arith.constant 0 : i32
    %c0_i32_2 = arith.constant 0 : i32
    return %c0_i32, %c0_i32_0, %c0_i32_1 : i32, i32, i32
  }
  func.func @transform_3(%arg0: i32) -> (i32, i32, i32) {
    %c0_i32 = arith.constant 0 : i32
    %c0_i32_0 = arith.constant 0 : i32
    %c0_i32_1 = arith.constant 0 : i32
    %c0_i32_2 = arith.constant 0 : i32
    return %c0_i32, %c0_i32_0, %c0_i32_1 : i32, i32, i32
  }
  func.func @transform_4(%arg0: i32) -> (i32, i32) {
    %c0_i32 = arith.constant 0 : i32
    %c0_i32_0 = arith.constant 0 : i32
    %c0_i32_1 = arith.constant 0 : i32
    return %c0_i32, %c0_i32_0 : i32, i32
  }
  func.func @transform_5(%arg0: i32) -> (i32, i32) {
    %c0_i32 = arith.constant 0 : i32
    %c0_i32_0 = arith.constant 0 : i32
    %c0_i32_1 = arith.constant 0 : i32
    return %c0_i32, %c0_i32_0 : i32, i32
  }
  func.func @transform_6(%arg0: i32) -> (i32, i32, i32) {
    %c0_i32 = arith.constant 0 : i32
    %c0_i32_0 = arith.constant 0 : i32
    %c0_i32_1 = arith.constant 0 : i32
    %c0_i32_2 = arith.constant 0 : i32
    return %c0_i32, %c0_i32_0, %c0_i32_1 : i32, i32, i32
  }
}

</mosaic_0001>

<bundles_post_ra>
// kernel: pose_rnn_forward.1
= control target key start
LH: loop header
LB: loop body
LE: loop exit
PB: predicated region body
PF: predicated region fallthrough
CT: control target
= control target key end

     0   :  { %v7423_v0 = vmov 0.0   ;;  %vm4716_vm0 = vmmov 0   ;;  %v7425_v58 = vmov 0   ;;  %s7416_s3 = inlined_call_operand.vmem [shape: bf16[3,128,128], index: 3, kind: input, shape index: {}]   ;;  %s7417_s2 = inlined_call_operand.vmem [shape: bf16[4,128,512], index: 2, kind: input, shape index: {}]   ;;  %s7418_s0 = inlined_call_operand.vmem [shape: f32[4,16,128], index: 0, kind: input, shape index: {}]   ;;  %s7419_s4 = inlined_call_operand.vmem [shape: f32[8,512], index: 4, kind: input, shape index: {}]   ;;  %s7420_s1 = inlined_call_operand.vmem [shape: f32[4,2,128], index: 1, kind: input, shape index: {}]   ;;  %s7421_s6 = inlined_call_operand.vmem [shape: f32[4,2,128], index: 6, kind: output, shape index: {1}]   ;;  %s7422_s5 = inlined_call_operand.vmem [shape: f32[16,128], index: 5, kind: output, shape index: {0}]  }
   0x1   :  { %4084 = vmatprep.subr.bf16.mxu0 %v7423_v0  ;;  %v4147_v1 = vld [vmem:[%s7416_s3 + $0x38] sm:$0xff]   ;;  %4100 = vmatprep.mubr.msk.bf16.mxu0 %vm4716_vm0, %v7423_v0  ;;  %v4148_v2 = vld [vmem:[%s7416_s3 + $0x30] sm:$0xff]   ;;  %v4149_v3 = vld [vmem:[%s7416_s3 + $0x28] sm:$0xff]  }
   0x2   :  { %4085 = vmatpush3.bf16.msra.mxu0 %v4147_v1  ;;  %v4150_v4 = vld [vmem:[%s7416_s3 + $0x20] sm:$0xff]   ;;  %v4151_v6 = vld [vmem:[%s7416_s3 + $0x18] sm:$0xff]   ;;  %v4152_v10 = vld [vmem:[%s7416_s3 + $0x10] sm:$0xff]   ;;  %396 = vmatprep.mubr.bf16.mxu1 %v7425_v58 }
   0x3   :  { %4086 = vmatprep.subr.bf16.mxu0 %v7423_v0  ;;  %v4155_v5 = vld [vmem:[%s7417_s2 + $0xe4] ss:$16 sps:$4 sm:$0xff]   ;;  %v4160_v7 = vld [vmem:[%s7417_s2 + $0xe0] ss:$16 sps:$4 sm:$0xff]   ;;  %v24_v12 = vld [vmem:[%s7418_s0 + $0x8] sm:$0xff] }
   0x4   :  { %364 = vmatprep.subr.bf16.mxu1 %v4155_v5  ;;  %v4161_v8 = vld [vmem:[%s7417_s2 + $0xc4] ss:$16 sps:$4 sm:$0xff]   ;;  %v4166_v9 = vld [vmem:[%s7417_s2 + $0xc0] ss:$16 sps:$4 sm:$0xff]   ;;  %v3765_v14 = vld [vmem:[%s7418_s0 + $0x18] sm:$0xff] }
   0x5   :  { %365 = vmatpush1.bf16.msra.mxu1 %v4160_v7  ;;  %v23_v11 = vld [vmem:[%s7418_s0] sm:$0xff]  ;;  %v3764_v13 = vld [vmem:[%s7418_s0 + $0x10] sm:$0xff]  ;;  %v3767_v17 = vld [vmem:[%s7418_s0 + $0x28] sm:$0xff] }
   0x6   :  { %4087 = vmatpush3.bf16.msra.mxu0 %v4148_v2  ;;  %v3766_v15 = vld [vmem:[%s7418_s0 + $0x20] sm:$0xff]  ;;  %366 = vmatprep.subr.bf16.mxu1 %v4161_v8  ;;  %v3768_v18 = vld [vmem:[%s7418_s0 + $0x30] sm:$0xff]  ;;  %v3769_v19 = vld [vmem:[%s7418_s0 + $0x38] sm:$0xff]  ;;  %v35_v23 = vmul.f32 %v3767_v17, %v24_v12 }
   0x7   :  { %4088 = vmatprep.subr.bf16.mxu0 %v7423_v0  ;;  %v4167_v16 = vld [vmem:[%s7417_s2 + $0xa4] ss:$16 sps:$4 sm:$0xff]   ;;  %v4172_v20 = vld [vmem:[%s7417_s2 + $0xa0] ss:$16 sps:$4 sm:$0xff]   ;;  %v34_v22 = vmul.f32 %v3766_v15, %v23_v11  ;;  %v36_v24 = vmul.f32 %v3768_v18, %v3764_v13  ;;  %v37_v25 = vmul.f32 %v3769_v19, %v3765_v14  ;;  %v4153_v26 = vld [vmem:[%s7416_s3 + $0x8] sm:$0xff]  }
   0x8   :  { %v4173_v21 = vld [vmem:[%s7417_s2 + $0x84] ss:$16 sps:$4 sm:$0xff]   ;;  %v4178_v27 = vld [vmem:[%s7417_s2 + $0x80] ss:$16 sps:$4 sm:$0xff]   ;;  %v4159_v32 = vld [vmem:[%s7417_s2 + $0xec] ss:$16 sps:$4 sm:$0xff]  }
   0x9   :  { %367 = vmatpush1.bf16.msra.mxu1 %v4166_v9  ;;  %v4179_v28 = vld [vmem:[%s7417_s2 + $0x64] ss:$16 sps:$4 sm:$0xff]   ;;  %v4837_v30 = vadd.f32 %v36_v24, %v34_v22  ;;  %v4839_v31 = vadd.f32 %v37_v25, %v35_v23  ;;  %v4184_v33 = vld [vmem:[%s7417_s2 + $0x60] ss:$16 sps:$4 sm:$0xff]   ;;  %v4157_v35 = vld [vmem:[%s7417_s2 + $0xe8] ss:$16 sps:$4 sm:$0xff]  }
   0xa   :  { %4089 = vmatpush3.bf16.msra.mxu0 %v4149_v3  ;;  %368 = vmatprep.subr.bf16.mxu1 %v4167_v16  ;;  %v4154_v29 = vld [vmem:[%s7416_s3] sm:$0xff]   ;;  %v4165_v37 = vld [vmem:[%s7417_s2 + $0xcc] ss:$16 sps:$4 sm:$0xff]   ;;  %v4163_v39 = vld [vmem:[%s7417_s2 + $0xc8] ss:$16 sps:$4 sm:$0xff]  }
   0xb   :  { %4090 = vmatprep.subr.bf16.mxu0 %v7423_v0  ;;  %v4185_v34 = vld [vmem:[%s7417_s2 + $0x44] ss:$16 sps:$4 sm:$0xff]   ;;  %v56_v36 = vpack.c.bf16 %v4839_v31, %v4837_v30  ;;  %v4190_v38 = vld [vmem:[%s7417_s2 + $0x40] ss:$16 sps:$4 sm:$0xff]   ;;  %v4171_v40 = vld [vmem:[%s7417_s2 + $0xac] ss:$16 sps:$4 sm:$0xff]  }
   0xc   :  { %v4169_v41 = vld [vmem:[%s7417_s2 + $0xa8] ss:$16 sps:$4 sm:$0xff]   ;;  %v4177_v42 = vld [vmem:[%s7417_s2 + $0x8c] ss:$16 sps:$4 sm:$0xff]   ;;  %v4191_v48 = vld [vmem:[%s7417_s2 + $0x24] ss:$16 sps:$4 sm:$0xff]  }
   0xd   :  { %369 = vmatpush1.bf16.msra.mxu1 %v4172_v20  ;;  %v4175_v43 = vld [vmem:[%s7417_s2 + $0x88] ss:$16 sps:$4 sm:$0xff]   ;;  %v4183_v44 = vld [vmem:[%s7417_s2 + $0x6c] ss:$16 sps:$4 sm:$0xff]   ;;  %v4196_v51 = vld [vmem:[%s7417_s2 + $0x20] ss:$16 sps:$4 sm:$0xff]  }
   0xe   :  { %4091 = vmatpush3.bf16.msra.mxu0 %v4150_v4  ;;  %370 = vmatprep.subr.bf16.mxu1 %v4173_v21  ;;  %v4181_v45 = vld [vmem:[%s7417_s2 + $0x68] ss:$16 sps:$4 sm:$0xff]   ;;  %v4189_v46 = vld [vmem:[%s7417_s2 + $0x4c] ss:$16 sps:$4 sm:$0xff]   ;;  %v4197_v52 = vld [vmem:[%s7417_s2 + $0x4] ss:$16 sps:$4 sm:$0xff]  }
   0xf   :  { %4092 = vmatprep.subr.bf16.mxu0 %v7423_v0  ;;  %v4187_v47 = vld [vmem:[%s7417_s2 + $0x48] ss:$16 sps:$4 sm:$0xff]   ;;  %v4195_v49 = vld [vmem:[%s7417_s2 + $0x2c] ss:$16 sps:$4 sm:$0xff]   ;;  %v4202_v55 = vld [vmem:[%s7417_s2] ss:$16 sps:$4 sm:$0xff]  }
  0x10   :  { %v4193_v50 = vld [vmem:[%s7417_s2 + $0x28] ss:$16 sps:$4 sm:$0xff]   ;;  %v4201_v53 = vld [vmem:[%s7417_s2 + $0xc] ss:$16 sps:$4 sm:$0xff]   ;;  %v4916_v56 = vld [vmem:[%s7417_s2 + $0x1e4] ss:$16 sps:$4 sm:$0xff]  }
  0x11   :  { %371 = vmatpush1.bf16.msra.mxu1 %v4178_v27  ;;  %v4199_v54 = vld [vmem:[%s7417_s2 + $0x8] ss:$16 sps:$4 sm:$0xff]   ;;  %7700 = vst [vmem:[#allocation4_spill] sm:$0xff] %v4916_v56  ;;  %v4921_v57 = vld [vmem:[%s7417_s2 + $0x1ec] ss:$16 sps:$4 sm:$0xff]  }
  0x12   :  { %4093 = vmatpush3.bf16.msra.mxu0 %v4151_v6  ;;  %372 = vmatprep.subr.bf16.mxu1 %v4179_v28  ;;  %7701 = vst [vmem:[#allocation5_spill] sm:$0xff] %v4921_v57  ;;  %v57_v59 = vld [vmem:[%s7419_s4 + $0x2] ss:$0 sm:$0xff]  ;;  %v4940_v6 = vld [vmem:[%s7417_s2 + $0x1e8] ss:$16 sps:$4 sm:$0xff]  }
  0x13   :  { %4094 = vmatprep.subr.bf16.mxu0 %v7423_v0  ;;  %v4935_v5 = vld [vmem:[%s7417_s2 + $0x1e0] ss:$16 sps:$4 sm:$0xff]   ;;  %v4945_v8 = vld [vmem:[%s7417_s2 + $0x1c4] ss:$16 sps:$4 sm:$0xff]   ;;  %v4950_v9 = vld [vmem:[%s7417_s2 + $0x1cc] ss:$16 sps:$4 sm:$0xff]  }
  0x14   :  { %v4962_v11 = vld [vmem:[%s7417_s2 + $0x1c8] ss:$16 sps:$4 sm:$0xff]   ;;  %v4969_v12 = vld [vmem:[%s7417_s2 + $0x1a4] ss:$16 sps:$4 sm:$0xff]   ;;  %v4974_v13 = vld [vmem:[%s7417_s2 + $0x1ac] ss:$16 sps:$4 sm:$0xff]  }
  0x15   :  { %373 = vmatpush1.bf16.msra.mxu1 %v4184_v33  ;;  %v4983_v14 = vld [vmem:[%s7417_s2 + $0x1a0] ss:$16 sps:$4 sm:$0xff]   ;;  %v4988_v15 = vld [vmem:[%s7417_s2 + $0x1a8] ss:$16 sps:$4 sm:$0xff]   ;;  %v4995_v16 = vld [vmem:[%s7417_s2 + $0x184] ss:$16 sps:$4 sm:$0xff]  }
  0x16   :  { %4095 = vmatpush3.bf16.msra.mxu0 %v4152_v10  ;;  %374 = vmatprep.subr.bf16.mxu1 %v4185_v34  ;;  %v4957_v10 = vld [vmem:[%s7417_s2 + $0x1c0] ss:$16 sps:$4 sm:$0xff]   ;;  %v5000_v17 = vld [vmem:[%s7417_s2 + $0x18c] ss:$16 sps:$4 sm:$0xff]   ;;  %v5012_v19 = vld [vmem:[%s7417_s2 + $0x188] ss:$16 sps:$4 sm:$0xff]  }
  0x17   :  { %4096 = vmatprep.subr.bf16.mxu0 %v7423_v0  ;;  %v5007_v18 = vld [vmem:[%s7417_s2 + $0x180] ss:$16 sps:$4 sm:$0xff]   ;;  %v5019_v20 = vld [vmem:[%s7417_s2 + $0x164] ss:$16 sps:$4 sm:$0xff]   ;;  %v5024_v21 = vld [vmem:[%s7417_s2 + $0x16c] ss:$16 sps:$4 sm:$0xff]  }
  0x18   :  { %v5031_v22 = vld [vmem:[%s7417_s2 + $0x160] ss:$16 sps:$4 sm:$0xff]   ;;  %v5036_v23 = vld [vmem:[%s7417_s2 + $0x168] ss:$16 sps:$4 sm:$0xff]   ;;  %v5043_v24 = vld [vmem:[%s7417_s2 + $0x144] ss:$16 sps:$4 sm:$0xff]  }
  0x19   :  { %375 = vmatpush1.bf16.msra.mxu1 %v4190_v38  ;;  %v5048_v25 = vld [vmem:[%s7417_s2 + $0x14c] ss:$16 sps:$4 sm:$0xff]   ;;  %v5060_v27 = vld [vmem:[%s7417_s2 + $0x148] ss:$16 sps:$4 sm:$0xff]   ;;  %v5067_v28 = vld [vmem:[%s7417_s2 + $0x124] ss:$16 sps:$4 sm:$0xff]  }
  0x1a   :  { %4097 = vmatpush3.bf16.msra.mxu0 %v4153_v26  ;;  %376 = vmatprep.subr.bf16.mxu1 %v4191_v48  ;;  %v5055_v26 = vld [vmem:[%s7417_s2 + $0x140] ss:$16 sps:$4 sm:$0xff]   ;;  %v5096_v33 = vld [vmem:[%s7417_s2 + $0x10c] ss:$16 sps:$4 sm:$0xff]   ;;  %v5122_v38 = vld [vmem:[%s7417_s2 + $0x3e4] ss:$16 sps:$4 sm:$0xff]  }
  0x1b   :  { %4098 = vmatprep.subr.bf16.mxu0 %v7423_v0  ;;  %v5103_v34 = vld [vmem:[%s7417_s2 + $0x100] ss:$16 sps:$4 sm:$0xff]  }
  0x1c   :  { %v5179_v48 = vld [vmem:[%s7417_s2 + $0x3a0] ss:$16 sps:$4 sm:$0xff]  }
  0x1d   :  { %377 = vmatpush1.bf16.msra.mxu1 %v4196_v51  ;;  %7705 = vst [vmem:[#allocation9_spill] sm:$0xff] %v5179_v48  ;;  %v5197_v51 = vld [vmem:[%s7417_s2 + $0x38c] ss:$16 sps:$4 sm:$0xff]   ;;  %v3907_v0 = vld [vmem:[%s7420_s1 + $0x2] sm:$0x3] }
  0x1e   :  { %4099 = vmatpush3.bf16.msra.mxu0 %v4154_v29  ;;  %378 = vmatprep.subr.bf16.mxu1 %v4197_v52  ;;  %v5072_v29 = vld [vmem:[%s7417_s2 + $0x12c] ss:$16 sps:$4 sm:$0xff]   ;;  %7708 = vst [vmem:[#allocation12_spill] sm:$0xff] %v5197_v51  ;;  %v5203_v52 = vld [vmem:[%s7417_s2 + $0x380] ss:$16 sps:$4 sm:$0xff]  }
  0x1f   :  { %407 = vmatprep.subr.bf16.mxu0 %v4159_v32  ;;  %v5091_v32 = vld [vmem:[%s7417_s2 + $0x104] ss:$16 sps:$4 sm:$0xff]   ;;  %7709 = vst [vmem:[#allocation13_spill] sm:$0xff] %v5203_v52 }
  0x21   :  { %4101 = vmatmul.mubr.bf16.vlgmr.msra.gmra.mxu0 %v56_v36  ;;  %379 = vmatpush1.bf16.msra.mxu1 %v4202_v55  ;;  %v559_v36 = vld [vmem:[%s7420_s1] sm:$0x3]  ;;  %v5221_v55 = vld [vmem:[%s7417_s2 + $0x36c] ss:$16 sps:$4 sm:$0xff]  }
  0x22   :  { %408 = vmatpush1.bf16.msra.mxu0 %v4157_v35  ;;  %439 = vmatprep.mubr.bf16.mxu0 %v7425_v58  ;;  %v5108_v35 = vld [vmem:[%s7417_s2 + $0x108] ss:$16 sps:$4 sm:$0xff]   ;;  %7712 = vst [vmem:[#allocation16_spill] sm:$0xff] %v5221_v55 }
  0x23   :  { %409 = vmatprep.subr.bf16.mxu0 %v4165_v37  ;;  %731 = vmatprep.subr.bf16.mxu1 %v4916_v56  ;;  %v570_v37 = vpack.c.bf16 %v559_v36, %v559_v36  ;;  %v5288_v36 = vld [vmem:[%s7417_s2 + $0x32c] ss:$16 sps:$4 sm:$0xff]  }
  0x24   :  { %7723 = vst [vmem:[#allocation27_spill] sm:$0xff] %v5288_v36 }
  0x26   :  { %410 = vmatpush1.bf16.msra.mxu0 %v4163_v39  ;;  %v5127_v39 = vld [vmem:[%s7417_s2 + $0x3e0] ss:$16 sps:$4 sm:$0xff]  }
  0x27   :  { %411 = vmatprep.subr.bf16.mxu0 %v4171_v40  ;;  %v5133_v40 = vld [vmem:[%s7417_s2 + $0x3c4] ss:$16 sps:$4 sm:$0xff]  }
  0x2a   :  { %412 = vmatpush1.bf16.msra.mxu0 %v4169_v41  ;;  %v5138_v41 = vld [vmem:[%s7417_s2 + $0x3ec] ss:$16 sps:$4 sm:$0xff]  }
  0x2b   :  { %413 = vmatprep.subr.bf16.mxu0 %v4177_v42  ;;  %v5144_v42 = vld [vmem:[%s7417_s2 + $0x3c0] ss:$16 sps:$4 sm:$0xff]  }
  0x2e   :  { %414 = vmatpush1.bf16.msra.mxu0 %v4175_v43  ;;  %v5149_v43 = vld [vmem:[%s7417_s2 + $0x3e8] ss:$16 sps:$4 sm:$0xff]  }
  0x2f   :  { %415 = vmatprep.subr.bf16.mxu0 %v4183_v44  ;;  %v5156_v44 = vld [vmem:[%s7417_s2 + $0x3a4] ss:$16 sps:$4 sm:$0xff]  }
  0x30   :  { %7702 = vst [vmem:[#allocation6_spill] sm:$0xff] %v5156_v44 }
  0x32   :  { %416 = vmatpush1.bf16.msra.mxu0 %v4181_v45  ;;  %v5161_v45 = vld [vmem:[%s7417_s2 + $0x3cc] ss:$16 sps:$4 sm:$0xff]  }
  0x33   :  { %417 = vmatprep.subr.bf16.mxu0 %v4189_v46  ;;  %v5167_v46 = vld [vmem:[%s7417_s2 + $0x3c8] ss:$16 sps:$4 sm:$0xff]  }
  0x34   :  { %7703 = vst [vmem:[#allocation7_spill] sm:$0xff] %v5167_v46 }
  0x36   :  { %418 = vmatpush1.bf16.msra.mxu0 %v4187_v47  ;;  %v5173_v47 = vld [vmem:[%s7417_s2 + $0x3ac] ss:$16 sps:$4 sm:$0xff]  }
  0x37   :  { %419 = vmatprep.subr.bf16.mxu0 %v4195_v49  ;;  %7704 = vst [vmem:[#allocation8_spill] sm:$0xff] %v5173_v47  ;;  %v5185_v49 = vld [vmem:[%s7417_s2 + $0x384] ss:$16 sps:$4 sm:$0xff]  }
  0x38   :  { %7706 = vst [vmem:[#allocation10_spill] sm:$0xff] %v5185_v49 }
  0x3a   :  { %420 = vmatpush1.bf16.msra.mxu0 %v4193_v50  ;;  %v5191_v50 = vld [vmem:[%s7417_s2 + $0x3a8] ss:$16 sps:$4 sm:$0xff]  }
  0x3b   :  { %421 = vmatprep.subr.bf16.mxu0 %v4201_v53  ;;  %7707 = vst [vmem:[#allocation11_spill] sm:$0xff] %v5191_v50  ;;  %v5209_v53 = vld [vmem:[%s7417_s2 + $0x364] ss:$16 sps:$4 sm:$0xff]  }
  0x3c   :  { %7710 = vst [vmem:[#allocation14_spill] sm:$0xff] %v5209_v53 }
  0x3e   :  { %422 = vmatpush1.bf16.msra.mxu0 %v4199_v54  ;;  %v5215_v54 = vld [vmem:[%s7417_s2 + $0x388] ss:$16 sps:$4 sm:$0xff]  }
  0x3f   :  { %772 = vmatprep.subr.bf16.mxu0 %v4921_v57  ;;  %7711 = vst [vmem:[#allocation15_spill] sm:$0xff] %v5215_v54 }
  0xe1   :  { %v140_v60 = vpop.f32.mrf.mxu0 }
  0xe2   :  { %v141_v62 = vadd.f32 %v140_v60, %v57_v59  ;;  %v5233_v60 = vld [vmem:[%s7417_s2 + $0x344] ss:$16 sps:$4 sm:$0xff]  }
  0xe3   :  { %v4102_v61 = vpop.f32.mrf.mxu0  ;;  %7714 = vst [vmem:[#allocation18_spill] sm:$0xff] %v5233_v60 }
  0xe4   :  { %v147_v3 = vmul.f32 %v141_v62, %v4837_v30  ;;  %v5079_v30 = vld [vmem:[%s7417_s2 + $0x120] ss:$16 sps:$4 sm:$0xff]   ;;  %v5239_v61 = vld [vmem:[%s7417_s2 + $0x368] ss:$16 sps:$4 sm:$0xff]  }
  0xe5   :  { %v143_v63 = vpop.f32.mrf.mxu0  ;;  %7715 = vst [vmem:[#allocation19_spill] sm:$0xff] %v5239_v61  ;;  %v5246_v62 = vld [vmem:[%s7417_s2 + $0x340] ss:$16 sps:$4 sm:$0xff]  }
  0xe6   :  { %v144_v1 = vadd.f32 %v143_v63, %v57_v59  ;;  %v5227_v59 = vld [vmem:[%s7417_s2 + $0x360] ss:$16 sps:$4 sm:$0xff]   ;;  %7716 = vst [vmem:[#allocation20_spill] sm:$0xff] %v5246_v62  ;;  %v5254_v63 = vld [vmem:[%s7417_s2 + $0x324] ss:$16 sps:$4 sm:$0xff]  }
  0xe7   :  { %v4103_v2 = vpop.f32.mrf.mxu0  ;;  %7713 = vst [vmem:[#allocation17_spill] sm:$0xff] %v5227_v59  ;;  %7717 = vst [vmem:[#allocation21_spill] sm:$0xff] %v5254_v63 }
  0xe8   :  { %v148_v4 = vmul.f32 %v144_v1, %v4839_v31  ;;  %v5084_v31 = vld [vmem:[%s7417_s2 + $0x128] ss:$16 sps:$4 sm:$0xff]   ;;  %v5260_v1 = vld [vmem:[%s7417_s2 + $0x320] ss:$16 sps:$4 sm:$0xff]   ;;  %v5265_v2 = vld [vmem:[%s7417_s2 + $0x34c] ss:$16 sps:$4 sm:$0xff]  }
  0xe9   :  { %7718 = vst [vmem:[#allocation22_spill] sm:$0xff] %v5260_v1  ;;  %7719 = vst [vmem:[#allocation23_spill] sm:$0xff] %v5265_v2 }
  0xea   :  { %v181_v7 = vpack.c.bf16 %v148_v4, %v147_v3  ;;  %v5270_v3 = vld [vmem:[%s7417_s2 + $0x348] ss:$16 sps:$4 sm:$0xff]   ;;  %v5278_v4 = vld [vmem:[%s7417_s2 + $0x304] ss:$16 sps:$4 sm:$0xff]  }
  0xeb   :  { %7720 = vst [vmem:[#allocation24_spill] sm:$0xff] %v5270_v3  ;;  %7721 = vst [vmem:[#allocation25_spill] sm:$0xff] %v5278_v4 }
  0xec   :  { %397 = vmatmul.mubr.bf16.vlgmr.msra.gmra.mxu1 %v181_v7  ;;  %440 = vmatmul.mubr.bf16.vlgmr.msra.gmra.mxu0 %v181_v7  ;;  %v5283_v7 = vld [vmem:[%s7417_s2 + $0x300] ss:$16 sps:$4 sm:$0xff]  }
  0xed   :  { %732 = vmatpush1.bf16.msra.mxu1 %v4935_v5  ;;  %773 = vmatpush1.bf16.msra.mxu0 %v4940_v6  ;;  %7722 = vst [vmem:[#allocation26_spill] sm:$0xff] %v5283_v7 }
  0xee   :  { %733 = vmatprep.subr.bf16.mxu1 %v4945_v8  ;;  %774 = vmatprep.subr.bf16.mxu0 %v4950_v9 }
  0xef   :  { %763 = vmatprep.mubr.bf16.mxu1 %v7425_v58  ;;  %804 = vmatprep.mubr.bf16.mxu0 %v7425_v58 }
  0xf1   :  { %734 = vmatpush1.bf16.msra.mxu1 %v4957_v10  ;;  %775 = vmatpush1.bf16.msra.mxu0 %v4962_v11 }
  0xf2   :  { %735 = vmatprep.subr.bf16.mxu1 %v4969_v12  ;;  %776 = vmatprep.subr.bf16.mxu0 %v4974_v13 }
  0xf5   :  { %736 = vmatpush1.bf16.msra.mxu1 %v4983_v14  ;;  %777 = vmatpush1.bf16.msra.mxu0 %v4988_v15 }
  0xf6   :  { %737 = vmatprep.subr.bf16.mxu1 %v4995_v16  ;;  %778 = vmatprep.subr.bf16.mxu0 %v5000_v17 }
  0xf9   :  { %738 = vmatpush1.bf16.msra.mxu1 %v5007_v18  ;;  %779 = vmatpush1.bf16.msra.mxu0 %v5012_v19 }
  0xfa   :  { %739 = vmatprep.subr.bf16.mxu1 %v5019_v20  ;;  %780 = vmatprep.subr.bf16.mxu0 %v5024_v21 }
  0xfd   :  { %740 = vmatpush1.bf16.msra.mxu1 %v5031_v22  ;;  %781 = vmatpush1.bf16.msra.mxu0 %v5036_v23 }
  0xfe   :  { %741 = vmatprep.subr.bf16.mxu1 %v5043_v24  ;;  %782 = vmatprep.subr.bf16.mxu0 %v5048_v25 }
 0x101   :  { %742 = vmatpush1.bf16.msra.mxu1 %v5055_v26  ;;  %783 = vmatpush1.bf16.msra.mxu0 %v5060_v27 }
 0x102   :  { %743 = vmatprep.subr.bf16.mxu1 %v5067_v28  ;;  %784 = vmatprep.subr.bf16.mxu0 %v5072_v29 }
 0x105   :  { %744 = vmatpush1.bf16.msra.mxu1 %v5079_v30  ;;  %785 = vmatpush1.bf16.msra.mxu0 %v5084_v31 }
 0x106   :  { %745 = vmatprep.subr.bf16.mxu1 %v5091_v32  ;;  %786 = vmatprep.subr.bf16.mxu0 %v5096_v33 }
 0x109   :  { %746 = vmatpush1.bf16.msra.mxu1 %v5103_v34  ;;  %787 = vmatpush1.bf16.msra.mxu0 %v5108_v35 }
 0x10a   :  { %999 = vmatprep.subr.bf16.mxu1 %v5122_v38  ;;  %1040 = vmatprep.subr.bf16.mxu0 %v5138_v41 }
 0x10c   :  { %764 = vmatmul.mubr.bf16.vlgmr.msra.gmra.mxu1 %v570_v37  ;;  %805 = vmatmul.mubr.bf16.vlgmr.msra.gmra.mxu0 %v570_v37  ;;  %v5294_v37 = vld [vmem:[%s7417_s2 + $0x328] ss:$16 sps:$4 sm:$0xff]  }
 0x10d   :  { %1031 = vmatprep.mubr.bf16.mxu1 %v7425_v58  ;;  %1072 = vmatprep.mubr.bf16.mxu0 %v7425_v58  ;;  %7724 = vst [vmem:[#allocation28_spill] sm:$0xff] %v5294_v37  ;;  %v817_v58 = vpack.c.bf16 %v3907_v0, %v3907_v0  ;;  %v5318_v0 = vld [vmem:[%s7417_s2 + $0x2e4] ss:$16 sps:$4 sm:$0xff]  }
 0x10e   :  { %1000 = vmatpush1.bf16.msra.mxu1 %v5127_v39  ;;  %1041 = vmatpush1.bf16.msra.mxu0 %v5149_v43  ;;  %7728 = vst [vmem:[#allocation31_spill] sm:$0xff] %v5318_v0 }
 0x10f   :  { %1001 = vmatprep.subr.bf16.mxu1 %v5133_v40  ;;  %1042 = vmatprep.subr.bf16.mxu0 %v5161_v45 }
 0x112   :  { %1002 = vmatpush1.bf16.msra.mxu1 %v5144_v42  ;;  %1043 = vmatpush1.bf16.msra.mxu0 %v5167_v46 }
 0x113   :  { %1003 = vmatprep.subr.bf16.mxu1 %v5156_v44  ;;  %1044 = vmatprep.subr.bf16.mxu0 %v5173_v47 }
 0x116   :  { %1004 = vmatpush1.bf16.msra.mxu1 %v5179_v48  ;;  %1045 = vmatpush1.bf16.msra.mxu0 %v5191_v50 }
 0x117   :  { %1005 = vmatprep.subr.bf16.mxu1 %v5185_v49  ;;  %1046 = vmatprep.subr.bf16.mxu0 %v5197_v51 }
 0x11a   :  { %1006 = vmatpush1.bf16.msra.mxu1 %v5203_v52  ;;  %1047 = vmatpush1.bf16.msra.mxu0 %v5215_v54 }
 0x11b   :  { %1007 = vmatprep.subr.bf16.mxu1 %v5209_v53  ;;  %1048 = vmatprep.subr.bf16.mxu0 %v5221_v55 }
 0x11e   :  { %1008 = vmatpush1.bf16.msra.mxu1 %v5227_v59  ;;  %1049 = vmatpush1.bf16.msra.mxu0 %v5239_v61 }
 0x11f   :  { %1009 = vmatprep.subr.bf16.mxu1 %v5233_v60  ;;  %1050 = vmatprep.subr.bf16.mxu0 %v5265_v2 }
 0x122   :  { %1010 = vmatpush1.bf16.msra.mxu1 %v5246_v62  ;;  %1051 = vmatpush1.bf16.msra.mxu0 %v5270_v3 }
 0x123   :  { %1011 = vmatprep.subr.bf16.mxu1 %v5254_v63  ;;  %1052 = vmatprep.subr.bf16.mxu0 %v5288_v36  ;;  %v5328_v36 = vld [vmem:[%s7417_s2 + $0x2e0] ss:$16 sps:$4 sm:$0xff]   ;;  %v5347_v63 = vld [vmem:[%s7417_s2 + $0x2cc] ss:$16 sps:$4 sm:$0xff]  }
 0x124   :  { %7730 = vst [vmem:[#allocation33_spill] sm:$0xff] %v5328_v36  ;;  %7733 = vst [vmem:[#allocation36_spill] sm:$0xff] %v5347_v63 }
 0x126   :  { %1012 = vmatpush1.bf16.msra.mxu1 %v5260_v1  ;;  %1053 = vmatpush1.bf16.msra.mxu0 %v5294_v37  ;;  %v5310_v1 = vld [vmem:[%s7417_s2 + $0x308] ss:$16 sps:$4 sm:$0xff]   ;;  %v5323_v37 = vld [vmem:[%s7417_s2 + $0x2ec] ss:$16 sps:$4 sm:$0xff]  }
 0x127   :  { %1013 = vmatprep.subr.bf16.mxu1 %v5278_v4  ;;  %v5305_v4 = vld [vmem:[%s7417_s2 + $0x30c] ss:$16 sps:$4 sm:$0xff]   ;;  %7726 = vst [vmem:[#allocation30_spill] sm:$0xff] %v5310_v1  ;;  %7729 = vst [vmem:[#allocation32_spill] sm:$0xff] %v5323_v37 }
 0x128   :  { %7725 = vst [vmem:[#allocation29_spill] sm:$0xff] %v5305_v4  ;;  %1054 = vmatprep.subr.bf16.mxu0 %v5305_v4  ;;  %v5333_v4 = vld [vmem:[%s7417_s2 + $0x2e8] ss:$16 sps:$4 sm:$0xff]  }
 0x129   :  { %7731 = vst [vmem:[#allocation34_spill] sm:$0xff] %v5333_v4 }
 0x12a   :  { %1014 = vmatpush1.bf16.msra.mxu1 %v5283_v7  ;;  %v7727_v7 = vmov 0   ;;  %1055 = vmatpush1.bf16.msra.mxu0 %v5310_v1  ;;  %v5342_v1 = vld [vmem:[%s7417_s2 + $0x2c4] ss:$16 sps:$4 sm:$0xff]  }
 0x12b   :  { %1260 = vmatprep.subr.bf16.mxu1 %v5318_v0  ;;  %1301 = vmatprep.subr.bf16.mxu0 %v5323_v37  ;;  %7732 = vst [vmem:[#allocation35_spill] sm:$0xff] %v5342_v1  ;;  %v5372_v37 = vld [vmem:[%s7417_s2 + $0x2ac] ss:$16 sps:$4 sm:$0xff]  }
 0x12c   :  { %7737 = vst [vmem:[#allocation40_spill] sm:$0xff] %v5372_v37 }
 0x12d   :  { %1032 = vmatmul.mubr.bf16.vlgmr.msra.gmra.mxu1 %v817_v58  ;;  %1073 = vmatmul.mubr.bf16.vlgmr.msra.gmra.mxu0 %v817_v58  ;;  %v5353_v58 = vld [vmem:[%s7417_s2 + $0x2c0] ss:$16 sps:$4 sm:$0xff]  }
 0x12e   :  { %1292 = vmatprep.mubr.bf16.mxu1 %v7727_v7  ;;  %1261 = vmatpush1.bf16.msra.mxu1 %v5328_v36  ;;  %7734 = vst [vmem:[#allocation37_spill] sm:$0xff] %v5353_v58  ;;  %v5367_v36 = vld [vmem:[%s7417_s2 + $0x2a4] ss:$16 sps:$4 sm:$0xff]  }
 0x12f   :  { %1302 = vmatpush1.bf16.msra.mxu0 %v5333_v4  ;;  %1333 = vmatprep.mubr.bf16.mxu0 %v7727_v7  ;;  %v5358_v4 = vld [vmem:[%s7417_s2 + $0x2c8] ss:$16 sps:$4 sm:$0xff]   ;;  %7736 = vst [vmem:[#allocation39_spill] sm:$0xff] %v5367_v36 }
 0x130   :  { %7735 = vst [vmem:[#allocation38_spill] sm:$0xff] %v5358_v4  ;;  %1262 = vmatprep.subr.bf16.mxu1 %v5342_v1  ;;  %1303 = vmatprep.subr.bf16.mxu0 %v5347_v63  ;;  %v5377_v1 = vld [vmem:[%s7417_s2 + $0x2a0] ss:$16 sps:$4 sm:$0xff]   ;;  %v5396_v63 = vld [vmem:[%s7417_s2 + $0x28c] ss:$16 sps:$4 sm:$0xff]  }
 0x131   :  { %7738 = vst [vmem:[#allocation41_spill] sm:$0xff] %v5377_v1  ;;  %7741 = vst [vmem:[#allocation44_spill] sm:$0xff] %v5396_v63 }
 0x132   :  { %1263 = vmatpush1.bf16.msra.mxu1 %v5353_v58  ;;  %v5382_v58 = vld [vmem:[%s7417_s2 + $0x2a8] ss:$16 sps:$4 sm:$0xff]  }
 0x133   :  { %1304 = vmatpush1.bf16.msra.mxu0 %v5358_v4  ;;  %7739 = vst [vmem:[#allocation42_spill] sm:$0xff] %v5382_v58  ;;  %1264 = vmatprep.subr.bf16.mxu1 %v5367_v36  ;;  %v5391_v4 = vld [vmem:[%s7417_s2 + $0x284] ss:$16 sps:$4 sm:$0xff]   ;;  %v5401_v36 = vld [vmem:[%s7417_s2 + $0x280] ss:$16 sps:$4 sm:$0xff]  }
 0x134   :  { %1305 = vmatprep.subr.bf16.mxu0 %v5372_v37  ;;  %7740 = vst [vmem:[#allocation43_spill] sm:$0xff] %v5391_v4  ;;  %7742 = vst [vmem:[#allocation45_spill] sm:$0xff] %v5401_v36  ;;  %v5420_v37 = vld [vmem:[%s7417_s2 + $0x26c] ss:$16 sps:$4 sm:$0xff]  }
 0x135   :  { %7745 = vst [vmem:[#allocation48_spill] sm:$0xff] %v5420_v37 }
 0x136   :  { %1265 = vmatpush1.bf16.msra.mxu1 %v5377_v1  ;;  %v5406_v1 = vld [vmem:[%s7417_s2 + $0x288] ss:$16 sps:$4 sm:$0xff]  }
 0x137   :  { %1306 = vmatpush1.bf16.msra.mxu0 %v5382_v58  ;;  %7743 = vst [vmem:[#allocation46_spill] sm:$0xff] %v5406_v1  ;;  %1266 = vmatprep.subr.bf16.mxu1 %v5391_v4  ;;  %v5415_v58 = vld [vmem:[%s7417_s2 + $0x264] ss:$16 sps:$4 sm:$0xff]   ;;  %v5425_v4 = vld [vmem:[%s7417_s2 + $0x260] ss:$16 sps:$4 sm:$0xff]  }
 0x138   :  { %1307 = vmatprep.subr.bf16.mxu0 %v5396_v63  ;;  %7744 = vst [vmem:[#allocation47_spill] sm:$0xff] %v5415_v58  ;;  %7746 = vst [vmem:[#allocation49_spill] sm:$0xff] %v5425_v4  ;;  %v5444_v63 = vld [vmem:[%s7417_s2 + $0x24c] ss:$16 sps:$4 sm:$0xff]  }
 0x139   :  { %7749 = vst [vmem:[#allocation52_spill] sm:$0xff] %v5444_v63 }
 0x13a   :  { %1267 = vmatpush1.bf16.msra.mxu1 %v5401_v36  ;;  %v5430_v36 = vld [vmem:[%s7417_s2 + $0x268] ss:$16 sps:$4 sm:$0xff]  }
 0x13b   :  { %1308 = vmatpush1.bf16.msra.mxu0 %v5406_v1  ;;  %7747 = vst [vmem:[#allocation50_spill] sm:$0xff] %v5430_v36  ;;  %1268 = vmatprep.subr.bf16.mxu1 %v5415_v58  ;;  %v5439_v1 = vld [vmem:[%s7417_s2 + $0x244] ss:$16 sps:$4 sm:$0xff]   ;;  %v5449_v58 = vld [vmem:[%s7417_s2 + $0x240] ss:$16 sps:$4 sm:$0xff]  }
 0x13c   :  { %1309 = vmatprep.subr.bf16.mxu0 %v5420_v37  ;;  %7748 = vst [vmem:[#allocation51_spill] sm:$0xff] %v5439_v1  ;;  %7750 = vst [vmem:[#allocation53_spill] sm:$0xff] %v5449_v58  ;;  %v5468_v37 = vld [vmem:[%s7417_s2 + $0x22c] ss:$16 sps:$4 sm:$0xff]  }
 0x13d   :  { %7753 = vst [vmem:[#allocation56_spill] sm:$0xff] %v5468_v37 }
 0x13e   :  { %1269 = vmatpush1.bf16.msra.mxu1 %v5425_v4  ;;  %v5454_v4 = vld [vmem:[%s7417_s2 + $0x248] ss:$16 sps:$4 sm:$0xff]  }
 0x13f   :  { %1310 = vmatpush1.bf16.msra.mxu0 %v5430_v36  ;;  %7751 = vst [vmem:[#allocation54_spill] sm:$0xff] %v5454_v4  ;;  %1270 = vmatprep.subr.bf16.mxu1 %v5439_v1  ;;  %v5463_v36 = vld [vmem:[%s7417_s2 + $0x224] ss:$16 sps:$4 sm:$0xff]   ;;  %v5473_v1 = vld [vmem:[%s7417_s2 + $0x220] ss:$16 sps:$4 sm:$0xff]  }
 0x140   :  { %1311 = vmatprep.subr.bf16.mxu0 %v5444_v63  ;;  %7752 = vst [vmem:[#allocation55_spill] sm:$0xff] %v5463_v36  ;;  %7754 = vst [vmem:[#allocation57_spill] sm:$0xff] %v5473_v1  ;;  %v5492_v63 = vld [vmem:[%s7417_s2 + $0x20c] ss:$16 sps:$4 sm:$0xff]  }
 0x141   :  { %7757 = vst [vmem:[#allocation60_spill] sm:$0xff] %v5492_v63 }
 0x142   :  { %1271 = vmatpush1.bf16.msra.mxu1 %v5449_v58  ;;  %v5478_v58 = vld [vmem:[%s7417_s2 + $0x228] ss:$16 sps:$4 sm:$0xff]  }
 0x143   :  { %1312 = vmatpush1.bf16.msra.mxu0 %v5454_v4  ;;  %7755 = vst [vmem:[#allocation58_spill] sm:$0xff] %v5478_v58  ;;  %1272 = vmatprep.subr.bf16.mxu1 %v5463_v36  ;;  %v5487_v4 = vld [vmem:[%s7417_s2 + $0x204] ss:$16 sps:$4 sm:$0xff]   ;;  %v5497_v36 = vld [vmem:[%s7417_s2 + $0x200] ss:$16 sps:$4 sm:$0xff]  }
 0x144   :  { %1313 = vmatprep.subr.bf16.mxu0 %v5468_v37  ;;  %7756 = vst [vmem:[#allocation59_spill] sm:$0xff] %v5487_v4  ;;  %7758 = vst [vmem:[#allocation61_spill] sm:$0xff] %v5497_v36 }
 0x146   :  { %1273 = vmatpush1.bf16.msra.mxu1 %v5473_v1  ;;  %v5502_v1 = vld [vmem:[%s7417_s2 + $0x208] ss:$16 sps:$4 sm:$0xff]  }
 0x147   :  { %1314 = vmatpush1.bf16.msra.mxu0 %v5478_v58  ;;  %7759 = vst [vmem:[#allocation62_spill] sm:$0xff] %v5502_v1  ;;  %1274 = vmatprep.subr.bf16.mxu1 %v5487_v4  ;;  %v184_v58 = vlaneseq  ;;  %v182_v4 = vld [vmem:[%s7419_s4] ss:$8 sm:$0xf] }
 0x148   :  { %1315 = vmatprep.subr.bf16.mxu0 %v5492_v63 }
 0x149   :  { %v5510_v37 = vshrl.u32 %v184_v58, 7 }
 0x14a   :  { %1275 = vmatpush1.bf16.msra.mxu1 %v5497_v36 }
 0x14b   :  { %1316 = vmatpush1.bf16.msra.mxu0 %v5502_v1  ;;  %1365 = vmatprep.subr.bf16.mxu1 %v4916_v56  ;;  %7760 = vst [vmem:[#allocation63_spill] sm:$0xff] %v5510_v37  ;;  %v7527_v0 = vsub.s32 0, %v5510_v37  ;;  %v7530_v3 = vsub.s32 2, %v5510_v37  ;;  %v7533_v63 = vsub.s32 1, %v5510_v37  ;;  %v7536_v36 = vsub.s32 3, %v5510_v37 }
 0x14c   :  { %1406 = vmatprep.subr.bf16.mxu0 %v4921_v57 }
 0x14d   :  { %v187_v56 = vrot.slane %v182_v4, %v7527_v0  ;;  %v195_v57 = vrot.slane %v182_v4, %v7530_v3  ;;  %v191_v58 = vrot.slane %v182_v4, %v7533_v63  ;;  %v199_v1 = vrot.slane %v182_v4, %v7536_v36 }
 0x1ac   :  { %v398_v62 = vpop.f32.mrf.mxu1  ;;  %v441_v2 = vpop.f32.mrf.mxu0 }
 0x1ad   :  { %v399_v60 = vadd.f32 %v398_v62, %v187_v56  ;;  %v442_v61 = vadd.f32 %v441_v2, %v195_v57 }
 0x1ae   :  { %v400_v59 = vpop.f32.mrf.mxu1  ;;  %v443_v55 = vpop.f32.mrf.mxu0 }
 0x1af   :  { %450 = vst [vmem:[#allocation2 + $0x30] sm:$0xff] %v399_v60  ;;  %452 = vst [vmem:[#allocation2 + $0x18] sm:$0xff] %v442_v61  ;;  %v401_v53 = vadd.f32 %v400_v59, %v191_v58  ;;  %v444_v54 = vadd.f32 %v443_v55, %v199_v1 }
 0x1b0   :  { %v402_v0 = vpop.f32.mrf.mxu1  ;;  %v445_v52 = vpop.f32.mrf.mxu0 }
 0x1b1   :  { %451 = vst [vmem:[#allocation2] sm:$0xff] %v401_v53  ;;  %453 = vst [vmem:[#allocation2 + $0x10] sm:$0xff] %v444_v54  ;;  %v403_v3 = vadd.f32 %v402_v0, %v187_v56  ;;  %v446_v51 = vadd.f32 %v445_v52, %v195_v57 }
 0x1b2   :  { %v404_v63 = vpop.f32.mrf.mxu1  ;;  %v447_v49 = vpop.f32.mrf.mxu0 }
 0x1b3   :  { %454 = vst [vmem:[#allocation2 + $0x8] sm:$0xff] %v403_v3  ;;  %456 = vst [vmem:[#allocation2 + $0x28] sm:$0xff] %v446_v51  ;;  %v405_v4 = vadd.f32 %v404_v63, %v191_v58  ;;  %v448_v36 = vadd.f32 %v447_v49, %v199_v1 }
 0x1b5   :  { %455 = vst [vmem:[#allocation2 + $0x20] sm:$0xff] %v405_v4  ;;  %457 = vst [vmem:[#allocation2 + $0x38] sm:$0xff] %v448_v36 }
 0x1b6   :  { %v566_v62 = vld [vmem:[#allocation2 + $0x30] sm:$0x3]  ;;  %v568_v52 = vld [vmem:[#allocation2 + $0x18] sm:$0x3] }
 0x1b8   :  { %v567_v59 = vld [vmem:[#allocation2] sm:$0x3]  ;;  %v569_v49 = vld [vmem:[#allocation2 + $0x10] sm:$0x3] }
 0x1cc   :  { %v765_v2 = vpop.f32.mrf.mxu1  ;;  %v806_v60 = vpop.f32.mrf.mxu0 }
 0x1cd   :  { %v813_v61 = vadd.f32 %v765_v2, %v566_v62  ;;  %v815_v63 = vadd.f32 %v806_v60, %v568_v52 }
 0x1ce   :  { %v767_v55 = vpop.f32.mrf.mxu1  ;;  %v808_v37 = vpop.f32.mrf.mxu0 }
 0x1cf   :  { %v1081_v50 = vmul.f32 0.5, %v813_v61  ;;  %v814_v53 = vadd.f32 %v767_v55, %v567_v59  ;;  %v816_v1 = vadd.f32 %v808_v37, %v569_v49 }
 0x1d0   :  { %v769_v54 = vpop.f32.mrf.mxu1  ;;  %v810_v56 = vpop.f32.mrf.mxu0 }
 0x1d1   :  { %4363 = vtanh.f32 %v1081_v50  ;;  %v1085_v57 = vmul.f32 0.5, %v814_v53  ;;  %v1090_v36 = vmul.f32 0.5, %v816_v1  ;;  %v3908_v50 = vld [vmem:[%s7420_s1 + $0x4] sm:$0x3] }
 0x1d2   :  { %v770_v3 = vpop.f32.mrf.mxu1  ;;  %v811_v51 = vpop.f32.mrf.mxu0 }
 0x1d3   :  { %4365 = vtanh.f32 %v1085_v57 }
 0x1d4   :  { %4367 = vtanh.f32 %v815_v63 }
 0x1d5   :  { %4369 = vtanh.f32 %v1090_v36 }
 0x1de   :  { %v4364_v0 = vpop.eup %4363 }
 0x1df   :  { %v1083_v58 = vmul.f32 0.5, %v4364_v0 }
 0x1e0   :  { %v4366_v4 = vpop.eup %4365 }
 0x1e1   :  { %v1084_v62 = vadd.f32 0.5, %v1083_v58  ;;  %v1087_v2 = vmul.f32 0.5, %v4366_v4  ;;  %v4368_v59 = vpop.eup %4367 }
 0x1e2   :  { %v4370_v37 = vpop.eup %4369 }
 0x1e3   :  { %v1088_v61 = vadd.f32 0.5, %v1087_v2  ;;  %v1095_v53 = vmul.f32 %v4368_v59, %v1084_v62  ;;  %v1092_v54 = vmul.f32 0.5, %v4370_v37  ;;  %v7761_v62 = vld [vmem:[#allocation11_spill] sm:$0xff]  ;;  %v7762_v2 = vld [vmem:[#allocation10_spill] sm:$0xff]  ;;  %v7768_v37 = vld [vmem:[#allocation17_spill] sm:$0xff] }
 0x1e4   :  { %v7765_v59 = vld [vmem:[#allocation15_spill] sm:$0xff] }
 0x1e5   :  { %v1094_v55 = vmul.f32 %v3908_v50, %v1088_v61  ;;  %v1093_v56 = vadd.f32 0.5, %v1092_v54  ;;  %v7763_v50 = vld [vmem:[#allocation12_spill] sm:$0xff]  ;;  %v7764_v61 = vld [vmem:[#allocation13_spill] sm:$0xff]  ;;  %v7769_v54 = vld [vmem:[#allocation19_spill] sm:$0xff] }
 0x1e7   :  { %v5530_v60 = vadd.f32 %v1095_v53, %v1094_v55  ;;  %v7766_v55 = vld [vmem:[#allocation14_spill] sm:$0xff]  ;;  %v7767_v53 = vld [vmem:[#allocation16_spill] sm:$0xff] }
 0x1e9   :  { %4371 = vtanh.f32 %v5530_v60 }
 0x1ed   :  { %v1033_v51 = vpop.f32.mrf.mxu1  ;;  %v1074_v36 = vpop.f32.mrf.mxu0 }
 0x1ef   :  { %v1035_v63 = vpop.f32.mrf.mxu1  ;;  %v1076_v0 = vpop.f32.mrf.mxu0 }
 0x1f1   :  { %v1037_v49 = vpop.f32.mrf.mxu1  ;;  %v1078_v58 = vpop.f32.mrf.mxu0 }
 0x1f2   :  { %v7774_v49 = vld [vmem:[#allocation21_spill] sm:$0xff]  ;;  %v7776_v58 = vld [vmem:[#allocation22_spill] sm:$0xff] }
 0x1f3   :  { %v1038_v1 = vpop.f32.mrf.mxu1  ;;  %v1079_v4 = vpop.f32.mrf.mxu0 }
 0x1f4   :  { %v7775_v1 = vld [vmem:[#allocation27_spill] sm:$0xff]  ;;  %v7777_v4 = vld [vmem:[#allocation28_spill] sm:$0xff] }
 0x1f6   :  { %v4372_v57 = vpop.eup %4371 }
 0x1f7   :  { %v1098_v52 = vmul.f32 %v4372_v57, %v1093_v56  ;;  %v7770_v56 = vld [vmem:[#allocation18_spill] sm:$0xff]  ;;  %v7771_v57 = vld [vmem:[#allocation23_spill] sm:$0xff] }
 0x1f9   :  { %v1099_v3 = vpack.c.bf16 %v1098_v52, %v1098_v52  ;;  %v7772_v52 = vld [vmem:[#allocation20_spill] sm:$0xff] }
 0x1fb   :  { %1293 = vmatmul.mubr.bf16.vlgmr.msra.gmra.mxu1 %v1099_v3  ;;  %1334 = vmatmul.mubr.bf16.vlgmr.msra.gmra.mxu0 %v1099_v3 }
 0x1fc   :  { %1366 = vmatpush1.bf16.msra.mxu1 %v4935_v5  ;;  %1407 = vmatpush1.bf16.msra.mxu0 %v4940_v6 }
 0x1fd   :  { %1367 = vmatprep.subr.bf16.mxu1 %v4945_v8  ;;  %1408 = vmatprep.subr.bf16.mxu0 %v4950_v9 }
 0x1fe   :  { %1397 = vmatprep.mubr.bf16.mxu1 %v7727_v7  ;;  %1438 = vmatprep.mubr.bf16.mxu0 %v7727_v7 }
 0x200   :  { %1368 = vmatpush1.bf16.msra.mxu1 %v4957_v10  ;;  %1409 = vmatpush1.bf16.msra.mxu0 %v4962_v11 }
 0x201   :  { %1369 = vmatprep.subr.bf16.mxu1 %v4969_v12  ;;  %1410 = vmatprep.subr.bf16.mxu0 %v4974_v13 }
 0x204   :  { %1370 = vmatpush1.bf16.msra.mxu1 %v4983_v14  ;;  %1411 = vmatpush1.bf16.msra.mxu0 %v4988_v15 }
 0x205   :  { %1371 = vmatprep.subr.bf16.mxu1 %v4995_v16  ;;  %1412 = vmatprep.subr.bf16.mxu0 %v5000_v17 }
 0x208   :  { %1372 = vmatpush1.bf16.msra.mxu1 %v5007_v18  ;;  %1413 = vmatpush1.bf16.msra.mxu0 %v5012_v19 }
 0x209   :  { %1373 = vmatprep.subr.bf16.mxu1 %v5019_v20  ;;  %1414 = vmatprep.subr.bf16.mxu0 %v5024_v21 }
 0x20c   :  { %1374 = vmatpush1.bf16.msra.mxu1 %v5031_v22  ;;  %1415 = vmatpush1.bf16.msra.mxu0 %v5036_v23 }
 0x20d   :  { %1375 = vmatprep.subr.bf16.mxu1 %v5043_v24  ;;  %1416 = vmatprep.subr.bf16.mxu0 %v5048_v25 }
 0x210   :  { %1376 = vmatpush1.bf16.msra.mxu1 %v5055_v26  ;;  %1417 = vmatpush1.bf16.msra.mxu0 %v5060_v27 }
 0x211   :  { %1377 = vmatprep.subr.bf16.mxu1 %v5067_v28  ;;  %1418 = vmatprep.subr.bf16.mxu0 %v5072_v29 }
 0x214   :  { %1378 = vmatpush1.bf16.msra.mxu1 %v5079_v30  ;;  %1419 = vmatpush1.bf16.msra.mxu0 %v5084_v31 }
 0x215   :  { %1379 = vmatprep.subr.bf16.mxu1 %v5091_v32  ;;  %1420 = vmatprep.subr.bf16.mxu0 %v5096_v33 }
 0x218   :  { %1380 = vmatpush1.bf16.msra.mxu1 %v5103_v34  ;;  %1421 = vmatpush1.bf16.msra.mxu0 %v5108_v35 }
 0x219   :  { %1464 = vmatprep.subr.bf16.mxu1 %v5122_v38  ;;  %1505 = vmatprep.subr.bf16.mxu0 %v5138_v41 }
 0x21b   :  { %1398 = vmatmul.mubr.bf16.vlgmr.msra.gmra.mxu1 %v1099_v3  ;;  %1439 = vmatmul.mubr.bf16.vlgmr.msra.gmra.mxu0 %v1099_v3  ;;  %v7773_v3 = vld [vmem:[#allocation24_spill] sm:$0xff] }
 0x21c   :  { %1465 = vmatpush1.bf16.msra.mxu1 %v5127_v39  ;;  %1506 = vmatpush1.bf16.msra.mxu0 %v5149_v43 }
 0x21d   :  { %1466 = vmatprep.subr.bf16.mxu1 %v5133_v40  ;;  %1507 = vmatprep.subr.bf16.mxu0 %v5161_v45 }
 0x21e   :  { %1496 = vmatprep.mubr.bf16.mxu1 %v7727_v7  ;;  %1537 = vmatprep.mubr.bf16.mxu0 %v7727_v7 }
 0x220   :  { %1467 = vmatpush1.bf16.msra.mxu1 %v5144_v42  ;;  %1508 = vmatpush1.bf16.msra.mxu0 %v5167_v46 }
 0x221   :  { %1468 = vmatprep.subr.bf16.mxu1 %v5156_v44  ;;  %1509 = vmatprep.subr.bf16.mxu0 %v5173_v47 }
 0x224   :  { %1469 = vmatpush1.bf16.msra.mxu1 %v5179_v48  ;;  %1510 = vmatpush1.bf16.msra.mxu0 %v7761_v62 }
 0x225   :  { %1470 = vmatprep.subr.bf16.mxu1 %v7762_v2  ;;  %1511 = vmatprep.subr.bf16.mxu0 %v7763_v50 }
 0x228   :  { %1471 = vmatpush1.bf16.msra.mxu1 %v7764_v61  ;;  %1512 = vmatpush1.bf16.msra.mxu0 %v7765_v59 }
 0x229   :  { %1472 = vmatprep.subr.bf16.mxu1 %v7766_v55  ;;  %1513 = vmatprep.subr.bf16.mxu0 %v7767_v53  ;;  %v7778_v53 = vld [vmem:[#allocation25_spill] sm:$0xff] }
 0x22c   :  { %1473 = vmatpush1.bf16.msra.mxu1 %v7768_v37  ;;  %1514 = vmatpush1.bf16.msra.mxu0 %v7769_v54  ;;  %v7779_v37 = vld [vmem:[#allocation29_spill] sm:$0xff]  ;;  %v7780_v54 = vld [vmem:[#allocation26_spill] sm:$0xff] }
 0x22d   :  { %1474 = vmatprep.subr.bf16.mxu1 %v7770_v56  ;;  %1515 = vmatprep.subr.bf16.mxu0 %v7771_v57  ;;  %v7781_v56 = vld [vmem:[#allocation30_spill] sm:$0xff]  ;;  %v7782_v57 = vld [vmem:[#allocation31_spill] sm:$0xff] }
 0x230   :  { %1475 = vmatpush1.bf16.msra.mxu1 %v7772_v52  ;;  %1516 = vmatpush1.bf16.msra.mxu0 %v7773_v3  ;;  %v7783_v52 = vld [vmem:[#allocation32_spill] sm:$0xff] }
 0x231   :  { %1476 = vmatprep.subr.bf16.mxu1 %v7774_v49  ;;  %1517 = vmatprep.subr.bf16.mxu0 %v7775_v1  ;;  %v3906_v1 = vld [vmem:[%s7419_s4 + $0x1] ss:$8 sm:$0xf] }
 0x232   :  { %v7784_v49 = vld [vmem:[#allocation63_spill] sm:$0xff] }
 0x234   :  { %1477 = vmatpush1.bf16.msra.mxu1 %v7776_v58  ;;  %1518 = vmatpush1.bf16.msra.mxu0 %v7777_v4  ;;  %v7785_v58 = vsub.s32 0, %v7784_v49 }
 0x235   :  { %1478 = vmatprep.subr.bf16.mxu1 %v7778_v53  ;;  %1519 = vmatprep.subr.bf16.mxu0 %v7779_v37  ;;  %v7787_v53 = vsub.s32 1, %v7784_v49 }
 0x236   :  { %v5606_v3 = vrot.slane %v3906_v1, %v7785_v58 }
 0x237   :  { %v5610_v4 = vrot.slane %v3906_v1, %v7787_v53 }
 0x238   :  { %1479 = vmatpush1.bf16.msra.mxu1 %v7780_v54  ;;  %1520 = vmatpush1.bf16.msra.mxu0 %v7781_v56  ;;  %7786 = vst [vmem:[#allocation63_spill] sm:$0xff] %v5606_v3  ;;  %v7789_v54 = vsub.s32 2, %v7784_v49 }
 0x239   :  { %1571 = vmatprep.subr.bf16.mxu1 %v7782_v57  ;;  %1612 = vmatprep.subr.bf16.mxu0 %v7783_v52  ;;  %7788 = vst [vmem:[#allocation64_spill] sm:$0xff] %v5610_v4  ;;  %v1034_v57 = vadd.f32 %v1033_v51, %v5606_v3  ;;  %v1036_v55 = vadd.f32 %v1035_v63, %v5610_v4  ;;  %v7791_v51 = vsub.s32 3, %v7784_v49 }
 0x23a   :  { %v5614_v37 = vrot.slane %v3906_v1, %v7789_v54 }
 0x23b   :  { %v5621_v3 = vrot.slane %v3906_v1, %v7791_v51 }
 0x23c   :  { %7790 = vst [vmem:[#allocation65_spill] sm:$0xff] %v5614_v37  ;;  %v1075_v58 = vadd.f32 %v1074_v36, %v5614_v37 }
 0x23d   :  { %7792 = vst [vmem:[#allocation66_spill] sm:$0xff] %v5621_v3  ;;  %v1077_v63 = vadd.f32 %v1076_v0, %v5621_v3 }
 0x2bb   :  { %v1294_v56 = vpop.f32.mrf.mxu1  ;;  %v1335_v52 = vpop.f32.mrf.mxu0 }
 0x2bc   :  { %v1295_v59 = vadd.f32 %v1294_v56, %v1034_v57  ;;  %v1336_v47 = vadd.f32 %v1335_v52, %v1075_v58  ;;  %v1361_v58 = vld [vmem:[#allocation2 + $0x30] sm:$0xc] }
 0x2bd   :  { %v1296_v61 = vpop.f32.mrf.mxu1  ;;  %v1337_v50 = vpop.f32.mrf.mxu0 }
 0x2be   :  { %v1342_v2 = vmul.f32 0.5, %v1295_v59  ;;  %v1297_v62 = vadd.f32 %v1296_v61, %v1036_v55  ;;  %v1338_v56 = vadd.f32 %v1337_v50, %v1077_v63 }
 0x2bf   :  { %v1298_v48 = vpop.f32.mrf.mxu1  ;;  %v1339_v53 = vpop.f32.mrf.mxu0 }
 0x2c0   :  { %4373 = vtanh.f32 %v1342_v2  ;;  %v1346_v44 = vmul.f32 0.5, %v1297_v62  ;;  %v1351_v57 = vmul.f32 0.5, %v1338_v56  ;;  %v1362_v56 = vld [vmem:[#allocation2] sm:$0xc] }
 0x2c1   :  { %v1299_v54 = vpop.f32.mrf.mxu1  ;;  %v1340_v46 = vpop.f32.mrf.mxu0 }
 0x2c2   :  { %4375 = vtanh.f32 %v1346_v44  ;;  %v3909_v46 = vld [vmem:[%s7420_s1 + $0x6] sm:$0x3] }
 0x2c3   :  { %4377 = vtanh.f32 %v1336_v47 }
 0x2c4   :  { %4379 = vtanh.f32 %v1351_v57 }
 0x2cd   :  { %v4374_v36 = vpop.eup %4373 }
 0x2ce   :  { %v1344_v59 = vmul.f32 0.5, %v4374_v36 }
 0x2cf   :  { %v4376_v61 = vpop.eup %4375 }
 0x2d0   :  { %v1345_v48 = vadd.f32 0.5, %v1344_v59  ;;  %v1348_v55 = vmul.f32 0.5, %v4376_v61  ;;  %v4378_v2 = vpop.eup %4377 }
 0x2d1   :  { %v4380_v1 = vpop.eup %4379 }
 0x2d2   :  { %v1349_v62 = vadd.f32 0.5, %v1348_v55  ;;  %v1356_v52 = vmul.f32 %v4378_v2, %v1345_v48  ;;  %v1353_v59 = vmul.f32 0.5, %v4380_v1  ;;  %v7795_v1 = vld [vmem:[#allocation34_spill] sm:$0xff] }
 0x2d4   :  { %v1355_v49 = vmul.f32 %v3909_v46, %v1349_v62 }
 0x2d6   :  { %v5627_v44 = vadd.f32 %v1356_v52, %v1355_v49  ;;  %v1363_v52 = vld [vmem:[#allocation2 + $0x18] sm:$0xc]  ;;  %v1354_v49 = vadd.f32 0.5, %v1353_v59 }
 0x2d8   :  { %7793 = vst [vmem:[#allocation67_spill] sm:$0xff] %v5627_v44  ;;  %4381 = vtanh.f32 %v5627_v44 }
 0x2db   :  { %v1399_v47 = vpop.f32.mrf.mxu1  ;;  %v1440_v0 = vpop.f32.mrf.mxu0 }
 0x2dc   :  { %v1451_v50 = vrot.slane %v1399_v47, 6  ;;  %v1453_v48 = vrot.slane %v1440_v0, 6  ;;  %v7794_v0 = vld [vmem:[#allocation33_spill] sm:$0xff] }
 0x2dd   :  { %v1401_v53 = vpop.f32.mrf.mxu1  ;;  %v1442_v54 = vpop.f32.mrf.mxu0 }
 0x2de   :  { %v1459_v51 = vadd.f32 %v1451_v50, %v1361_v58  ;;  %v1452_v63 = vrot.slane %v1401_v53, 6  ;;  %v1461_v47 = vadd.f32 %v1453_v48, %v1363_v52  ;;  %v1454_v37 = vrot.slane %v1442_v54, 6  ;;  %v1364_v58 = vld [vmem:[#allocation2 + $0x10] sm:$0xc]  ;;  %v7804_v52 = vld [vmem:[#allocation43_spill] sm:$0xff] }
 0x2df   :  { %v1403_v57 = vpop.f32.mrf.mxu1  ;;  %v1444_v36 = vpop.f32.mrf.mxu0 }
 0x2e0   :  { %v1546_v61 = vmul.f32 0.5, %v1459_v51  ;;  %v1460_v55 = vadd.f32 %v1452_v63, %v1362_v56  ;;  %v1462_v53 = vadd.f32 %v1454_v37, %v1364_v58  ;;  %v7796_v51 = vld [vmem:[#allocation35_spill] sm:$0xff]  ;;  %v7797_v63 = vld [vmem:[#allocation36_spill] sm:$0xff]  ;;  %v7798_v56 = vld [vmem:[#allocation37_spill] sm:$0xff] }
 0x2e1   :  { %v1404_v2 = vpop.f32.mrf.mxu1  ;;  %v1445_v46 = vpop.f32.mrf.mxu0  ;;  %v7800_v57 = vld [vmem:[#allocation39_spill] sm:$0xff]  ;;  %v7801_v36 = vld [vmem:[#allocation40_spill] sm:$0xff] }
 0x2e2   :  { %4383 = vtanh.f32 %v1546_v61  ;;  %v1550_v62 = vmul.f32 0.5, %v1460_v55  ;;  %v7802_v55 = vld [vmem:[#allocation41_spill] sm:$0xff]  ;;  %v7803_v2 = vld [vmem:[#allocation42_spill] sm:$0xff] }
 0x2e4   :  { %4385 = vtanh.f32 %v1550_v62  ;;  %v1560_v62 = vrot.slane %v5530_v60, 6  ;;  %v7810_v60 = vld [vmem:[#allocation49_spill] sm:$0xff] }
 0x2e5   :  { %v4382_v44 = vpop.eup %4381  ;;  %4387 = vtanh.f32 %v1461_v47 }
 0x2e6   :  { %v1359_v3 = vmul.f32 %v4382_v44, %v1354_v49  ;;  %v1555_v44 = vmul.f32 0.5, %v1462_v53  ;;  %v7805_v49 = vld [vmem:[#allocation44_spill] sm:$0xff]  ;;  %v7806_v53 = vld [vmem:[#allocation45_spill] sm:$0xff] }
 0x2e8   :  { %1360 = vst [vmem:[#allocation3] sm:$0x3] %v1359_v3  ;;  %v1463_v50 = vpack.c.bf16 %v1359_v3, %v1359_v3  ;;  %v7799_v3 = vld [vmem:[#allocation38_spill] sm:$0xff]  ;;  %4389 = vtanh.f32 %v1555_v44  ;;  %v7808_v44 = vld [vmem:[#allocation47_spill] sm:$0xff] }
 0x2ea   :  { %1497 = vmatmul.mubr.bf16.vlgmr.msra.gmra.mxu1 %v1463_v50  ;;  %1538 = vmatmul.mubr.bf16.vlgmr.msra.gmra.mxu0 %v1463_v50 }
 0x2eb   :  { %1572 = vmatpush1.bf16.msra.mxu1 %v7794_v0  ;;  %1613 = vmatpush1.bf16.msra.mxu0 %v7795_v1 }
 0x2ec   :  { %1573 = vmatprep.subr.bf16.mxu1 %v7796_v51  ;;  %1614 = vmatprep.subr.bf16.mxu0 %v7797_v63 }
 0x2ed   :  { %1603 = vmatprep.mubr.bf16.mxu1 %v7727_v7  ;;  %1644 = vmatprep.mubr.bf16.mxu0 %v7727_v7 }
 0x2ef   :  { %v4384_v54 = vpop.eup %4383  ;;  %1574 = vmatpush1.bf16.msra.mxu1 %v7798_v56  ;;  %1615 = vmatpush1.bf16.msra.mxu0 %v7799_v3 }
 0x2f0   :  { %v1548_v37 = vmul.f32 0.5, %v4384_v54  ;;  %1575 = vmatprep.subr.bf16.mxu1 %v7800_v57  ;;  %1616 = vmatprep.subr.bf16.mxu0 %v7801_v36  ;;  %v7807_v54 = vld [vmem:[#allocation46_spill] sm:$0xff] }
 0x2f1   :  { %v4386_v59 = vpop.eup %4385 }
 0x2f2   :  { %v1549_v61 = vadd.f32 0.5, %v1548_v37  ;;  %v1552_v48 = vmul.f32 0.5, %v4386_v59  ;;  %v4388_v47 = vpop.eup %4387  ;;  %v7809_v59 = vld [vmem:[#allocation48_spill] sm:$0xff] }
 0x2f3   :  { %1576 = vmatpush1.bf16.msra.mxu1 %v7802_v55  ;;  %1617 = vmatpush1.bf16.msra.mxu0 %v7803_v2 }
 0x2f4   :  { %v1553_v46 = vadd.f32 0.5, %v1552_v48  ;;  %1577 = vmatprep.subr.bf16.mxu1 %v7804_v52  ;;  %1618 = vmatprep.subr.bf16.mxu0 %v7805_v49  ;;  %v1563_v58 = vmul.f32 %v4388_v47, %v1549_v61  ;;  %v7811_v48 = vld [vmem:[#allocation50_spill] sm:$0xff]  ;;  %v7812_v49 = vld [vmem:[#allocation51_spill] sm:$0xff] }
 0x2f5   :  { %v4390_v61 = vpop.eup %4389  ;;  %v7815_v47 = vld [vmem:[#allocation54_spill] sm:$0xff] }
 0x2f6   :  { %v1562_v50 = vmul.f32 %v1560_v62, %v1553_v46  ;;  %v7813_v46 = vld [vmem:[#allocation52_spill] sm:$0xff]  ;;  %v7814_v62 = vld [vmem:[#allocation53_spill] sm:$0xff] }
 0x2f7   :  { %1578 = vmatpush1.bf16.msra.mxu1 %v7806_v53  ;;  %1619 = vmatpush1.bf16.msra.mxu0 %v7807_v54  ;;  %v7819_v54 = vld [vmem:[#allocation58_spill] sm:$0xff]  ;;  %v7822_v53 = vld [vmem:[#allocation61_spill] sm:$0xff] }
 0x2f8   :  { %v5647_v37 = vadd.f32 %v1563_v58, %v1562_v50  ;;  %1579 = vmatprep.subr.bf16.mxu1 %v7808_v44  ;;  %1620 = vmatprep.subr.bf16.mxu0 %v7809_v59  ;;  %v7816_v50 = vld [vmem:[#allocation55_spill] sm:$0xff]  ;;  %v7817_v58 = vld [vmem:[#allocation56_spill] sm:$0xff]  ;;  %v1557_v59 = vmul.f32 0.5, %v4390_v61  ;;  %v7818_v44 = vld [vmem:[#allocation57_spill] sm:$0xff] }
 0x2fa   :  { %4391 = vtanh.f32 %v5647_v37 }
 0x2fb   :  { %1580 = vmatpush1.bf16.msra.mxu1 %v7810_v60  ;;  %1621 = vmatpush1.bf16.msra.mxu0 %v7811_v48  ;;  %v7820_v60 = vld [vmem:[#allocation59_spill] sm:$0xff]  ;;  %v7821_v48 = vld [vmem:[#allocation60_spill] sm:$0xff] }
 0x2fc   :  { %1581 = vmatprep.subr.bf16.mxu1 %v7812_v49  ;;  %1622 = vmatprep.subr.bf16.mxu0 %v7813_v46  ;;  %v1558_v49 = vadd.f32 0.5, %v1557_v59 }
 0x2ff   :  { %1582 = vmatpush1.bf16.msra.mxu1 %v7814_v62  ;;  %1623 = vmatpush1.bf16.msra.mxu0 %v7815_v47  ;;  %v7823_v62 = vld [vmem:[#allocation62_spill] sm:$0xff]  ;;  %v7824_v47 = vld [vmem:[#allocation4_spill] sm:$0xff] }
 0x300   :  { %1583 = vmatprep.subr.bf16.mxu1 %v7816_v50  ;;  %1624 = vmatprep.subr.bf16.mxu0 %v7817_v58  ;;  %v7825_v50 = vld [vmem:[#allocation5_spill] sm:$0xff] }
 0x303   :  { %1584 = vmatpush1.bf16.msra.mxu1 %v7818_v44  ;;  %1625 = vmatpush1.bf16.msra.mxu0 %v7819_v54 }
 0x304   :  { %1585 = vmatprep.subr.bf16.mxu1 %v7820_v60  ;;  %1626 = vmatprep.subr.bf16.mxu0 %v7821_v48 }
 0x307   :  { %v4392_v46 = vpop.eup %4391  ;;  %1586 = vmatpush1.bf16.msra.mxu1 %v7822_v53  ;;  %1627 = vmatpush1.bf16.msra.mxu0 %v7823_v62 }
 0x308   :  { %1676 = vmatprep.subr.bf16.mxu1 %v7824_v47  ;;  %1717 = vmatprep.subr.bf16.mxu0 %v7825_v50  ;;  %v1566_v58 = vmul.f32 %v4392_v46, %v1558_v49 }
 0x30a   :  { %v1567_v61 = vpack.c.bf16 %v1566_v58, %v1566_v58 }
 0x30c   :  { %v1569_v52 = vrot.slane %v1567_v61, 1 }
 0x30e   :  { %1604 = vmatmul.mubr.bf16.vlgmr.msra.gmra.mxu1 %v1569_v52  ;;  %1645 = vmatmul.mubr.bf16.vlgmr.msra.gmra.mxu0 %v1569_v52 }
 0x30f   :  { %1677 = vmatpush1.bf16.msra.mxu1 %v4935_v5  ;;  %1718 = vmatpush1.bf16.msra.mxu0 %v4940_v6  ;;  %v7826_v5 = vld [vmem:[#allocation7_spill] sm:$0xff]  ;;  %v7827_v6 = vld [vmem:[#allocation6_spill] sm:$0xff] }
 0x310   :  { %1678 = vmatprep.subr.bf16.mxu1 %v4945_v8  ;;  %1719 = vmatprep.subr.bf16.mxu0 %v4950_v9  ;;  %v7828_v8 = vld [vmem:[#allocation8_spill] sm:$0xff]  ;;  %v7829_v9 = vld [vmem:[#allocation9_spill] sm:$0xff] }
 0x311   :  { %1708 = vmatprep.mubr.bf16.mxu1 %v7727_v7  ;;  %1749 = vmatprep.mubr.bf16.mxu0 %v7727_v7 }
 0x313   :  { %1679 = vmatpush1.bf16.msra.mxu1 %v4957_v10  ;;  %1720 = vmatpush1.bf16.msra.mxu0 %v4962_v11  ;;  %v7830_v10 = vld [vmem:[#allocation11_spill] sm:$0xff]  ;;  %v7831_v11 = vld [vmem:[#allocation10_spill] sm:$0xff] }
 0x314   :  { %1680 = vmatprep.subr.bf16.mxu1 %v4969_v12  ;;  %1721 = vmatprep.subr.bf16.mxu0 %v4974_v13  ;;  %v7832_v12 = vld [vmem:[#allocation12_spill] sm:$0xff]  ;;  %v7833_v13 = vld [vmem:[#allocation13_spill] sm:$0xff] }
 0x317   :  { %1681 = vmatpush1.bf16.msra.mxu1 %v4983_v14  ;;  %1722 = vmatpush1.bf16.msra.mxu0 %v4988_v15  ;;  %v7834_v14 = vld [vmem:[#allocation15_spill] sm:$0xff]  ;;  %v7835_v15 = vld [vmem:[#allocation14_spill] sm:$0xff] }
 0x318   :  { %1682 = vmatprep.subr.bf16.mxu1 %v4995_v16  ;;  %1723 = vmatprep.subr.bf16.mxu0 %v5000_v17  ;;  %v7836_v16 = vld [vmem:[#allocation16_spill] sm:$0xff]  ;;  %v7837_v17 = vld [vmem:[#allocation17_spill] sm:$0xff] }
 0x31b   :  { %1683 = vmatpush1.bf16.msra.mxu1 %v5007_v18  ;;  %1724 = vmatpush1.bf16.msra.mxu0 %v5012_v19  ;;  %v7838_v18 = vld [vmem:[#allocation19_spill] sm:$0xff]  ;;  %v7839_v19 = vld [vmem:[#allocation18_spill] sm:$0xff] }
 0x31c   :  { %1684 = vmatprep.subr.bf16.mxu1 %v5019_v20  ;;  %1725 = vmatprep.subr.bf16.mxu0 %v5024_v21  ;;  %v7840_v20 = vld [vmem:[#allocation23_spill] sm:$0xff]  ;;  %v7841_v21 = vld [vmem:[#allocation20_spill] sm:$0xff] }
 0x31f   :  { %1685 = vmatpush1.bf16.msra.mxu1 %v5031_v22  ;;  %1726 = vmatpush1.bf16.msra.mxu0 %v5036_v23  ;;  %v7842_v22 = vld [vmem:[#allocation24_spill] sm:$0xff]  ;;  %v7843_v23 = vld [vmem:[#allocation21_spill] sm:$0xff] }
 0x320   :  { %1686 = vmatprep.subr.bf16.mxu1 %v5043_v24  ;;  %1727 = vmatprep.subr.bf16.mxu0 %v5048_v25  ;;  %v7844_v24 = vld [vmem:[#allocation27_spill] sm:$0xff]  ;;  %v7845_v25 = vld [vmem:[#allocation22_spill] sm:$0xff] }
 0x323   :  { %1687 = vmatpush1.bf16.msra.mxu1 %v5055_v26  ;;  %1728 = vmatpush1.bf16.msra.mxu0 %v5060_v27  ;;  %v7846_v26 = vld [vmem:[#allocation28_spill] sm:$0xff]  ;;  %v7847_v27 = vld [vmem:[#allocation25_spill] sm:$0xff] }
 0x324   :  { %1688 = vmatprep.subr.bf16.mxu1 %v5067_v28  ;;  %1729 = vmatprep.subr.bf16.mxu0 %v5072_v29  ;;  %v7848_v28 = vld [vmem:[#allocation29_spill] sm:$0xff]  ;;  %v7849_v29 = vld [vmem:[#allocation26_spill] sm:$0xff] }
 0x327   :  { %1689 = vmatpush1.bf16.msra.mxu1 %v5079_v30  ;;  %1730 = vmatpush1.bf16.msra.mxu0 %v5084_v31  ;;  %v7850_v30 = vld [vmem:[#allocation30_spill] sm:$0xff]  ;;  %v7851_v31 = vld [vmem:[#allocation31_spill] sm:$0xff] }
 0x328   :  { %1690 = vmatprep.subr.bf16.mxu1 %v5091_v32  ;;  %1731 = vmatprep.subr.bf16.mxu0 %v5096_v33  ;;  %v7852_v32 = vld [vmem:[#allocation32_spill] sm:$0xff] }
 0x32b   :  { %1691 = vmatpush1.bf16.msra.mxu1 %v5103_v34  ;;  %1732 = vmatpush1.bf16.msra.mxu0 %v5108_v35 }
 0x32c   :  { %1775 = vmatprep.subr.bf16.mxu1 %v5122_v38  ;;  %1816 = vmatprep.subr.bf16.mxu0 %v5138_v41 }
 0x32e   :  { %1709 = vmatmul.mubr.bf16.vlgmr.msra.gmra.mxu1 %v1569_v52  ;;  %1750 = vmatmul.mubr.bf16.vlgmr.msra.gmra.mxu0 %v1569_v52 }
 0x32f   :  { %1776 = vmatpush1.bf16.msra.mxu1 %v5127_v39  ;;  %1817 = vmatpush1.bf16.msra.mxu0 %v5149_v43  ;;  %v7853_v43 = vld [vmem:[#allocation63_spill] sm:$0xff] }
 0x330   :  { %1777 = vmatprep.subr.bf16.mxu1 %v5133_v40  ;;  %1818 = vmatprep.subr.bf16.mxu0 %v5161_v45 }
 0x331   :  { %1807 = vmatprep.mubr.bf16.mxu1 %v7727_v7  ;;  %1848 = vmatprep.mubr.bf16.mxu0 %v7727_v7 }
 0x333   :  { %1778 = vmatpush1.bf16.msra.mxu1 %v5144_v42  ;;  %1819 = vmatpush1.bf16.msra.mxu0 %v7826_v5 }
 0x334   :  { %1779 = vmatprep.subr.bf16.mxu1 %v7827_v6  ;;  %1820 = vmatprep.subr.bf16.mxu0 %v7828_v8  ;;  %v7854_v8 = vld [vmem:[#allocation65_spill] sm:$0xff] }
 0x337   :  { %1780 = vmatpush1.bf16.msra.mxu1 %v7829_v9  ;;  %1821 = vmatpush1.bf16.msra.mxu0 %v7830_v10 }
 0x338   :  { %1781 = vmatprep.subr.bf16.mxu1 %v7831_v11  ;;  %1822 = vmatprep.subr.bf16.mxu0 %v7832_v12 }
 0x33b   :  { %1782 = vmatpush1.bf16.msra.mxu1 %v7833_v13  ;;  %1823 = vmatpush1.bf16.msra.mxu0 %v7834_v14  ;;  %v7855_v14 = vld [vmem:[#allocation66_spill] sm:$0xff] }
 0x33c   :  { %1783 = vmatprep.subr.bf16.mxu1 %v7835_v15  ;;  %1824 = vmatprep.subr.bf16.mxu0 %v7836_v16 }
 0x33f   :  { %1784 = vmatpush1.bf16.msra.mxu1 %v7837_v17  ;;  %1825 = vmatpush1.bf16.msra.mxu0 %v7838_v18 }
 0x340   :  { %1785 = vmatprep.subr.bf16.mxu1 %v7839_v19  ;;  %1826 = vmatprep.subr.bf16.mxu0 %v7840_v20 }
 0x343   :  { %1786 = vmatpush1.bf16.msra.mxu1 %v7841_v21  ;;  %1827 = vmatpush1.bf16.msra.mxu0 %v7842_v22 }
 0x344   :  { %1787 = vmatprep.subr.bf16.mxu1 %v7843_v23  ;;  %1828 = vmatprep.subr.bf16.mxu0 %v7844_v24 }
 0x347   :  { %1788 = vmatpush1.bf16.msra.mxu1 %v7845_v25  ;;  %1829 = vmatpush1.bf16.msra.mxu0 %v7846_v26  ;;  %v7856_v25 = vld [vmem:[#allocation67_spill] sm:$0xff] }
 0x348   :  { %1789 = vmatprep.subr.bf16.mxu1 %v7847_v27  ;;  %1830 = vmatprep.subr.bf16.mxu0 %v7848_v28 }
 0x34b   :  { %1790 = vmatpush1.bf16.msra.mxu1 %v7849_v29  ;;  %1831 = vmatpush1.bf16.msra.mxu0 %v7850_v30 }
 0x34c   :  { %1882 = vmatprep.subr.bf16.mxu1 %v7851_v31  ;;  %1923 = vmatprep.subr.bf16.mxu0 %v7852_v32 }
 0x3aa   :  { %v1498_v33 = vpop.f32.mrf.mxu1  ;;  %v1539_v34 = vpop.f32.mrf.mxu0 }
 0x3ab   :  { %v1499_v45 = vadd.f32 %v1498_v33, %v7853_v43  ;;  %v1540_v9 = vadd.f32 %v1539_v34, %v7854_v8  ;;  %v1672_v33 = vld [vmem:[#allocation2 + $0x30] sm:$0x30] }
 0x3ac   :  { %v1500_v35 = vpop.f32.mrf.mxu1  ;;  %v1541_v38 = vpop.f32.mrf.mxu0 }
 0x3ad   :  { %v1501_v59 = vadd.f32 %v1500_v35, %v5610_v4  ;;  %v1542_v15 = vadd.f32 %v1541_v38, %v7855_v14 }
 0x3ae   :  { %v1502_v39 = vpop.f32.mrf.mxu1  ;;  %v1543_v40 = vpop.f32.mrf.mxu0 }
 0x3af   :  { %v1673_v40 = vld [vmem:[#allocation2] sm:$0x30] }
 0x3b0   :  { %v1503_v41 = vpop.f32.mrf.mxu1  ;;  %v1544_v42 = vpop.f32.mrf.mxu0 }
 0x3ce   :  { %v1605_v52 = vpop.f32.mrf.mxu1  ;;  %v1646_v49 = vpop.f32.mrf.mxu0 }
 0x3cf   :  { %v1606_v46 = vadd.f32 %v1605_v52, %v1499_v45  ;;  %v1647_v13 = vadd.f32 %v1646_v49, %v1540_v9 }
 0x3d0   :  { %v1607_v47 = vpop.f32.mrf.mxu1  ;;  %v1648_v50 = vpop.f32.mrf.mxu0 }
 0x3d1   :  { %v1653_v58 = vmul.f32 0.5, %v1606_v46  ;;  %v1608_v61 = vadd.f32 %v1607_v47, %v1501_v59  ;;  %v1649_v16 = vadd.f32 %v1648_v50, %v1542_v15 }
 0x3d2   :  { %v1609_v5 = vpop.f32.mrf.mxu1  ;;  %v1650_v6 = vpop.f32.mrf.mxu0 }
 0x3d3   :  { %4393 = vtanh.f32 %v1653_v58  ;;  %v1657_v10 = vmul.f32 0.5, %v1608_v61  ;;  %v1662_v17 = vmul.f32 0.5, %v1649_v16  ;;  %v1674_v58 = vld [vmem:[#allocation2 + $0x18] sm:$0x30] }
 0x3d4   :  { %v1610_v11 = vpop.f32.mrf.mxu1  ;;  %v1651_v12 = vpop.f32.mrf.mxu0 }
 0x3d5   :  { %4395 = vtanh.f32 %v1657_v10  ;;  %v1675_v12 = vld [vmem:[#allocation2 + $0x10] sm:$0x30] }
 0x3d6   :  { %4397 = vtanh.f32 %v1647_v13 }
 0x3d7   :  { %4399 = vtanh.f32 %v1662_v17 }
 0x3e0   :  { %v4394_v18 = vpop.eup %4393 }
 0x3e1   :  { %v1655_v19 = vmul.f32 0.5, %v4394_v18  ;;  %v1871_v18 = vrot.slane %v5647_v37, 6  ;;  %v7864_v37 = vld [vmem:[#allocation50_spill] sm:$0xff] }
 0x3e2   :  { %v4396_v20 = vpop.eup %4395 }
 0x3e3   :  { %v1656_v21 = vadd.f32 0.5, %v1655_v19  ;;  %v1659_v22 = vmul.f32 0.5, %v4396_v20  ;;  %v4398_v24 = vpop.eup %4397  ;;  %v7857_v19 = vld [vmem:[#allocation43_spill] sm:$0xff] }
 0x3e4   :  { %v4400_v32 = vpop.eup %4399 }
 0x3e5   :  { %v1660_v23 = vadd.f32 0.5, %v1659_v22  ;;  %v1667_v27 = vmul.f32 %v4398_v24, %v1656_v21  ;;  %v1664_v45 = vmul.f32 0.5, %v4400_v32  ;;  %v7859_v21 = vld [vmem:[#allocation45_spill] sm:$0xff]  ;;  %v7865_v24 = vld [vmem:[#allocation51_spill] sm:$0xff] }
 0x3e7   :  { %v1666_v26 = vmul.f32 %v1660_v23, %v7856_v25  ;;  %v1665_v61 = vadd.f32 0.5, %v1664_v45  ;;  %v7861_v23 = vld [vmem:[#allocation47_spill] sm:$0xff]  ;;  %v7866_v25 = vld [vmem:[#allocation52_spill] sm:$0xff] }
 0x3e8   :  { %v5843_v45 = vld [vmem:[%s7417_s2 + $0x1ac] ss:$16 sps:$4 sm:$0xff]  }
 0x3e9   :  { %v5741_v28 = vadd.f32 %v1667_v27, %v1666_v26  ;;  %v7867_v27 = vld [vmem:[#allocation53_spill] sm:$0xff] }
 0x3eb   :  { %4401 = vtanh.f32 %v5741_v28 }
 0x3ee   :  { %v1710_v29 = vpop.f32.mrf.mxu1  ;;  %v1751_v30 = vpop.f32.mrf.mxu0 }
 0x3ef   :  { %v1762_v31 = vrot.slane %v1710_v29, 4  ;;  %v1764_v49 = vrot.slane %v1751_v30, 4  ;;  %v7868_v29 = vld [vmem:[#allocation54_spill] sm:$0xff]  ;;  %v7869_v30 = vld [vmem:[#allocation55_spill] sm:$0xff] }
 0x3f0   :  { %v1712_v34 = vpop.f32.mrf.mxu1  ;;  %v1753_v35 = vpop.f32.mrf.mxu0 }
 0x3f1   :  { %v1770_v38 = vadd.f32 %v1762_v31, %v1672_v33  ;;  %v1763_v39 = vrot.slane %v1712_v34, 4  ;;  %v1772_v5 = vadd.f32 %v1764_v49, %v1674_v58  ;;  %v1765_v10 = vrot.slane %v1753_v35, 4  ;;  %v7870_v31 = vld [vmem:[#allocation56_spill] sm:$0xff]  ;;  %v5855_v49 = vld [vmem:[%s7417_s2 + $0x1a8] ss:$16 sps:$4 sm:$0xff]  }
 0x3f2   :  { %v1714_v41 = vpop.f32.mrf.mxu1  ;;  %v1755_v42 = vpop.f32.mrf.mxu0  ;;  %v5783_v35 = vld [vmem:[%s7417_s2 + $0x1e4] ss:$16 sps:$4 sm:$0xff]  }
 0x3f3   :  { %v1857_v52 = vmul.f32 0.5, %v1770_v38  ;;  %v1771_v59 = vadd.f32 %v1763_v39, %v1673_v40  ;;  %v1773_v13 = vadd.f32 %v1765_v10, %v1675_v12  ;;  %v5811_v38 = vld [vmem:[%s7417_s2 + $0x1c4] ss:$16 sps:$4 sm:$0xff]   ;;  %v5817_v39 = vld [vmem:[%s7417_s2 + $0x1cc] ss:$16 sps:$4 sm:$0xff]  }
 0x3f4   :  { %v1715_v46 = vpop.f32.mrf.mxu1  ;;  %v1756_v47 = vpop.f32.mrf.mxu0  ;;  %v5825_v40 = vld [vmem:[%s7417_s2 + $0x1c0] ss:$16 sps:$4 sm:$0xff]   ;;  %v5831_v41 = vld [vmem:[%s7417_s2 + $0x1c8] ss:$16 sps:$4 sm:$0xff]   ;;  %v5837_v42 = vld [vmem:[%s7417_s2 + $0x1a4] ss:$16 sps:$4 sm:$0xff]  }
 0x3f5   :  { %4403 = vtanh.f32 %v1857_v52  ;;  %v1861_v50 = vmul.f32 0.5, %v1771_v59  ;;  %v1866_v15 = vmul.f32 0.5, %v1773_v13  ;;  %v5849_v52 = vld [vmem:[%s7417_s2 + $0x1a0] ss:$16 sps:$4 sm:$0xff]   ;;  %v5861_v59 = vld [vmem:[%s7417_s2 + $0x184] ss:$16 sps:$4 sm:$0xff]  }
 0x3f6   :  { %v5867_v46 = vld [vmem:[%s7417_s2 + $0x18c] ss:$16 sps:$4 sm:$0xff]   ;;  %v5873_v47 = vld [vmem:[%s7417_s2 + $0x180] ss:$16 sps:$4 sm:$0xff]   ;;  %v5885_v58 = vld [vmem:[%s7417_s2 + $0x164] ss:$16 sps:$4 sm:$0xff]  }
 0x3f7   :  { %4405 = vtanh.f32 %v1861_v50  ;;  %v5879_v50 = vld [vmem:[%s7417_s2 + $0x188] ss:$16 sps:$4 sm:$0xff]   ;;  %v5915_v10 = vld [vmem:[%s7417_s2 + $0x14c] ss:$16 sps:$4 sm:$0xff]   ;;  %v5933_v13 = vld [vmem:[%s7417_s2 + $0x124] ss:$16 sps:$4 sm:$0xff]  }
 0x3f8   :  { %v4402_v6 = vpop.eup %4401  ;;  %4407 = vtanh.f32 %v1772_v5  ;;  %v5897_v5 = vld [vmem:[%s7417_s2 + $0x160] ss:$16 sps:$4 sm:$0xff]   ;;  %7873 = vst [vmem:[#allocation35_spill] sm:$0xff] %v5915_v10  ;;  %v5927_v12 = vld [vmem:[%s7417_s2 + $0x148] ss:$16 sps:$4 sm:$0xff]   ;;  %7876 = vst [vmem:[#allocation38_spill] sm:$0xff] %v5933_v13 }
 0x3f9   :  { %v1670_v9 = vmul.f32 %v4402_v6, %v1665_v61  ;;  %4409 = vtanh.f32 %v1866_v15  ;;  %v5891_v61 = vld [vmem:[%s7417_s2 + $0x16c] ss:$16 sps:$4 sm:$0xff]   ;;  %v5903_v6 = vld [vmem:[%s7417_s2 + $0x168] ss:$16 sps:$4 sm:$0xff]   ;;  %7875 = vst [vmem:[#allocation37_spill] sm:$0xff] %v5927_v12 }
 0x3fa   :  { %7871 = vst [vmem:[#allocation33_spill] sm:$0xff] %v5903_v6  ;;  %v5939_v15 = vld [vmem:[%s7417_s2 + $0x12c] ss:$16 sps:$4 sm:$0xff]  }
 0x3fb   :  { %1671 = vst [vmem:[#allocation3 + $0x2] sm:$0x3] %v1670_v9  ;;  %v1774_v11 = vpack.c.bf16 %v1670_v9, %v1670_v9  ;;  %v5909_v9 = vld [vmem:[%s7417_s2 + $0x144] ss:$16 sps:$4 sm:$0xff]   ;;  %7877 = vst [vmem:[#allocation39_spill] sm:$0xff] %v5939_v15 }
 0x3fc   :  { %7872 = vst [vmem:[#allocation34_spill] sm:$0xff] %v5909_v9 }
 0x3fd   :  { %1808 = vmatmul.mubr.bf16.vlgmr.msra.gmra.mxu1 %v1774_v11  ;;  %1849 = vmatmul.mubr.bf16.vlgmr.msra.gmra.mxu0 %v1774_v11  ;;  %v5921_v11 = vld [vmem:[%s7417_s2 + $0x140] ss:$16 sps:$4 sm:$0xff]  }
 0x3fe   :  { %1883 = vmatpush1.bf16.msra.mxu1 %v7794_v0  ;;  %1924 = vmatpush1.bf16.msra.mxu0 %v7795_v1  ;;  %7874 = vst [vmem:[#allocation36_spill] sm:$0xff] %v5921_v11 }
 0x3ff   :  { %1884 = vmatprep.subr.bf16.mxu1 %v7796_v51  ;;  %1925 = vmatprep.subr.bf16.mxu0 %v7797_v63 }
 0x400   :  { %1914 = vmatprep.mubr.bf16.mxu1 %v7727_v7  ;;  %1955 = vmatprep.mubr.bf16.mxu0 %v7727_v7 }
 0x402   :  { %v4404_v16 = vpop.eup %4403  ;;  %1885 = vmatpush1.bf16.msra.mxu1 %v7798_v56  ;;  %1926 = vmatpush1.bf16.msra.mxu0 %v7799_v3  ;;  %v7858_v56 = vld [vmem:[#allocation44_spill] sm:$0xff] }
 0x403   :  { %v1859_v17 = vmul.f32 0.5, %v4404_v16  ;;  %1886 = vmatprep.subr.bf16.mxu1 %v7800_v57  ;;  %1927 = vmatprep.subr.bf16.mxu0 %v7801_v36  ;;  %v7860_v36 = vld [vmem:[#allocation46_spill] sm:$0xff] }
 0x404   :  { %v4406_v0 = vpop.eup %4405  ;;  %v5945_v16 = vld [vmem:[%s7417_s2 + $0x120] ss:$16 sps:$4 sm:$0xff]  }
 0x405   :  { %v1860_v1 = vadd.f32 0.5, %v1859_v17  ;;  %v1863_v51 = vmul.f32 0.5, %v4406_v0  ;;  %v4408_v3 = vpop.eup %4407  ;;  %7878 = vst [vmem:[#allocation40_spill] sm:$0xff] %v5945_v16  ;;  %v5951_v17 = vld [vmem:[%s7417_s2 + $0x128] ss:$16 sps:$4 sm:$0xff]  }
 0x406   :  { %1887 = vmatpush1.bf16.msra.mxu1 %v7802_v55  ;;  %1928 = vmatpush1.bf16.msra.mxu0 %v7803_v2  ;;  %v7862_v55 = vld [vmem:[#allocation48_spill] sm:$0xff]  ;;  %v7863_v2 = vld [vmem:[#allocation49_spill] sm:$0xff]  ;;  %v4410_v26 = vpop.eup %4409  ;;  %7879 = vst [vmem:[#allocation41_spill] sm:$0xff] %v5951_v17 }
 0x407   :  { %v1864_v63 = vadd.f32 0.5, %v1863_v51  ;;  %1888 = vmatprep.subr.bf16.mxu1 %v7857_v19  ;;  %1929 = vmatprep.subr.bf16.mxu0 %v7858_v56  ;;  %v1874_v57 = vmul.f32 %v4408_v3, %v1860_v1  ;;  %v1868_v32 = vmul.f32 0.5, %v4410_v26  ;;  %v5957_v0 = vld [vmem:[%s7417_s2 + $0x104] ss:$16 sps:$4 sm:$0xff]   ;;  %v5963_v1 = vld [vmem:[%s7417_s2 + $0x10c] ss:$16 sps:$4 sm:$0xff]  }
 0x408   :  { %7880 = vst [vmem:[#allocation42_spill] sm:$0xff] %v5957_v0  ;;  %7881 = vst [vmem:[#allocation57_spill] sm:$0xff] %v5963_v1  ;;  %v5969_v51 = vld [vmem:[%s7417_s2 + $0x100] ss:$16 sps:$4 sm:$0xff]   ;;  %v5987_v19 = vld [vmem:[%s7417_s2 + $0x3ec] ss:$16 sps:$4 sm:$0xff]  }
 0x409   :  { %v1873_v20 = vmul.f32 %v1871_v18, %v1864_v63  ;;  %v1869_v33 = vadd.f32 0.5, %v1868_v32  ;;  %7882 = vst [vmem:[#allocation58_spill] sm:$0xff] %v5969_v51  ;;  %v5975_v63 = vld [vmem:[%s7417_s2 + $0x108] ss:$16 sps:$4 sm:$0xff]   ;;  %v5981_v18 = vld [vmem:[%s7417_s2 + $0x3e4] ss:$16 sps:$4 sm:$0xff]  }
 0x40a   :  { %1889 = vmatpush1.bf16.msra.mxu1 %v7859_v21  ;;  %1930 = vmatpush1.bf16.msra.mxu0 %v7860_v36  ;;  %7883 = vst [vmem:[#allocation59_spill] sm:$0xff] %v5975_v63  ;;  %7884 = vst [vmem:[#allocation60_spill] sm:$0xff] %v5981_v18  ;;  %v5995_v56 = vld [vmem:[%s7417_s2 + $0x3e0] ss:$16 sps:$4 sm:$0xff]   ;;  %v6001_v3 = vld [vmem:[%s7417_s2 + $0x3e8] ss:$16 sps:$4 sm:$0xff]  }
 0x40b   :  { %v5761_v22 = vadd.f32 %v1874_v57, %v1873_v20  ;;  %1890 = vmatprep.subr.bf16.mxu1 %v7861_v23  ;;  %1931 = vmatprep.subr.bf16.mxu0 %v7862_v55  ;;  %7885 = vst [vmem:[#allocation61_spill] sm:$0xff] %v5987_v19  ;;  %7886 = vst [vmem:[#allocation62_spill] sm:$0xff] %v5995_v56  ;;  %v6007_v20 = vld [vmem:[%s7417_s2 + $0x3c4] ss:$16 sps:$4 sm:$0xff]   ;;  %v6013_v57 = vld [vmem:[%s7417_s2 + $0x3cc] ss:$16 sps:$4 sm:$0xff]  }
 0x40c   :  { %7887 = vst [vmem:[#allocation4_spill] sm:$0xff] %v6001_v3  ;;  %7888 = vst [vmem:[#allocation5_spill] sm:$0xff] %v6007_v20  ;;  %v6021_v21 = vld [vmem:[%s7417_s2 + $0x3c0] ss:$16 sps:$4 sm:$0xff]   ;;  %v6027_v36 = vld [vmem:[%s7417_s2 + $0x3c8] ss:$16 sps:$4 sm:$0xff]  }
 0x40d   :  { %4411 = vtanh.f32 %v5761_v22  ;;  %7889 = vst [vmem:[#allocation7_spill] sm:$0xff] %v6013_v57  ;;  %7890 = vst [vmem:[#allocation6_spill] sm:$0xff] %v6021_v21  ;;  %v6033_v23 = vld [vmem:[%s7417_s2 + $0x3a4] ss:$16 sps:$4 sm:$0xff]   ;;  %v6039_v55 = vld [vmem:[%s7417_s2 + $0x3ac] ss:$16 sps:$4 sm:$0xff]  }
 0x40e   :  { %1891 = vmatpush1.bf16.msra.mxu1 %v7863_v2  ;;  %1932 = vmatpush1.bf16.msra.mxu0 %v7864_v37  ;;  %7891 = vst [vmem:[#allocation8_spill] sm:$0xff] %v6027_v36  ;;  %7892 = vst [vmem:[#allocation9_spill] sm:$0xff] %v6033_v23  ;;  %v6045_v2 = vld [vmem:[%s7417_s2 + $0x3a0] ss:$16 sps:$4 sm:$0xff]   ;;  %v6051_v37 = vld [vmem:[%s7417_s2 + $0x3a8] ss:$16 sps:$4 sm:$0xff]  }
 0x40f   :  { %1892 = vmatprep.subr.bf16.mxu1 %v7865_v24  ;;  %1933 = vmatprep.subr.bf16.mxu0 %v7866_v25  ;;  %7893 = vst [vmem:[#allocation11_spill] sm:$0xff] %v6039_v55  ;;  %7894 = vst [vmem:[#allocation10_spill] sm:$0xff] %v6045_v2  ;;  %v6057_v24 = vld [vmem:[%s7417_s2 + $0x384] ss:$16 sps:$4 sm:$0xff]   ;;  %v6063_v25 = vld [vmem:[%s7417_s2 + $0x38c] ss:$16 sps:$4 sm:$0xff]  }
 0x410   :  { %7895 = vst [vmem:[#allocation12_spill] sm:$0xff] %v6051_v37  ;;  %7896 = vst [vmem:[#allocation13_spill] sm:$0xff] %v6057_v24  ;;  %v6069_v26 = vld [vmem:[%s7417_s2 + $0x380] ss:$16 sps:$4 sm:$0xff]   ;;  %v6099_v32 = vld [vmem:[%s7417_s2 + $0x368] ss:$16 sps:$4 sm:$0xff]  }
 0x411   :  { %7897 = vst [vmem:[#allocation15_spill] sm:$0xff] %v6063_v25  ;;  %7898 = vst [vmem:[#allocation14_spill] sm:$0xff] %v6069_v26 }
 0x412   :  { %1893 = vmatpush1.bf16.msra.mxu1 %v7867_v27  ;;  %1934 = vmatpush1.bf16.msra.mxu0 %v7868_v29  ;;  %v6075_v27 = vld [vmem:[%s7417_s2 + $0x388] ss:$16 sps:$4 sm:$0xff]   ;;  %v6081_v29 = vld [vmem:[%s7417_s2 + $0x364] ss:$16 sps:$4 sm:$0xff]   ;;  %7903 = vst [vmem:[#allocation23_spill] sm:$0xff] %v6099_v32 }
 0x413   :  { %1894 = vmatprep.subr.bf16.mxu1 %v7869_v30  ;;  %1935 = vmatprep.subr.bf16.mxu0 %v7870_v31  ;;  %7899 = vst [vmem:[#allocation16_spill] sm:$0xff] %v6075_v27  ;;  %7900 = vst [vmem:[#allocation17_spill] sm:$0xff] %v6081_v29  ;;  %v6087_v30 = vld [vmem:[%s7417_s2 + $0x36c] ss:$16 sps:$4 sm:$0xff]   ;;  %v6093_v31 = vld [vmem:[%s7417_s2 + $0x360] ss:$16 sps:$4 sm:$0xff]  }
 0x414   :  { %7901 = vst [vmem:[#allocation19_spill] sm:$0xff] %v6087_v30  ;;  %7902 = vst [vmem:[#allocation18_spill] sm:$0xff] %v6093_v31 }
 0x416   :  { %1895 = vmatpush1.bf16.msra.mxu1 %v7818_v44  ;;  %1936 = vmatpush1.bf16.msra.mxu0 %v7819_v54  ;;  %v5789_v54 = vld [vmem:[%s7417_s2 + $0x1ec] ss:$16 sps:$4 sm:$0xff]  }
 0x417   :  { %1896 = vmatprep.subr.bf16.mxu1 %v7820_v60  ;;  %1937 = vmatprep.subr.bf16.mxu0 %v7821_v48 }
 0x41a   :  { %v4412_v34 = vpop.eup %4411  ;;  %1897 = vmatpush1.bf16.msra.mxu1 %v7822_v53  ;;  %1938 = vmatpush1.bf16.msra.mxu0 %v7823_v62  ;;  %v5799_v53 = vld [vmem:[%s7417_s2 + $0x1e0] ss:$16 sps:$4 sm:$0xff]   ;;  %v5805_v62 = vld [vmem:[%s7417_s2 + $0x1e8] ss:$16 sps:$4 sm:$0xff]  }
 0x41b   :  { %1987 = vmatprep.subr.bf16.mxu1 %v5783_v35  ;;  %2028 = vmatprep.subr.bf16.mxu0 %v5789_v54  ;;  %v1877_v44 = vmul.f32 %v4412_v34, %v1869_v33  ;;  %v6105_v33 = vld [vmem:[%s7417_s2 + $0x344] ss:$16 sps:$4 sm:$0xff]   ;;  %v6111_v34 = vld [vmem:[%s7417_s2 + $0x34c] ss:$16 sps:$4 sm:$0xff]  }
 0x41c   :  { %7904 = vst [vmem:[#allocation20_spill] sm:$0xff] %v6105_v33  ;;  %7905 = vst [vmem:[#allocation24_spill] sm:$0xff] %v6111_v34 }
 0x41d   :  { %v1878_v60 = vpack.c.bf16 %v1877_v44, %v1877_v44  ;;  %v6117_v44 = vld [vmem:[%s7417_s2 + $0x340] ss:$16 sps:$4 sm:$0xff]  }
 0x41e   :  { %7906 = vst [vmem:[#allocation21_spill] sm:$0xff] %v6117_v44 }
 0x41f   :  { %v5792_v48 = vrot.slane %v1878_v60, 2  ;;  %v6123_v60 = vld [vmem:[%s7417_s2 + $0x348] ss:$16 sps:$4 sm:$0xff]  }
 0x420   :  { %7907 = vst [vmem:[#allocation27_spill] sm:$0xff] %v6123_v60 }
 0x421   :  { %1915 = vmatmul.mubr.bf16.vlgmr.msra.gmra.mxu1 %v5792_v48  ;;  %1956 = vmatmul.mubr.bf16.vlgmr.msra.gmra.mxu0 %v5792_v48 }
 0x422   :  { %1988 = vmatpush1.bf16.msra.mxu1 %v5799_v53  ;;  %2029 = vmatpush1.bf16.msra.mxu0 %v5805_v62 }
 0x423   :  { %1989 = vmatprep.subr.bf16.mxu1 %v5811_v38  ;;  %2030 = vmatprep.subr.bf16.mxu0 %v5817_v39 }
 0x424   :  { %2019 = vmatprep.mubr.bf16.mxu1 %v7727_v7  ;;  %2060 = vmatprep.mubr.bf16.mxu0 %v7727_v7 }
 0x426   :  { %1990 = vmatpush1.bf16.msra.mxu1 %v5825_v40  ;;  %2031 = vmatpush1.bf16.msra.mxu0 %v5831_v41 }
 0x427   :  { %1991 = vmatprep.subr.bf16.mxu1 %v5837_v42  ;;  %2032 = vmatprep.subr.bf16.mxu0 %v5843_v45 }
 0x42a   :  { %1992 = vmatpush1.bf16.msra.mxu1 %v5849_v52  ;;  %2033 = vmatpush1.bf16.msra.mxu0 %v5855_v49 }
 0x42b   :  { %1993 = vmatprep.subr.bf16.mxu1 %v5861_v59  ;;  %2034 = vmatprep.subr.bf16.mxu0 %v5867_v46 }
 0x42e   :  { %1994 = vmatpush1.bf16.msra.mxu1 %v5873_v47  ;;  %2035 = vmatpush1.bf16.msra.mxu0 %v5879_v50 }
 0x42f   :  { %1995 = vmatprep.subr.bf16.mxu1 %v5885_v58  ;;  %2036 = vmatprep.subr.bf16.mxu0 %v5891_v61 }
 0x432   :  { %1996 = vmatpush1.bf16.msra.mxu1 %v5897_v5  ;;  %2037 = vmatpush1.bf16.msra.mxu0 %v5903_v6 }
 0x433   :  { %1997 = vmatprep.subr.bf16.mxu1 %v5909_v9  ;;  %2038 = vmatprep.subr.bf16.mxu0 %v5915_v10 }
 0x436   :  { %1998 = vmatpush1.bf16.msra.mxu1 %v5921_v11  ;;  %2039 = vmatpush1.bf16.msra.mxu0 %v5927_v12 }
 0x437   :  { %1999 = vmatprep.subr.bf16.mxu1 %v5933_v13  ;;  %2040 = vmatprep.subr.bf16.mxu0 %v5939_v15 }
 0x43a   :  { %2000 = vmatpush1.bf16.msra.mxu1 %v5945_v16  ;;  %2041 = vmatpush1.bf16.msra.mxu0 %v5951_v17 }
 0x43b   :  { %2001 = vmatprep.subr.bf16.mxu1 %v5957_v0  ;;  %2042 = vmatprep.subr.bf16.mxu0 %v5963_v1 }
 0x43e   :  { %2002 = vmatpush1.bf16.msra.mxu1 %v5969_v51  ;;  %2043 = vmatpush1.bf16.msra.mxu0 %v5975_v63 }
 0x43f   :  { %2086 = vmatprep.subr.bf16.mxu1 %v5981_v18  ;;  %2127 = vmatprep.subr.bf16.mxu0 %v5987_v19 }
 0x441   :  { %2020 = vmatmul.mubr.bf16.vlgmr.msra.gmra.mxu1 %v5792_v48  ;;  %2061 = vmatmul.mubr.bf16.vlgmr.msra.gmra.mxu0 %v5792_v48  ;;  %v6129_v48 = vld [vmem:[%s7417_s2 + $0x324] ss:$16 sps:$4 sm:$0xff]  }
 0x442   :  { %2087 = vmatpush1.bf16.msra.mxu1 %v5995_v56  ;;  %2128 = vmatpush1.bf16.msra.mxu0 %v6001_v3  ;;  %7908 = vst [vmem:[#allocation22_spill] sm:$0xff] %v6129_v48 }
 0x443   :  { %2088 = vmatprep.subr.bf16.mxu1 %v6007_v20  ;;  %2129 = vmatprep.subr.bf16.mxu0 %v6013_v57 }
 0x444   :  { %2118 = vmatprep.mubr.bf16.mxu1 %v7727_v7  ;;  %2159 = vmatprep.mubr.bf16.mxu0 %v7727_v7 }
 0x446   :  { %2089 = vmatpush1.bf16.msra.mxu1 %v6021_v21  ;;  %2130 = vmatpush1.bf16.msra.mxu0 %v6027_v36 }
 0x447   :  { %2090 = vmatprep.subr.bf16.mxu1 %v6033_v23  ;;  %2131 = vmatprep.subr.bf16.mxu0 %v6039_v55 }
 0x44a   :  { %2091 = vmatpush1.bf16.msra.mxu1 %v6045_v2  ;;  %2132 = vmatpush1.bf16.msra.mxu0 %v6051_v37 }
 0x44b   :  { %2092 = vmatprep.subr.bf16.mxu1 %v6057_v24  ;;  %2133 = vmatprep.subr.bf16.mxu0 %v6063_v25 }
 0x44e   :  { %2093 = vmatpush1.bf16.msra.mxu1 %v6069_v26  ;;  %2134 = vmatpush1.bf16.msra.mxu0 %v6075_v27 }
 0x44f   :  { %2094 = vmatprep.subr.bf16.mxu1 %v6081_v29  ;;  %2135 = vmatprep.subr.bf16.mxu0 %v6087_v30 }
 0x452   :  { %2095 = vmatpush1.bf16.msra.mxu1 %v6093_v31  ;;  %2136 = vmatpush1.bf16.msra.mxu0 %v6099_v32 }
 0x453   :  { %2096 = vmatprep.subr.bf16.mxu1 %v6105_v33  ;;  %2137 = vmatprep.subr.bf16.mxu0 %v6111_v34  ;;  %v6135_v34 = vld [vmem:[%s7417_s2 + $0x32c] ss:$16 sps:$4 sm:$0xff]  }
 0x454   :  { %7909 = vst [vmem:[#allocation28_spill] sm:$0xff] %v6135_v34 }
 0x456   :  { %2097 = vmatpush1.bf16.msra.mxu1 %v6117_v44  ;;  %2138 = vmatpush1.bf16.msra.mxu0 %v6123_v60  ;;  %v6141_v44 = vld [vmem:[%s7417_s2 + $0x320] ss:$16 sps:$4 sm:$0xff]   ;;  %v6147_v60 = vld [vmem:[%s7417_s2 + $0x328] ss:$16 sps:$4 sm:$0xff]  }
 0x457   :  { %2098 = vmatprep.subr.bf16.mxu1 %v6129_v48  ;;  %2139 = vmatprep.subr.bf16.mxu0 %v6135_v34  ;;  %7910 = vst [vmem:[#allocation25_spill] sm:$0xff] %v6141_v44  ;;  %7911 = vst [vmem:[#allocation29_spill] sm:$0xff] %v6147_v60  ;;  %v6153_v48 = vld [vmem:[%s7417_s2 + $0x304] ss:$16 sps:$4 sm:$0xff]   ;;  %v6159_v34 = vld [vmem:[%s7417_s2 + $0x30c] ss:$16 sps:$4 sm:$0xff]  }
 0x458   :  { %7912 = vst [vmem:[#allocation26_spill] sm:$0xff] %v6153_v48  ;;  %7913 = vst [vmem:[#allocation30_spill] sm:$0xff] %v6159_v34 }
 0x45a   :  { %2099 = vmatpush1.bf16.msra.mxu1 %v6141_v44  ;;  %2140 = vmatpush1.bf16.msra.mxu0 %v6147_v60  ;;  %v6165_v44 = vld [vmem:[%s7417_s2 + $0x300] ss:$16 sps:$4 sm:$0xff]   ;;  %v6171_v60 = vld [vmem:[%s7417_s2 + $0x308] ss:$16 sps:$4 sm:$0xff]  }
 0x45b   :  { %2100 = vmatprep.subr.bf16.mxu1 %v6153_v48  ;;  %2141 = vmatprep.subr.bf16.mxu0 %v6159_v34  ;;  %7914 = vst [vmem:[#allocation31_spill] sm:$0xff] %v6165_v44  ;;  %7915 = vst [vmem:[#allocation32_spill] sm:$0xff] %v6171_v60  ;;  %v6177_v48 = vld [vmem:[%s7417_s2 + $0x2e4] ss:$16 sps:$4 sm:$0xff]   ;;  %v6183_v34 = vld [vmem:[%s7417_s2 + $0x2ec] ss:$16 sps:$4 sm:$0xff]  }
 0x45c   :  { %7916 = vst [vmem:[#allocation65_spill] sm:$0xff] %v6177_v48  ;;  %7917 = vst [vmem:[#allocation67_spill] sm:$0xff] %v6183_v34 }
 0x45e   :  { %2101 = vmatpush1.bf16.msra.mxu1 %v6165_v44  ;;  %2142 = vmatpush1.bf16.msra.mxu0 %v6171_v60 }
 0x45f   :  { %2193 = vmatprep.subr.bf16.mxu1 %v6177_v48  ;;  %2234 = vmatprep.subr.bf16.mxu0 %v6183_v34 }
 0x4bd   :  { %v1809_v44 = vpop.f32.mrf.mxu1  ;;  %v1850_v33 = vpop.f32.mrf.mxu0 }
 0x4be   :  { %v1810_v26 = vadd.f32 %v1809_v44, %v7853_v43  ;;  %v1851_v57 = vadd.f32 %v1850_v33, %v7854_v8 }
 0x4bf   :  { %v1811_v32 = vpop.f32.mrf.mxu1  ;;  %v1852_v31 = vpop.f32.mrf.mxu0 }
 0x4c0   :  { %v1812_v48 = vadd.f32 %v1811_v32, %v5610_v4  ;;  %v1853_v44 = vadd.f32 %v1852_v31, %v7855_v14 }
 0x4c1   :  { %v1813_v30 = vpop.f32.mrf.mxu1  ;;  %v1854_v60 = vpop.f32.mrf.mxu0 }
 0x4c3   :  { %v1814_v29 = vpop.f32.mrf.mxu1  ;;  %v1855_v27 = vpop.f32.mrf.mxu0 }
 0x4e1   :  { %v1916_v25 = vpop.f32.mrf.mxu1  ;;  %v1957_v24 = vpop.f32.mrf.mxu0 }
 0x4e2   :  { %v1917_v37 = vadd.f32 %v1916_v25, %v1810_v26  ;;  %v1958_v27 = vadd.f32 %v1957_v24, %v1851_v57 }
 0x4e3   :  { %v1918_v2 = vpop.f32.mrf.mxu1  ;;  %v1959_v55 = vpop.f32.mrf.mxu0 }
 0x4e4   :  { %v1964_v23 = vmul.f32 0.5, %v1917_v37  ;;  %v1919_v36 = vadd.f32 %v1918_v2, %v1812_v48  ;;  %v1960_v43 = vadd.f32 %v1959_v55, %v1853_v44 }
 0x4e5   :  { %v1920_v34 = vpop.f32.mrf.mxu1  ;;  %v1961_v21 = vpop.f32.mrf.mxu0 }
 0x4e6   :  { %4413 = vtanh.f32 %v1964_v23  ;;  %v1968_v30 = vmul.f32 0.5, %v1919_v36  ;;  %v1973_v32 = vmul.f32 0.5, %v1960_v43  ;;  %v1983_v43 = vld [vmem:[#allocation2 + $0x30] sm:$0xc0] }
 0x4e7   :  { %v1921_v60 = vpop.f32.mrf.mxu1  ;;  %v1962_v29 = vpop.f32.mrf.mxu0 }
 0x4e8   :  { %4415 = vtanh.f32 %v1968_v30 }
 0x4e9   :  { %4417 = vtanh.f32 %v1958_v27 }
 0x4ea   :  { %4419 = vtanh.f32 %v1973_v32 }
 0x4f3   :  { %v4414_v25 = vpop.eup %4413 }
 0x4f4   :  { %v1966_v26 = vmul.f32 0.5, %v4414_v25 }
 0x4f5   :  { %v4416_v4 = vpop.eup %4415 }
 0x4f6   :  { %v1967_v37 = vadd.f32 0.5, %v1966_v26  ;;  %v1970_v2 = vmul.f32 0.5, %v4416_v4  ;;  %v4418_v34 = vpop.eup %4417  ;;  %v1984_v4 = vld [vmem:[#allocation2] sm:$0xc0] }
 0x4f7   :  { %v4420_v55 = vpop.eup %4419 }
 0x4f8   :  { %v1971_v21 = vadd.f32 0.5, %v1970_v2  ;;  %v1978_v36 = vmul.f32 %v4418_v34, %v1967_v37  ;;  %v1975_v32 = vmul.f32 0.5, %v4420_v55  ;;  %v1985_v34 = vld [vmem:[#allocation2 + $0x18] sm:$0xc0]  ;;  %v6203_v55 = vld [vmem:[%s7417_s2 + $0x2e8] ss:$16 sps:$4 sm:$0xff]  }
 0x4fa   :  { %v1977_v23 = vmul.f32 %v1971_v21, %v5741_v28 }
 0x4fc   :  { %v6191_v33 = vadd.f32 %v1978_v36, %v1977_v23  ;;  %v1976_v23 = vadd.f32 0.5, %v1975_v32  ;;  %v6241_v32 = vld [vmem:[%s7417_s2 + $0x2ac] ss:$16 sps:$4 sm:$0xff]  }
 0x4fe   :  { %7918 = vst [vmem:[#allocation43_spill] sm:$0xff] %v6191_v33  ;;  %4421 = vtanh.f32 %v6191_v33 }
 0x501   :  { %v2021_v57 = vpop.f32.mrf.mxu1  ;;  %v2062_v24 = vpop.f32.mrf.mxu0 }
 0x502   :  { %v2073_v31 = vrot.slane %v2021_v57, 2  ;;  %v2075_v28 = vrot.slane %v2062_v24, 2  ;;  %v6197_v24 = vld [vmem:[%s7417_s2 + $0x2e0] ss:$16 sps:$4 sm:$0xff]  }
 0x503   :  { %v2023_v48 = vpop.f32.mrf.mxu1  ;;  %v2064_v30 = vpop.f32.mrf.mxu0 }
 0x504   :  { %v2081_v60 = vadd.f32 %v2073_v31, %v1983_v43  ;;  %v2074_v29 = vrot.slane %v2023_v48, 2  ;;  %v2083_v36 = vadd.f32 %v2075_v28, %v1985_v34  ;;  %v2076_v14 = vrot.slane %v2064_v30, 2  ;;  %v1986_v43 = vld [vmem:[#allocation2 + $0x10] sm:$0xc0] }
 0x505   :  { %v2025_v27 = vpop.f32.mrf.mxu1  ;;  %v2066_v44 = vpop.f32.mrf.mxu0  ;;  %v2182_v34 = vrot.slane %v5761_v22, 6  ;;  %v6272_v22 = vld [vmem:[%s7417_s2 + $0x280] ss:$16 sps:$4 sm:$0xff]  }
 0x506   :  { %v2168_v25 = vmul.f32 0.5, %v2081_v60  ;;  %v2082_v26 = vadd.f32 %v2074_v29, %v1984_v4  ;;  %v2084_v48 = vadd.f32 %v2076_v14, %v1986_v43  ;;  %v6209_v14 = vld [vmem:[%s7417_s2 + $0x2c4] ss:$16 sps:$4 sm:$0xff]   ;;  %v6223_v29 = vld [vmem:[%s7417_s2 + $0x2c0] ss:$16 sps:$4 sm:$0xff]  }
 0x507   :  { %v2026_v37 = vpop.f32.mrf.mxu1  ;;  %v2067_v2 = vpop.f32.mrf.mxu0  ;;  %v6229_v4 = vld [vmem:[%s7417_s2 + $0x2c8] ss:$16 sps:$4 sm:$0xff]   ;;  %v6235_v44 = vld [vmem:[%s7417_s2 + $0x2a4] ss:$16 sps:$4 sm:$0xff]  }
 0x508   :  { %4423 = vtanh.f32 %v2168_v25  ;;  %v2172_v21 = vmul.f32 0.5, %v2082_v26  ;;  %v2177_v30 = vmul.f32 0.5, %v2084_v48  ;;  %v6247_v37 = vld [vmem:[%s7417_s2 + $0x2a0] ss:$16 sps:$4 sm:$0xff]   ;;  %v6253_v2 = vld [vmem:[%s7417_s2 + $0x2a8] ss:$16 sps:$4 sm:$0xff]  }
 0x509   :  { %v6278_v48 = vld [vmem:[%s7417_s2 + $0x288] ss:$16 sps:$4 sm:$0xff]  }
 0x50a   :  { %4425 = vtanh.f32 %v2172_v21 }
 0x50b   :  { %v4422_v57 = vpop.eup %4421  ;;  %4427 = vtanh.f32 %v2083_v36  ;;  %v6266_v36 = vld [vmem:[%s7417_s2 + $0x28c] ss:$16 sps:$4 sm:$0xff]  }
 0x50c   :  { %v1981_v33 = vmul.f32 %v4422_v57, %v1976_v23  ;;  %4429 = vtanh.f32 %v2177_v30  ;;  %v6260_v23 = vld [vmem:[%s7417_s2 + $0x284] ss:$16 sps:$4 sm:$0xff]  }
 0x50e   :  { %1982 = vst [vmem:[#allocation3 + $0x4] sm:$0x3] %v1981_v33  ;;  %v2085_v31 = vpack.c.bf16 %v1981_v33, %v1981_v33  ;;  %v6215_v33 = vld [vmem:[%s7417_s2 + $0x2cc] ss:$16 sps:$4 sm:$0xff]  }
 0x510   :  { %2119 = vmatmul.mubr.bf16.vlgmr.msra.gmra.mxu1 %v2085_v31  ;;  %2160 = vmatmul.mubr.bf16.vlgmr.msra.gmra.mxu0 %v2085_v31 }
 0x511   :  { %2194 = vmatpush1.bf16.msra.mxu1 %v6197_v24  ;;  %2235 = vmatpush1.bf16.msra.mxu0 %v6203_v55 }
 0x512   :  { %2195 = vmatprep.subr.bf16.mxu1 %v6209_v14  ;;  %2236 = vmatprep.subr.bf16.mxu0 %v6215_v33 }
 0x513   :  { %2225 = vmatprep.mubr.bf16.mxu1 %v7727_v7  ;;  %2266 = vmatprep.mubr.bf16.mxu0 %v7727_v7 }
 0x515   :  { %v4424_v60 = vpop.eup %4423  ;;  %2196 = vmatpush1.bf16.msra.mxu1 %v6223_v29  ;;  %2237 = vmatpush1.bf16.msra.mxu0 %v6229_v4 }
 0x516   :  { %v2170_v27 = vmul.f32 0.5, %v4424_v60  ;;  %2197 = vmatprep.subr.bf16.mxu1 %v6235_v44  ;;  %2238 = vmatprep.subr.bf16.mxu0 %v6241_v32  ;;  %v6286_v60 = vld [vmem:[%s7417_s2 + $0x264] ss:$16 sps:$4 sm:$0xff]  }
 0x517   :  { %v4426_v25 = vpop.eup %4425 }
 0x518   :  { %v2171_v28 = vadd.f32 0.5, %v2170_v27  ;;  %v2174_v26 = vmul.f32 0.5, %v4426_v25  ;;  %v4428_v57 = vpop.eup %4427  ;;  %v6292_v27 = vld [vmem:[%s7417_s2 + $0x26c] ss:$16 sps:$4 sm:$0xff]   ;;  %v6299_v25 = vld [vmem:[%s7417_s2 + $0x260] ss:$16 sps:$4 sm:$0xff]  }
 0x519   :  { %2198 = vmatpush1.bf16.msra.mxu1 %v6247_v37  ;;  %2239 = vmatpush1.bf16.msra.mxu0 %v6253_v2 }
 0x51a   :  { %v2175_v21 = vadd.f32 0.5, %v2174_v26  ;;  %2199 = vmatprep.subr.bf16.mxu1 %v6260_v23  ;;  %2240 = vmatprep.subr.bf16.mxu0 %v6266_v36  ;;  %v2185_v43 = vmul.f32 %v4428_v57, %v2171_v28  ;;  %v6305_v28 = vld [vmem:[%s7417_s2 + $0x268] ss:$16 sps:$4 sm:$0xff]   ;;  %v6311_v26 = vld [vmem:[%s7417_s2 + $0x244] ss:$16 sps:$4 sm:$0xff]  }
 0x51b   :  { %7919 = vst [vmem:[#allocation44_spill] sm:$0xff] %v6305_v28  ;;  %7920 = vst [vmem:[#allocation45_spill] sm:$0xff] %v6311_v26  ;;  %v6323_v57 = vld [vmem:[%s7417_s2 + $0x240] ss:$16 sps:$4 sm:$0xff]  }
 0x51c   :  { %v2184_v31 = vmul.f32 %v2182_v34, %v2175_v21  ;;  %v6317_v21 = vld [vmem:[%s7417_s2 + $0x24c] ss:$16 sps:$4 sm:$0xff]   ;;  %v4430_v34 = vpop.eup %4429  ;;  %7922 = vst [vmem:[#allocation47_spill] sm:$0xff] %v6323_v57 }
 0x51d   :  { %2200 = vmatpush1.bf16.msra.mxu1 %v6272_v22  ;;  %2241 = vmatpush1.bf16.msra.mxu0 %v6278_v48  ;;  %7921 = vst [vmem:[#allocation46_spill] sm:$0xff] %v6317_v21 }
 0x51e   :  { %v6281_v30 = vadd.f32 %v2185_v43, %v2184_v31  ;;  %2201 = vmatprep.subr.bf16.mxu1 %v6286_v60  ;;  %2242 = vmatprep.subr.bf16.mxu0 %v6292_v27  ;;  %v6329_v31 = vld [vmem:[%s7417_s2 + $0x248] ss:$16 sps:$4 sm:$0xff]   ;;  %v6335_v43 = vld [vmem:[%s7417_s2 + $0x224] ss:$16 sps:$4 sm:$0xff]  }
 0x51f   :  { %7923 = vst [vmem:[#allocation48_spill] sm:$0xff] %v6329_v31  ;;  %7924 = vst [vmem:[#allocation49_spill] sm:$0xff] %v6335_v43 }
 0x520   :  { %4431 = vtanh.f32 %v6281_v30 }
 0x521   :  { %2202 = vmatpush1.bf16.msra.mxu1 %v6299_v25  ;;  %2243 = vmatpush1.bf16.msra.mxu0 %v6305_v28 }
 0x522   :  { %2203 = vmatprep.subr.bf16.mxu1 %v6311_v26  ;;  %2244 = vmatprep.subr.bf16.mxu0 %v6317_v21  ;;  %v6341_v21 = vld [vmem:[%s7417_s2 + $0x22c] ss:$16 sps:$4 sm:$0xff]   ;;  %v6347_v26 = vld [vmem:[%s7417_s2 + $0x220] ss:$16 sps:$4 sm:$0xff]  }
 0x523   :  { %7925 = vst [vmem:[#allocation50_spill] sm:$0xff] %v6341_v21  ;;  %7926 = vst [vmem:[#allocation51_spill] sm:$0xff] %v6347_v26 }
 0x525   :  { %2204 = vmatpush1.bf16.msra.mxu1 %v6323_v57  ;;  %2245 = vmatpush1.bf16.msra.mxu0 %v6329_v31  ;;  %v2179_v57 = vmul.f32 0.5, %v4430_v34  ;;  %v6353_v31 = vld [vmem:[%s7417_s2 + $0x228] ss:$16 sps:$4 sm:$0xff]   ;;  %v6365_v34 = vld [vmem:[%s7417_s2 + $0x20c] ss:$16 sps:$4 sm:$0xff]  }
 0x526   :  { %2205 = vmatprep.subr.bf16.mxu1 %v6335_v43  ;;  %2246 = vmatprep.subr.bf16.mxu0 %v6341_v21  ;;  %7927 = vst [vmem:[#allocation52_spill] sm:$0xff] %v6353_v31  ;;  %v6359_v43 = vld [vmem:[%s7417_s2 + $0x204] ss:$16 sps:$4 sm:$0xff]   ;;  %7929 = vst [vmem:[#allocation54_spill] sm:$0xff] %v6365_v34 }
 0x527   :  { %7928 = vst [vmem:[#allocation53_spill] sm:$0xff] %v6359_v43 }
 0x529   :  { %2206 = vmatpush1.bf16.msra.mxu1 %v6347_v26  ;;  %2247 = vmatpush1.bf16.msra.mxu0 %v6353_v31  ;;  %v2180_v26 = vadd.f32 0.5, %v2179_v57  ;;  %v6371_v31 = vld [vmem:[%s7417_s2 + $0x200] ss:$16 sps:$4 sm:$0xff]  }
 0x52a   :  { %2207 = vmatprep.subr.bf16.mxu1 %v6359_v43  ;;  %2248 = vmatprep.subr.bf16.mxu0 %v6365_v34  ;;  %v6377_v43 = vld [vmem:[%s7417_s2 + $0x208] ss:$16 sps:$4 sm:$0xff]  }
 0x52d   :  { %v4432_v21 = vpop.eup %4431  ;;  %2208 = vmatpush1.bf16.msra.mxu1 %v6371_v31  ;;  %2249 = vmatpush1.bf16.msra.mxu0 %v6377_v43 }
 0x52e   :  { %2298 = vmatprep.subr.bf16.mxu1 %v5783_v35  ;;  %2339 = vmatprep.subr.bf16.mxu0 %v5789_v54  ;;  %v2188_v57 = vmul.f32 %v4432_v21, %v2180_v26  ;;  %v7930_v26 = vld [vmem:[#allocation7_spill] sm:$0xff]  ;;  %v7931_v21 = vld [vmem:[#allocation6_spill] sm:$0xff] }
 0x530   :  { %v2189_v34 = vpack.c.bf16 %v2188_v57, %v2188_v57  ;;  %v7933_v57 = vld [vmem:[#allocation9_spill] sm:$0xff] }
 0x532   :  { %v2191_v28 = vrot.slane %v2189_v34, 3  ;;  %v7932_v34 = vld [vmem:[#allocation8_spill] sm:$0xff] }
 0x534   :  { %2226 = vmatmul.mubr.bf16.vlgmr.msra.gmra.mxu1 %v2191_v28  ;;  %2267 = vmatmul.mubr.bf16.vlgmr.msra.gmra.mxu0 %v2191_v28 }
 0x535   :  { %2299 = vmatpush1.bf16.msra.mxu1 %v5799_v53  ;;  %2340 = vmatpush1.bf16.msra.mxu0 %v5805_v62 }
 0x536   :  { %2300 = vmatprep.subr.bf16.mxu1 %v5811_v38  ;;  %2341 = vmatprep.subr.bf16.mxu0 %v5817_v39 }
 0x537   :  { %2330 = vmatprep.mubr.bf16.mxu1 %v7727_v7  ;;  %2371 = vmatprep.mubr.bf16.mxu0 %v7727_v7 }
 0x539   :  { %2301 = vmatpush1.bf16.msra.mxu1 %v5825_v40  ;;  %2342 = vmatpush1.bf16.msra.mxu0 %v5831_v41 }
 0x53a   :  { %2302 = vmatprep.subr.bf16.mxu1 %v5837_v42  ;;  %2343 = vmatprep.subr.bf16.mxu0 %v5843_v45 }
 0x53d   :  { %2303 = vmatpush1.bf16.msra.mxu1 %v5849_v52  ;;  %2344 = vmatpush1.bf16.msra.mxu0 %v5855_v49 }
 0x53e   :  { %2304 = vmatprep.subr.bf16.mxu1 %v5861_v59  ;;  %2345 = vmatprep.subr.bf16.mxu0 %v5867_v46 }
 0x541   :  { %2305 = vmatpush1.bf16.msra.mxu1 %v5873_v47  ;;  %2346 = vmatpush1.bf16.msra.mxu0 %v5879_v50 }
 0x542   :  { %2306 = vmatprep.subr.bf16.mxu1 %v5885_v58  ;;  %2347 = vmatprep.subr.bf16.mxu0 %v5891_v61 }
 0x545   :  { %2307 = vmatpush1.bf16.msra.mxu1 %v5897_v5  ;;  %2348 = vmatpush1.bf16.msra.mxu0 %v5903_v6 }
 0x546   :  { %2308 = vmatprep.subr.bf16.mxu1 %v5909_v9  ;;  %2349 = vmatprep.subr.bf16.mxu0 %v5915_v10 }
 0x549   :  { %2309 = vmatpush1.bf16.msra.mxu1 %v5921_v11  ;;  %2350 = vmatpush1.bf16.msra.mxu0 %v5927_v12 }
 0x54a   :  { %2310 = vmatprep.subr.bf16.mxu1 %v5933_v13  ;;  %2351 = vmatprep.subr.bf16.mxu0 %v5939_v15  ;;  %v7960_v15 = vld [vmem:[#allocation64_spill] sm:$0xff] }
 0x54d   :  { %2311 = vmatpush1.bf16.msra.mxu1 %v5945_v16  ;;  %2352 = vmatpush1.bf16.msra.mxu0 %v5951_v17  ;;  %v7959_v17 = vld [vmem:[#allocation63_spill] sm:$0xff] }
 0x54e   :  { %2312 = vmatprep.subr.bf16.mxu1 %v5957_v0  ;;  %2353 = vmatprep.subr.bf16.mxu0 %v5963_v1 }
 0x551   :  { %2313 = vmatpush1.bf16.msra.mxu1 %v5969_v51  ;;  %2354 = vmatpush1.bf16.msra.mxu0 %v5975_v63  ;;  %v7941_v63 = vld [vmem:[#allocation17_spill] sm:$0xff] }
 0x552   :  { %2385 = vmatprep.subr.bf16.mxu1 %v5981_v18  ;;  %2426 = vmatprep.subr.bf16.mxu0 %v5987_v19  ;;  %v7934_v19 = vld [vmem:[#allocation11_spill] sm:$0xff]  ;;  %v7940_v18 = vld [vmem:[#allocation16_spill] sm:$0xff] }
 0x554   :  { %2331 = vmatmul.mubr.bf16.vlgmr.msra.gmra.mxu1 %v2191_v28  ;;  %2372 = vmatmul.mubr.bf16.vlgmr.msra.gmra.mxu0 %v2191_v28  ;;  %v7935_v28 = vld [vmem:[#allocation10_spill] sm:$0xff] }
 0x555   :  { %2386 = vmatpush1.bf16.msra.mxu1 %v5995_v56  ;;  %2427 = vmatpush1.bf16.msra.mxu0 %v6001_v3  ;;  %v7936_v56 = vld [vmem:[#allocation12_spill] sm:$0xff]  ;;  %v7937_v3 = vld [vmem:[#allocation13_spill] sm:$0xff] }
 0x556   :  { %2387 = vmatprep.subr.bf16.mxu1 %v6007_v20  ;;  %2428 = vmatprep.subr.bf16.mxu0 %v7930_v26  ;;  %v7938_v20 = vld [vmem:[#allocation15_spill] sm:$0xff]  ;;  %v7939_v26 = vld [vmem:[#allocation14_spill] sm:$0xff] }
 0x557   :  { %2417 = vmatprep.mubr.bf16.mxu1 %v7727_v7  ;;  %2458 = vmatprep.mubr.bf16.mxu0 %v7727_v7 }
 0x559   :  { %2388 = vmatpush1.bf16.msra.mxu1 %v7931_v21  ;;  %2429 = vmatpush1.bf16.msra.mxu0 %v7932_v34  ;;  %v7942_v21 = vld [vmem:[#allocation19_spill] sm:$0xff]  ;;  %v7943_v34 = vld [vmem:[#allocation18_spill] sm:$0xff] }
 0x55a   :  { %2389 = vmatprep.subr.bf16.mxu1 %v7933_v57  ;;  %2430 = vmatprep.subr.bf16.mxu0 %v7934_v19  ;;  %v7944_v57 = vld [vmem:[#allocation23_spill] sm:$0xff]  ;;  %v7945_v19 = vld [vmem:[#allocation20_spill] sm:$0xff] }
 0x55d   :  { %2390 = vmatpush1.bf16.msra.mxu1 %v7935_v28  ;;  %2431 = vmatpush1.bf16.msra.mxu0 %v7936_v56  ;;  %v7946_v28 = vld [vmem:[#allocation24_spill] sm:$0xff]  ;;  %v7947_v56 = vld [vmem:[#allocation21_spill] sm:$0xff] }
 0x55e   :  { %2391 = vmatprep.subr.bf16.mxu1 %v7937_v3  ;;  %2432 = vmatprep.subr.bf16.mxu0 %v7938_v20  ;;  %v7948_v3 = vld [vmem:[#allocation27_spill] sm:$0xff]  ;;  %v7949_v20 = vld [vmem:[#allocation22_spill] sm:$0xff] }
 0x561   :  { %2392 = vmatpush1.bf16.msra.mxu1 %v7939_v26  ;;  %2433 = vmatpush1.bf16.msra.mxu0 %v7940_v18  ;;  %v7950_v26 = vld [vmem:[#allocation28_spill] sm:$0xff]  ;;  %v7951_v18 = vld [vmem:[#allocation25_spill] sm:$0xff] }
 0x562   :  { %2393 = vmatprep.subr.bf16.mxu1 %v7941_v63  ;;  %2434 = vmatprep.subr.bf16.mxu0 %v7942_v21  ;;  %v7952_v63 = vld [vmem:[#allocation29_spill] sm:$0xff]  ;;  %v7953_v21 = vld [vmem:[#allocation26_spill] sm:$0xff] }
 0x565   :  { %2394 = vmatpush1.bf16.msra.mxu1 %v7943_v34  ;;  %2435 = vmatpush1.bf16.msra.mxu0 %v7944_v57  ;;  %v7954_v34 = vld [vmem:[#allocation30_spill] sm:$0xff]  ;;  %v7955_v57 = vld [vmem:[#allocation31_spill] sm:$0xff] }
 0x566   :  { %2395 = vmatprep.subr.bf16.mxu1 %v7945_v19  ;;  %2436 = vmatprep.subr.bf16.mxu0 %v7946_v28  ;;  %v7956_v19 = vld [vmem:[#allocation32_spill] sm:$0xff]  ;;  %v7957_v28 = vld [vmem:[#allocation65_spill] sm:$0xff] }
 0x569   :  { %2396 = vmatpush1.bf16.msra.mxu1 %v7947_v56  ;;  %2437 = vmatpush1.bf16.msra.mxu0 %v7948_v3  ;;  %v7958_v56 = vld [vmem:[#allocation67_spill] sm:$0xff] }
 0x56a   :  { %2397 = vmatprep.subr.bf16.mxu1 %v7949_v20  ;;  %2438 = vmatprep.subr.bf16.mxu0 %v7950_v26 }
 0x56d   :  { %2398 = vmatpush1.bf16.msra.mxu1 %v7951_v18  ;;  %2439 = vmatpush1.bf16.msra.mxu0 %v7952_v63 }
 0x56e   :  { %2399 = vmatprep.subr.bf16.mxu1 %v7953_v21  ;;  %2440 = vmatprep.subr.bf16.mxu0 %v7954_v34 }
 0x571   :  { %2400 = vmatpush1.bf16.msra.mxu1 %v7955_v57  ;;  %2441 = vmatpush1.bf16.msra.mxu0 %v7956_v19 }
 0x572   :  { %2489 = vmatprep.subr.bf16.mxu1 %v7957_v28  ;;  %2530 = vmatprep.subr.bf16.mxu0 %v7958_v56 }
 0x5d0   :  { %v2120_v3 = vpop.f32.mrf.mxu1  ;;  %v2161_v20 = vpop.f32.mrf.mxu0 }
 0x5d1   :  { %v2121_v21 = vadd.f32 %v2120_v3, %v7959_v17  ;;  %v2162_v9 = vadd.f32 %v2161_v20, %v7854_v8  ;;  %v7961_v3 = vld [vmem:[#allocation66_spill] sm:$0xff]  ;;  %v7962_v20 = vld [vmem:[#allocation43_spill] sm:$0xff] }
 0x5d2   :  { %v2122_v51 = vpop.f32.mrf.mxu1  ;;  %v2163_v26 = vpop.f32.mrf.mxu0 }
 0x5d3   :  { %v2123_v57 = vadd.f32 %v2122_v51, %v7960_v15  ;;  %v2164_v17 = vadd.f32 %v2163_v26, %v7961_v3 }
 0x5d4   :  { %v2124_v1 = vpop.f32.mrf.mxu1  ;;  %v2165_v18 = vpop.f32.mrf.mxu0 }
 0x5d6   :  { %v2125_v0 = vpop.f32.mrf.mxu1  ;;  %v2166_v63 = vpop.f32.mrf.mxu0 }
 0x5f4   :  { %v2227_v16 = vpop.f32.mrf.mxu1  ;;  %v2268_v34 = vpop.f32.mrf.mxu0 }
 0x5f5   :  { %v2228_v13 = vadd.f32 %v2227_v16, %v2121_v21  ;;  %v2269_v63 = vadd.f32 %v2268_v34, %v2162_v9  ;;  %v2294_v9 = vld [vmem:[#allocation2 + $0x8] sm:$0x3] }
 0x5f6   :  { %v2229_v19 = vpop.f32.mrf.mxu1  ;;  %v2270_v12 = vpop.f32.mrf.mxu0 }
 0x5f7   :  { %v2275_v28 = vmul.f32 0.5, %v2228_v13  ;;  %v2230_v11 = vadd.f32 %v2229_v19, %v2123_v57  ;;  %v2271_v6 = vadd.f32 %v2270_v12, %v2164_v17  ;;  %v2295_v17 = vld [vmem:[#allocation2 + $0x20] sm:$0x3] }
 0x5f8   :  { %v2231_v56 = vpop.f32.mrf.mxu1  ;;  %v2272_v10 = vpop.f32.mrf.mxu0 }
 0x5f9   :  { %4433 = vtanh.f32 %v2275_v28  ;;  %v2279_v1 = vmul.f32 0.5, %v2230_v11  ;;  %v2284_v51 = vmul.f32 0.5, %v2271_v6 }
 0x5fa   :  { %v2232_v18 = vpop.f32.mrf.mxu1  ;;  %v2273_v0 = vpop.f32.mrf.mxu0 }
 0x5fb   :  { %4435 = vtanh.f32 %v2279_v1 }
 0x5fc   :  { %4437 = vtanh.f32 %v2269_v63 }
 0x5fd   :  { %4439 = vtanh.f32 %v2284_v51 }
 0x606   :  { %v4434_v16 = vpop.eup %4433 }
 0x607   :  { %v2277_v21 = vmul.f32 0.5, %v4434_v16 }
 0x608   :  { %v4436_v15 = vpop.eup %4435 }
 0x609   :  { %v2278_v13 = vadd.f32 0.5, %v2277_v21  ;;  %v2281_v19 = vmul.f32 0.5, %v4436_v15  ;;  %v4438_v56 = vpop.eup %4437 }
 0x60a   :  { %v4440_v6 = vpop.eup %4439 }
 0x60b   :  { %v2282_v10 = vadd.f32 0.5, %v2281_v19  ;;  %v2289_v11 = vmul.f32 %v4438_v56, %v2278_v13  ;;  %v2286_v16 = vmul.f32 0.5, %v4440_v6  ;;  %v2296_v13 = vld [vmem:[#allocation2 + $0x28] sm:$0x3] }
 0x60d   :  { %v2288_v57 = vmul.f32 %v2282_v10, %v7962_v20  ;;  %v2287_v20 = vadd.f32 0.5, %v2286_v16 }
 0x60f   :  { %v6455_v28 = vadd.f32 %v2289_v11, %v2288_v57 }
 0x611   :  { %7963 = vst [vmem:[#allocation55_spill] sm:$0xff] %v6455_v28  ;;  %4441 = vtanh.f32 %v6455_v28 }
 0x614   :  { %v2332_v26 = vpop.f32.mrf.mxu1  ;;  %v2373_v34 = vpop.f32.mrf.mxu0 }
 0x615   :  { %v2380_v12 = vadd.f32 %v2332_v26, %v2294_v9  ;;  %v2382_v56 = vadd.f32 %v2373_v34, %v2296_v13  ;;  %v2297_v9 = vld [vmem:[#allocation2 + $0x38] sm:$0x3]  ;;  %v7966_v13 = vld [vmem:[#allocation46_spill] sm:$0xff] }
 0x616   :  { %v2334_v1 = vpop.f32.mrf.mxu1  ;;  %v2375_v18 = vpop.f32.mrf.mxu0 }
 0x617   :  { %v2467_v0 = vmul.f32 0.5, %v2380_v12  ;;  %v2381_v15 = vadd.f32 %v2334_v1, %v2295_v17  ;;  %v2383_v26 = vadd.f32 %v2375_v18, %v2297_v9  ;;  %v7971_v9 = vld [vmem:[#allocation51_spill] sm:$0xff] }
 0x618   :  { %v2336_v63 = vpop.f32.mrf.mxu1  ;;  %v2377_v51 = vpop.f32.mrf.mxu0 }
 0x619   :  { %4443 = vtanh.f32 %v2467_v0  ;;  %v2471_v21 = vmul.f32 0.5, %v2381_v15  ;;  %v2476_v12 = vmul.f32 0.5, %v2383_v26  ;;  %v2481_v0 = vrot.slane %v6281_v30, 6  ;;  %v7964_v30 = vld [vmem:[#allocation44_spill] sm:$0xff] }
 0x61a   :  { %v2337_v19 = vpop.f32.mrf.mxu1  ;;  %v2378_v10 = vpop.f32.mrf.mxu0  ;;  %v7972_v26 = vld [vmem:[#allocation52_spill] sm:$0xff] }
 0x61b   :  { %4445 = vtanh.f32 %v2471_v21  ;;  %v7965_v21 = vld [vmem:[#allocation45_spill] sm:$0xff]  ;;  %v7967_v10 = vld [vmem:[#allocation47_spill] sm:$0xff] }
 0x61c   :  { %4447 = vtanh.f32 %v2382_v56  ;;  %v7968_v56 = vld [vmem:[#allocation48_spill] sm:$0xff] }
 0x61d   :  { %4449 = vtanh.f32 %v2476_v12 }
 0x61e   :  { %v4442_v57 = vpop.eup %4441 }
 0x61f   :  { %v2292_v11 = vmul.f32 %v4442_v57, %v2287_v20  ;;  %v7969_v57 = vld [vmem:[#allocation49_spill] sm:$0xff] }
 0x621   :  { %2293 = vst [vmem:[#allocation3 + $0x6] sm:$0x3] %v2292_v11  ;;  %v2384_v28 = vpack.c.bf16 %v2292_v11, %v2292_v11  ;;  %v7970_v11 = vld [vmem:[#allocation50_spill] sm:$0xff] }
 0x623   :  { %2418 = vmatmul.mubr.bf16.vlgmr.msra.gmra.mxu1 %v2384_v28  ;;  %2459 = vmatmul.mubr.bf16.vlgmr.msra.gmra.mxu0 %v2384_v28 }
 0x624   :  { %2490 = vmatpush1.bf16.msra.mxu1 %v6197_v24  ;;  %2531 = vmatpush1.bf16.msra.mxu0 %v6203_v55 }
 0x625   :  { %2491 = vmatprep.subr.bf16.mxu1 %v6209_v14  ;;  %2532 = vmatprep.subr.bf16.mxu0 %v6215_v33 }
 0x626   :  { %v4444_v34 = vpop.eup %4443  ;;  %2521 = vmatprep.mubr.bf16.mxu1 %v7727_v7  ;;  %2562 = vmatprep.mubr.bf16.mxu0 %v7727_v7 }
 0x627   :  { %v2469_v6 = vmul.f32 0.5, %v4444_v34  ;;  %v7973_v34 = vld [vmem:[#allocation53_spill] sm:$0xff] }
 0x628   :  { %v4446_v17 = vpop.eup %4445  ;;  %2492 = vmatpush1.bf16.msra.mxu1 %v6223_v29  ;;  %2533 = vmatpush1.bf16.msra.mxu0 %v6229_v4 }
 0x629   :  { %v2470_v28 = vadd.f32 0.5, %v2469_v6  ;;  %v2473_v1 = vmul.f32 0.5, %v4446_v17  ;;  %2493 = vmatprep.subr.bf16.mxu1 %v6235_v44  ;;  %2534 = vmatprep.subr.bf16.mxu0 %v6241_v32  ;;  %v4448_v15 = vpop.eup %4447  ;;  %v7974_v6 = vld [vmem:[#allocation54_spill] sm:$0xff] }
 0x62a   :  { %v4450_v19 = vpop.eup %4449 }
 0x62b   :  { %v2474_v18 = vadd.f32 0.5, %v2473_v1  ;;  %v2484_v51 = vmul.f32 %v4448_v15, %v2470_v28  ;;  %v2478_v20 = vmul.f32 0.5, %v4450_v19  ;;  %v7996_v15 = vld [vmem:[#allocation9_spill] sm:$0xff]  ;;  %v7999_v19 = vld [vmem:[#allocation12_spill] sm:$0xff] }
 0x62c   :  { %2494 = vmatpush1.bf16.msra.mxu1 %v6247_v37  ;;  %2535 = vmatpush1.bf16.msra.mxu0 %v6253_v2 }
 0x62d   :  { %v2483_v63 = vmul.f32 %v2481_v0, %v2474_v18  ;;  %2495 = vmatprep.subr.bf16.mxu1 %v6260_v23  ;;  %2536 = vmatprep.subr.bf16.mxu0 %v6266_v36  ;;  %v2479_v12 = vadd.f32 0.5, %v2478_v20  ;;  %v7994_v18 = vld [vmem:[#allocation6_spill] sm:$0xff]  ;;  %v7995_v0 = vld [vmem:[#allocation8_spill] sm:$0xff]  ;;  %v8000_v20 = vld [vmem:[#allocation13_spill] sm:$0xff] }
 0x62f   :  { %v6473_v16 = vadd.f32 %v2484_v51, %v2483_v63  ;;  %v7997_v63 = vld [vmem:[#allocation11_spill] sm:$0xff]  ;;  %v7998_v51 = vld [vmem:[#allocation10_spill] sm:$0xff] }
 0x630   :  { %2496 = vmatpush1.bf16.msra.mxu1 %v6272_v22  ;;  %2537 = vmatpush1.bf16.msra.mxu0 %v6278_v48 }
 0x631   :  { %4451 = vtanh.f32 %v6473_v16  ;;  %2497 = vmatprep.subr.bf16.mxu1 %v6286_v60  ;;  %2538 = vmatprep.subr.bf16.mxu0 %v6292_v27 }
 0x634   :  { %2498 = vmatpush1.bf16.msra.mxu1 %v6299_v25  ;;  %2539 = vmatpush1.bf16.msra.mxu0 %v7964_v30 }
 0x635   :  { %2499 = vmatprep.subr.bf16.mxu1 %v7965_v21  ;;  %2540 = vmatprep.subr.bf16.mxu0 %v7966_v13 }
 0x638   :  { %2500 = vmatpush1.bf16.msra.mxu1 %v7967_v10  ;;  %2541 = vmatpush1.bf16.msra.mxu0 %v7968_v56 }
 0x639   :  { %2501 = vmatprep.subr.bf16.mxu1 %v7969_v57  ;;  %2542 = vmatprep.subr.bf16.mxu0 %v7970_v11 }
 0x63c   :  { %2502 = vmatpush1.bf16.msra.mxu1 %v7971_v9  ;;  %2543 = vmatpush1.bf16.msra.mxu0 %v7972_v26 }
 0x63d   :  { %2503 = vmatprep.subr.bf16.mxu1 %v7973_v34  ;;  %2544 = vmatprep.subr.bf16.mxu0 %v7974_v6 }
 0x63e   :  { %v4452_v17 = vpop.eup %4451 }
 0x63f   :  { %v2487_v28 = vmul.f32 %v4452_v17, %v2479_v12  ;;  %v8001_v12 = vld [vmem:[#allocation15_spill] sm:$0xff]  ;;  %v8002_v17 = vld [vmem:[#allocation14_spill] sm:$0xff] }
 0x640   :  { %2504 = vmatpush1.bf16.msra.mxu1 %v6371_v31  ;;  %2545 = vmatpush1.bf16.msra.mxu0 %v6377_v43 }
 0x641   :  { %v2488_v1 = vpack.c.bf16 %v2487_v28, %v2487_v28  ;;  %2594 = vmatprep.subr.bf16.mxu1 %v5783_v35  ;;  %2635 = vmatprep.subr.bf16.mxu0 %v5789_v54  ;;  %v7975_v35 = vld [vmem:[#allocation33_spill] sm:$0xff]  ;;  %v7976_v54 = vld [vmem:[#allocation34_spill] sm:$0xff]  ;;  %v8003_v28 = vld [vmem:[#allocation16_spill] sm:$0xff] }
 0x643   :  { %2522 = vmatmul.mubr.bf16.vlgmr.msra.gmra.mxu1 %v2488_v1  ;;  %2563 = vmatmul.mubr.bf16.vlgmr.msra.gmra.mxu0 %v2488_v1 }
 0x644   :  { %2595 = vmatpush1.bf16.msra.mxu1 %v5799_v53  ;;  %2636 = vmatpush1.bf16.msra.mxu0 %v5805_v62  ;;  %v7977_v53 = vld [vmem:[#allocation35_spill] sm:$0xff]  ;;  %v7978_v62 = vld [vmem:[#allocation36_spill] sm:$0xff] }
 0x645   :  { %2596 = vmatprep.subr.bf16.mxu1 %v5811_v38  ;;  %2637 = vmatprep.subr.bf16.mxu0 %v5817_v39  ;;  %v7979_v38 = vld [vmem:[#allocation37_spill] sm:$0xff]  ;;  %v7980_v39 = vld [vmem:[#allocation38_spill] sm:$0xff] }
 0x646   :  { %2626 = vmatprep.mubr.bf16.mxu1 %v7727_v7  ;;  %2667 = vmatprep.mubr.bf16.mxu0 %v7727_v7 }
 0x648   :  { %2597 = vmatpush1.bf16.msra.mxu1 %v5825_v40  ;;  %2638 = vmatpush1.bf16.msra.mxu0 %v5831_v41  ;;  %v7981_v40 = vld [vmem:[#allocation39_spill] sm:$0xff]  ;;  %v7982_v41 = vld [vmem:[#allocation40_spill] sm:$0xff] }
 0x649   :  { %2598 = vmatprep.subr.bf16.mxu1 %v5837_v42  ;;  %2639 = vmatprep.subr.bf16.mxu0 %v5843_v45  ;;  %v7983_v42 = vld [vmem:[#allocation41_spill] sm:$0xff]  ;;  %v7984_v45 = vld [vmem:[#allocation42_spill] sm:$0xff] }
 0x64c   :  { %2599 = vmatpush1.bf16.msra.mxu1 %v5849_v52  ;;  %2640 = vmatpush1.bf16.msra.mxu0 %v5855_v49  ;;  %v7985_v52 = vld [vmem:[#allocation57_spill] sm:$0xff]  ;;  %v7986_v49 = vld [vmem:[#allocation58_spill] sm:$0xff] }
 0x64d   :  { %2600 = vmatprep.subr.bf16.mxu1 %v5861_v59  ;;  %2641 = vmatprep.subr.bf16.mxu0 %v5867_v46  ;;  %v7987_v59 = vld [vmem:[#allocation59_spill] sm:$0xff]  ;;  %v7988_v46 = vld [vmem:[#allocation60_spill] sm:$0xff] }
 0x650   :  { %2601 = vmatpush1.bf16.msra.mxu1 %v5873_v47  ;;  %2642 = vmatpush1.bf16.msra.mxu0 %v5879_v50  ;;  %v7989_v47 = vld [vmem:[#allocation61_spill] sm:$0xff]  ;;  %v7990_v50 = vld [vmem:[#allocation62_spill] sm:$0xff] }
 0x651   :  { %2602 = vmatprep.subr.bf16.mxu1 %v5885_v58  ;;  %2643 = vmatprep.subr.bf16.mxu0 %v5891_v61  ;;  %v7991_v58 = vld [vmem:[#allocation4_spill] sm:$0xff]  ;;  %v7992_v61 = vld [vmem:[#allocation5_spill] sm:$0xff] }
 0x654   :  { %2603 = vmatpush1.bf16.msra.mxu1 %v5897_v5  ;;  %2644 = vmatpush1.bf16.msra.mxu0 %v7975_v35  ;;  %v7993_v5 = vld [vmem:[#allocation7_spill] sm:$0xff] }
 0x655   :  { %2604 = vmatprep.subr.bf16.mxu1 %v7976_v54  ;;  %2645 = vmatprep.subr.bf16.mxu0 %v7977_v53  ;;  %v8005_v35 = vld [vmem:[#allocation19_spill] sm:$0xff]  ;;  %v8006_v54 = vld [vmem:[#allocation18_spill] sm:$0xff] }
 0x656   :  { %v8007_v53 = vld [vmem:[#allocation23_spill] sm:$0xff] }
 0x658   :  { %2605 = vmatpush1.bf16.msra.mxu1 %v7978_v62  ;;  %2646 = vmatpush1.bf16.msra.mxu0 %v7979_v38  ;;  %v8008_v62 = vld [vmem:[#allocation20_spill] sm:$0xff] }
 0x659   :  { %2606 = vmatprep.subr.bf16.mxu1 %v7980_v39  ;;  %2647 = vmatprep.subr.bf16.mxu0 %v7981_v40  ;;  %v8009_v38 = vld [vmem:[#allocation24_spill] sm:$0xff]  ;;  %v8010_v39 = vld [vmem:[#allocation21_spill] sm:$0xff]  ;;  %v8011_v40 = vld [vmem:[#allocation27_spill] sm:$0xff] }
 0x65c   :  { %2607 = vmatpush1.bf16.msra.mxu1 %v7982_v41  ;;  %2648 = vmatpush1.bf16.msra.mxu0 %v7983_v42  ;;  %v8012_v41 = vld [vmem:[#allocation22_spill] sm:$0xff]  ;;  %v8013_v42 = vld [vmem:[#allocation28_spill] sm:$0xff] }
 0x65d   :  { %2608 = vmatprep.subr.bf16.mxu1 %v7984_v45  ;;  %2649 = vmatprep.subr.bf16.mxu0 %v7985_v52  ;;  %v8014_v45 = vld [vmem:[#allocation25_spill] sm:$0xff] }
 0x65e   :  { %v8015_v52 = vld [vmem:[#allocation29_spill] sm:$0xff] }
 0x660   :  { %2609 = vmatpush1.bf16.msra.mxu1 %v7986_v49  ;;  %2650 = vmatpush1.bf16.msra.mxu0 %v7987_v59  ;;  %v8016_v49 = vld [vmem:[#allocation26_spill] sm:$0xff] }
 0x661   :  { %2693 = vmatprep.subr.bf16.mxu1 %v7988_v46  ;;  %2734 = vmatprep.subr.bf16.mxu0 %v7989_v47  ;;  %v8017_v59 = vld [vmem:[#allocation30_spill] sm:$0xff]  ;;  %v8018_v46 = vld [vmem:[#allocation31_spill] sm:$0xff]  ;;  %v8019_v47 = vld [vmem:[#allocation32_spill] sm:$0xff] }
 0x663   :  { %2627 = vmatmul.mubr.bf16.vlgmr.msra.gmra.mxu1 %v2488_v1  ;;  %2668 = vmatmul.mubr.bf16.vlgmr.msra.gmra.mxu0 %v2488_v1  ;;  %v8004_v1 = vld [vmem:[#allocation17_spill] sm:$0xff] }
 0x664   :  { %2694 = vmatpush1.bf16.msra.mxu1 %v7990_v50  ;;  %2735 = vmatpush1.bf16.msra.mxu0 %v7991_v58  ;;  %v8020_v50 = vld [vmem:[#allocation65_spill] sm:$0xff]  ;;  %v8021_v58 = vld [vmem:[#allocation67_spill] sm:$0xff] }
 0x665   :  { %2695 = vmatprep.subr.bf16.mxu1 %v7992_v61  ;;  %2736 = vmatprep.subr.bf16.mxu0 %v7993_v5 }
 0x666   :  { %2725 = vmatprep.mubr.bf16.mxu1 %v7727_v7  ;;  %2766 = vmatprep.mubr.bf16.mxu0 %v7727_v7 }
 0x668   :  { %2696 = vmatpush1.bf16.msra.mxu1 %v7994_v18  ;;  %2737 = vmatpush1.bf16.msra.mxu0 %v7995_v0 }
 0x669   :  { %2697 = vmatprep.subr.bf16.mxu1 %v7996_v15  ;;  %2738 = vmatprep.subr.bf16.mxu0 %v7997_v63 }
 0x66c   :  { %2698 = vmatpush1.bf16.msra.mxu1 %v7998_v51  ;;  %2739 = vmatpush1.bf16.msra.mxu0 %v7999_v19 }
 0x66d   :  { %2699 = vmatprep.subr.bf16.mxu1 %v8000_v20  ;;  %2740 = vmatprep.subr.bf16.mxu0 %v8001_v12  ;;  %v8022_v20 = vld [vmem:[#allocation63_spill] sm:$0xff] }
 0x670   :  { %2700 = vmatpush1.bf16.msra.mxu1 %v8002_v17  ;;  %2741 = vmatpush1.bf16.msra.mxu0 %v8003_v28 }
 0x671   :  { %2701 = vmatprep.subr.bf16.mxu1 %v8004_v1  ;;  %2742 = vmatprep.subr.bf16.mxu0 %v8005_v35  ;;  %v8023_v1 = vld [vmem:[#allocation64_spill] sm:$0xff] }
 0x674   :  { %2702 = vmatpush1.bf16.msra.mxu1 %v8006_v54  ;;  %2743 = vmatpush1.bf16.msra.mxu0 %v8007_v53 }
 0x675   :  { %2703 = vmatprep.subr.bf16.mxu1 %v8008_v62  ;;  %2744 = vmatprep.subr.bf16.mxu0 %v8009_v38 }
 0x678   :  { %2704 = vmatpush1.bf16.msra.mxu1 %v8010_v39  ;;  %2745 = vmatpush1.bf16.msra.mxu0 %v8011_v40 }
 0x679   :  { %2705 = vmatprep.subr.bf16.mxu1 %v8012_v41  ;;  %2746 = vmatprep.subr.bf16.mxu0 %v8013_v42 }
 0x67c   :  { %2706 = vmatpush1.bf16.msra.mxu1 %v8014_v45  ;;  %2747 = vmatpush1.bf16.msra.mxu0 %v8015_v52 }
 0x67d   :  { %2707 = vmatprep.subr.bf16.mxu1 %v8016_v49  ;;  %2748 = vmatprep.subr.bf16.mxu0 %v8017_v59 }
 0x680   :  { %2708 = vmatpush1.bf16.msra.mxu1 %v8018_v46  ;;  %2749 = vmatpush1.bf16.msra.mxu0 %v8019_v47 }
 0x681   :  { %2800 = vmatprep.subr.bf16.mxu1 %v8020_v50  ;;  %2841 = vmatprep.subr.bf16.mxu0 %v8021_v58 }
 0x6e3   :  { %v2419_v61 = vpop.f32.mrf.mxu1  ;;  %v2460_v5 = vpop.f32.mrf.mxu0 }
 0x6e4   :  { %v2420_v12 = vadd.f32 %v2419_v61, %v8022_v20  ;;  %v2461_v42 = vadd.f32 %v2460_v5, %v7854_v8  ;;  %v8024_v5 = vld [vmem:[#allocation55_spill] sm:$0xff] }
 0x6e5   :  { %v2421_v18 = vpop.f32.mrf.mxu1  ;;  %v2462_v0 = vpop.f32.mrf.mxu0 }
 0x6e6   :  { %v2422_v35 = vadd.f32 %v2421_v18, %v8023_v1  ;;  %v2463_v46 = vadd.f32 %v2462_v0, %v7961_v3 }
 0x6e7   :  { %v2423_v15 = vpop.f32.mrf.mxu1  ;;  %v2464_v63 = vpop.f32.mrf.mxu0 }
 0x6e9   :  { %v2424_v51 = vpop.f32.mrf.mxu1  ;;  %v2465_v19 = vpop.f32.mrf.mxu0 }
 0x703   :  { %v2523_v17 = vpop.f32.mrf.mxu1  ;;  %v2564_v28 = vpop.f32.mrf.mxu0 }
 0x704   :  { %v2524_v54 = vadd.f32 %v2523_v17, %v2420_v12  ;;  %v2565_v59 = vadd.f32 %v2564_v28, %v2461_v42  ;;  %v2591_v42 = vld [vmem:[#allocation2 + $0x20] sm:$0xc] }
 0x705   :  { %v2525_v53 = vpop.f32.mrf.mxu1  ;;  %v2566_v62 = vpop.f32.mrf.mxu0 }
 0x706   :  { %v2571_v38 = vmul.f32 0.5, %v2524_v54  ;;  %v2526_v39 = vadd.f32 %v2525_v53, %v2422_v35  ;;  %v2567_v47 = vadd.f32 %v2566_v62, %v2463_v46  ;;  %v2590_v62 = vld [vmem:[#allocation2 + $0x8] sm:$0xc] }
 0x707   :  { %v2527_v40 = vpop.f32.mrf.mxu1  ;;  %v2568_v41 = vpop.f32.mrf.mxu0 }
 0x708   :  { %4453 = vtanh.f32 %v2571_v38  ;;  %v2575_v45 = vmul.f32 0.5, %v2526_v39  ;;  %v2580_v50 = vmul.f32 0.5, %v2567_v47 }
 0x709   :  { %v2528_v52 = vpop.f32.mrf.mxu1  ;;  %v2569_v49 = vpop.f32.mrf.mxu0 }
 0x70a   :  { %4455 = vtanh.f32 %v2575_v45 }
 0x70b   :  { %4457 = vtanh.f32 %v2565_v59 }
 0x70c   :  { %4459 = vtanh.f32 %v2580_v50 }
 0x715   :  { %v4454_v58 = vpop.eup %4453 }
 0x716   :  { %v2573_v61 = vmul.f32 0.5, %v4454_v58 }
 0x717   :  { %v4456_v18 = vpop.eup %4455 }
 0x718   :  { %v2574_v15 = vadd.f32 0.5, %v2573_v61  ;;  %v2577_v63 = vmul.f32 0.5, %v4456_v18  ;;  %v4458_v19 = vpop.eup %4457  ;;  %v2592_v18 = vld [vmem:[#allocation2 + $0x28] sm:$0xc] }
 0x719   :  { %v4460_v53 = vpop.eup %4459 }
 0x71a   :  { %v2578_v51 = vadd.f32 0.5, %v2577_v63  ;;  %v2585_v17 = vmul.f32 %v4458_v19, %v2574_v15  ;;  %v2582_v49 = vmul.f32 0.5, %v4460_v53 }
 0x71c   :  { %v2584_v12 = vmul.f32 %v2578_v51, %v8024_v5  ;;  %v2583_v15 = vadd.f32 0.5, %v2582_v49  ;;  %v6755_v49 = vld [vmem:[%s7417_s2 + $0x148] ss:$16 sps:$4 sm:$0xff]  }
 0x71e   :  { %v6569_v35 = vadd.f32 %v2585_v17, %v2584_v12  ;;  %v2593_v17 = vld [vmem:[#allocation2 + $0x38] sm:$0xc] }
 0x720   :  { %4461 = vtanh.f32 %v6569_v35 }
 0x723   :  { %v2628_v28 = vpop.f32.mrf.mxu1  ;;  %v2669_v0 = vpop.f32.mrf.mxu0 }
 0x724   :  { %v2680_v54 = vrot.slane %v2628_v28, 6  ;;  %v2682_v46 = vrot.slane %v2669_v0, 6 }
 0x725   :  { %v2630_v38 = vpop.f32.mrf.mxu1  ;;  %v2671_v39 = vpop.f32.mrf.mxu0 }
 0x726   :  { %v2688_v40 = vadd.f32 %v2680_v54, %v2590_v62  ;;  %v2681_v41 = vrot.slane %v2630_v38, 6  ;;  %v2690_v63 = vadd.f32 %v2682_v46, %v2592_v18  ;;  %v2683_v5 = vrot.slane %v2671_v39, 6  ;;  %v6713_v38 = vld [vmem:[%s7417_s2 + $0x164] ss:$16 sps:$4 sm:$0xff]   ;;  %v6719_v39 = vld [vmem:[%s7417_s2 + $0x16c] ss:$16 sps:$4 sm:$0xff]  }
 0x727   :  { %v2632_v45 = vpop.f32.mrf.mxu1  ;;  %v2673_v52 = vpop.f32.mrf.mxu0  ;;  %v2789_v62 = vrot.slane %v6473_v16, 6  ;;  %v6639_v16 = vld [vmem:[%s7417_s2 + $0x1c4] ss:$16 sps:$4 sm:$0xff]   ;;  %v6767_v46 = vld [vmem:[%s7417_s2 + $0x12c] ss:$16 sps:$4 sm:$0xff]  }
 0x728   :  { %v2775_v59 = vmul.f32 0.5, %v2688_v40  ;;  %v2689_v47 = vadd.f32 %v2681_v41, %v2591_v42  ;;  %v2691_v28 = vadd.f32 %v2683_v5, %v2593_v17  ;;  %v6725_v40 = vld [vmem:[%s7417_s2 + $0x160] ss:$16 sps:$4 sm:$0xff]   ;;  %v6731_v41 = vld [vmem:[%s7417_s2 + $0x168] ss:$16 sps:$4 sm:$0xff]  }
 0x729   :  { %v2633_v50 = vpop.f32.mrf.mxu1  ;;  %v2674_v58 = vpop.f32.mrf.mxu0  ;;  %v6737_v42 = vld [vmem:[%s7417_s2 + $0x144] ss:$16 sps:$4 sm:$0xff]   ;;  %v6743_v45 = vld [vmem:[%s7417_s2 + $0x14c] ss:$16 sps:$4 sm:$0xff]   ;;  %v6749_v52 = vld [vmem:[%s7417_s2 + $0x140] ss:$16 sps:$4 sm:$0xff]  }
 0x72a   :  { %4463 = vtanh.f32 %v2775_v59  ;;  %v2779_v61 = vmul.f32 0.5, %v2689_v47  ;;  %v2784_v0 = vmul.f32 0.5, %v2691_v28  ;;  %v6761_v59 = vld [vmem:[%s7417_s2 + $0x124] ss:$16 sps:$4 sm:$0xff]   ;;  %v6773_v47 = vld [vmem:[%s7417_s2 + $0x120] ss:$16 sps:$4 sm:$0xff]  }
 0x72b   :  { %v6779_v50 = vld [vmem:[%s7417_s2 + $0x128] ss:$16 sps:$4 sm:$0xff]   ;;  %v6785_v58 = vld [vmem:[%s7417_s2 + $0x104] ss:$16 sps:$4 sm:$0xff]   ;;  %v6797_v18 = vld [vmem:[%s7417_s2 + $0x100] ss:$16 sps:$4 sm:$0xff]  }
 0x72c   :  { %4465 = vtanh.f32 %v2779_v61  ;;  %v6791_v61 = vld [vmem:[%s7417_s2 + $0x10c] ss:$16 sps:$4 sm:$0xff]   ;;  %v6829_v5 = vld [vmem:[%s7417_s2 + $0x3e8] ss:$16 sps:$4 sm:$0xff]   ;;  %v6849_v28 = vld [vmem:[%s7417_s2 + $0x3c0] ss:$16 sps:$4 sm:$0xff]  }
 0x72d   :  { %v4462_v51 = vpop.eup %4461  ;;  %4467 = vtanh.f32 %v2690_v63  ;;  %v6809_v63 = vld [vmem:[%s7417_s2 + $0x3e4] ss:$16 sps:$4 sm:$0xff]   ;;  %v6841_v17 = vld [vmem:[%s7417_s2 + $0x3cc] ss:$16 sps:$4 sm:$0xff]   ;;  %8026 = vst [vmem:[#allocation43_spill] sm:$0xff] %v6849_v28 }
 0x72e   :  { %v2588_v19 = vmul.f32 %v4462_v51, %v2583_v15  ;;  %4469 = vtanh.f32 %v2784_v0  ;;  %v6803_v15 = vld [vmem:[%s7417_s2 + $0x108] ss:$16 sps:$4 sm:$0xff]   ;;  %v6815_v51 = vld [vmem:[%s7417_s2 + $0x3ec] ss:$16 sps:$4 sm:$0xff]   ;;  %8025 = vst [vmem:[#allocation56_spill] sm:$0xff] %v6841_v17 }
 0x72f   :  { %v6855_v0 = vld [vmem:[%s7417_s2 + $0x3c8] ss:$16 sps:$4 sm:$0xff]  }
 0x730   :  { %2589 = vst [vmem:[#allocation3 + $0x8] sm:$0x3] %v2588_v19  ;;  %v2692_v12 = vpack.c.bf16 %v2588_v19, %v2588_v19  ;;  %v6823_v19 = vld [vmem:[%s7417_s2 + $0x3e0] ss:$16 sps:$4 sm:$0xff]   ;;  %8027 = vst [vmem:[#allocation44_spill] sm:$0xff] %v6855_v0 }
 0x732   :  { %2726 = vmatmul.mubr.bf16.vlgmr.msra.gmra.mxu1 %v2692_v12  ;;  %2767 = vmatmul.mubr.bf16.vlgmr.msra.gmra.mxu0 %v2692_v12  ;;  %v6835_v12 = vld [vmem:[%s7417_s2 + $0x3c4] ss:$16 sps:$4 sm:$0xff]  }
 0x733   :  { %2801 = vmatpush1.bf16.msra.mxu1 %v6197_v24  ;;  %2842 = vmatpush1.bf16.msra.mxu0 %v6203_v55 }
 0x734   :  { %2802 = vmatprep.subr.bf16.mxu1 %v6209_v14  ;;  %2843 = vmatprep.subr.bf16.mxu0 %v6215_v33 }
 0x735   :  { %2832 = vmatprep.mubr.bf16.mxu1 %v7727_v7  ;;  %2873 = vmatprep.mubr.bf16.mxu0 %v7727_v7 }
 0x737   :  { %v4464_v54 = vpop.eup %4463  ;;  %2803 = vmatpush1.bf16.msra.mxu1 %v6223_v29  ;;  %2844 = vmatpush1.bf16.msra.mxu0 %v6229_v4 }
 0x738   :  { %v2777_v53 = vmul.f32 0.5, %v4464_v54  ;;  %2804 = vmatprep.subr.bf16.mxu1 %v6235_v44  ;;  %2845 = vmatprep.subr.bf16.mxu0 %v6241_v32  ;;  %v6861_v54 = vld [vmem:[%s7417_s2 + $0x3a4] ss:$16 sps:$4 sm:$0xff]  }
 0x739   :  { %v4466_v24 = vpop.eup %4465  ;;  %8028 = vst [vmem:[#allocation45_spill] sm:$0xff] %v6861_v54 }
 0x73a   :  { %v2778_v55 = vadd.f32 0.5, %v2777_v53  ;;  %v2781_v14 = vmul.f32 0.5, %v4466_v24  ;;  %v4468_v29 = vpop.eup %4467  ;;  %v6867_v53 = vld [vmem:[%s7417_s2 + $0x3ac] ss:$16 sps:$4 sm:$0xff]   ;;  %v6873_v24 = vld [vmem:[%s7417_s2 + $0x3a0] ss:$16 sps:$4 sm:$0xff]  }
 0x73b   :  { %2805 = vmatpush1.bf16.msra.mxu1 %v6247_v37  ;;  %2846 = vmatpush1.bf16.msra.mxu0 %v6253_v2  ;;  %v4470_v37 = vpop.eup %4469  ;;  %8029 = vst [vmem:[#allocation46_spill] sm:$0xff] %v6867_v53  ;;  %8030 = vst [vmem:[#allocation47_spill] sm:$0xff] %v6873_v24 }
 0x73c   :  { %v2782_v33 = vadd.f32 0.5, %v2781_v14  ;;  %2806 = vmatprep.subr.bf16.mxu1 %v6260_v23  ;;  %2847 = vmatprep.subr.bf16.mxu0 %v6266_v36  ;;  %v2792_v44 = vmul.f32 %v4468_v29, %v2778_v55  ;;  %v2786_v2 = vmul.f32 0.5, %v4470_v37  ;;  %v6879_v55 = vld [vmem:[%s7417_s2 + $0x3a8] ss:$16 sps:$4 sm:$0xff]   ;;  %v6885_v14 = vld [vmem:[%s7417_s2 + $0x384] ss:$16 sps:$4 sm:$0xff]  }
 0x73d   :  { %8031 = vst [vmem:[#allocation48_spill] sm:$0xff] %v6879_v55  ;;  %8032 = vst [vmem:[#allocation49_spill] sm:$0xff] %v6885_v14  ;;  %v6903_v29 = vld [vmem:[%s7417_s2 + $0x388] ss:$16 sps:$4 sm:$0xff]   ;;  %v6921_v37 = vld [vmem:[%s7417_s2 + $0x360] ss:$16 sps:$4 sm:$0xff]  }
 0x73e   :  { %v2791_v4 = vmul.f32 %v2789_v62, %v2782_v33  ;;  %v2787_v23 = vadd.f32 0.5, %v2786_v2  ;;  %v6891_v33 = vld [vmem:[%s7417_s2 + $0x38c] ss:$16 sps:$4 sm:$0xff]   ;;  %v6897_v62 = vld [vmem:[%s7417_s2 + $0x380] ss:$16 sps:$4 sm:$0xff]   ;;  %8035 = vst [vmem:[#allocation52_spill] sm:$0xff] %v6903_v29 }
 0x73f   :  { %2807 = vmatpush1.bf16.msra.mxu1 %v6272_v22  ;;  %2848 = vmatpush1.bf16.msra.mxu0 %v6278_v48  ;;  %v6611_v22 = vld [vmem:[%s7417_s2 + $0x1e4] ss:$16 sps:$4 sm:$0xff]   ;;  %v6617_v48 = vld [vmem:[%s7417_s2 + $0x1ec] ss:$16 sps:$4 sm:$0xff]   ;;  %8033 = vst [vmem:[#allocation50_spill] sm:$0xff] %v6891_v33  ;;  %8034 = vst [vmem:[#allocation51_spill] sm:$0xff] %v6897_v62 }
 0x740   :  { %v6589_v32 = vadd.f32 %v2792_v44, %v2791_v4  ;;  %2808 = vmatprep.subr.bf16.mxu1 %v6286_v60  ;;  %2849 = vmatprep.subr.bf16.mxu0 %v6292_v27  ;;  %v6909_v4 = vld [vmem:[%s7417_s2 + $0x364] ss:$16 sps:$4 sm:$0xff]   ;;  %v6915_v44 = vld [vmem:[%s7417_s2 + $0x36c] ss:$16 sps:$4 sm:$0xff]   ;;  %8038 = vst [vmem:[#allocation33_spill] sm:$0xff] %v6921_v37 }
 0x741   :  { %8036 = vst [vmem:[#allocation53_spill] sm:$0xff] %v6909_v4  ;;  %8037 = vst [vmem:[#allocation54_spill] sm:$0xff] %v6915_v44  ;;  %v6927_v2 = vld [vmem:[%s7417_s2 + $0x368] ss:$16 sps:$4 sm:$0xff]  }
 0x742   :  { %4471 = vtanh.f32 %v6589_v32  ;;  %8039 = vst [vmem:[#allocation34_spill] sm:$0xff] %v6927_v2 }
 0x743   :  { %2809 = vmatpush1.bf16.msra.mxu1 %v6299_v25  ;;  %2850 = vmatpush1.bf16.msra.mxu0 %v7964_v30  ;;  %v6645_v30 = vld [vmem:[%s7417_s2 + $0x1cc] ss:$16 sps:$4 sm:$0xff]  }
 0x744   :  { %2810 = vmatprep.subr.bf16.mxu1 %v7965_v21  ;;  %2851 = vmatprep.subr.bf16.mxu0 %v7966_v13  ;;  %v6653_v21 = vld [vmem:[%s7417_s2 + $0x1c0] ss:$16 sps:$4 sm:$0xff]   ;;  %v6659_v13 = vld [vmem:[%s7417_s2 + $0x1c8] ss:$16 sps:$4 sm:$0xff]  }
 0x747   :  { %2811 = vmatpush1.bf16.msra.mxu1 %v7967_v10  ;;  %2852 = vmatpush1.bf16.msra.mxu0 %v7968_v56  ;;  %v6665_v10 = vld [vmem:[%s7417_s2 + $0x1a4] ss:$16 sps:$4 sm:$0xff]   ;;  %v6671_v56 = vld [vmem:[%s7417_s2 + $0x1ac] ss:$16 sps:$4 sm:$0xff]  }
 0x748   :  { %2812 = vmatprep.subr.bf16.mxu1 %v7969_v57  ;;  %2853 = vmatprep.subr.bf16.mxu0 %v7970_v11  ;;  %v6677_v57 = vld [vmem:[%s7417_s2 + $0x1a0] ss:$16 sps:$4 sm:$0xff]   ;;  %v6683_v11 = vld [vmem:[%s7417_s2 + $0x1a8] ss:$16 sps:$4 sm:$0xff]  }
 0x74b   :  { %2813 = vmatpush1.bf16.msra.mxu1 %v7971_v9  ;;  %2854 = vmatpush1.bf16.msra.mxu0 %v7972_v26  ;;  %v6689_v9 = vld [vmem:[%s7417_s2 + $0x184] ss:$16 sps:$4 sm:$0xff]   ;;  %v6695_v26 = vld [vmem:[%s7417_s2 + $0x18c] ss:$16 sps:$4 sm:$0xff]  }
 0x74c   :  { %2814 = vmatprep.subr.bf16.mxu1 %v7973_v34  ;;  %2855 = vmatprep.subr.bf16.mxu0 %v7974_v6  ;;  %v6701_v34 = vld [vmem:[%s7417_s2 + $0x180] ss:$16 sps:$4 sm:$0xff]   ;;  %v6707_v6 = vld [vmem:[%s7417_s2 + $0x188] ss:$16 sps:$4 sm:$0xff]  }
 0x74f   :  { %v4472_v36 = vpop.eup %4471  ;;  %2815 = vmatpush1.bf16.msra.mxu1 %v6371_v31  ;;  %2856 = vmatpush1.bf16.msra.mxu0 %v6377_v43  ;;  %v6627_v31 = vld [vmem:[%s7417_s2 + $0x1e0] ss:$16 sps:$4 sm:$0xff]   ;;  %v6633_v43 = vld [vmem:[%s7417_s2 + $0x1e8] ss:$16 sps:$4 sm:$0xff]  }
 0x750   :  { %2905 = vmatprep.subr.bf16.mxu1 %v6611_v22  ;;  %2946 = vmatprep.subr.bf16.mxu0 %v6617_v48  ;;  %v2795_v60 = vmul.f32 %v4472_v36, %v2787_v23  ;;  %v6933_v23 = vld [vmem:[%s7417_s2 + $0x344] ss:$16 sps:$4 sm:$0xff]   ;;  %v6939_v36 = vld [vmem:[%s7417_s2 + $0x34c] ss:$16 sps:$4 sm:$0xff]  }
 0x751   :  { %8040 = vst [vmem:[#allocation35_spill] sm:$0xff] %v6933_v23  ;;  %8041 = vst [vmem:[#allocation36_spill] sm:$0xff] %v6939_v36 }
 0x752   :  { %v2796_v27 = vpack.c.bf16 %v2795_v60, %v2795_v60  ;;  %v6945_v60 = vld [vmem:[%s7417_s2 + $0x340] ss:$16 sps:$4 sm:$0xff]  }
 0x753   :  { %8042 = vst [vmem:[#allocation37_spill] sm:$0xff] %v6945_v60 }
 0x754   :  { %v6620_v25 = vrot.slane %v2796_v27, 1  ;;  %v6951_v27 = vld [vmem:[%s7417_s2 + $0x348] ss:$16 sps:$4 sm:$0xff]  }
 0x755   :  { %8043 = vst [vmem:[#allocation38_spill] sm:$0xff] %v6951_v27 }
 0x756   :  { %2833 = vmatmul.mubr.bf16.vlgmr.msra.gmra.mxu1 %v6620_v25  ;;  %2874 = vmatmul.mubr.bf16.vlgmr.msra.gmra.mxu0 %v6620_v25 }
 0x757   :  { %2906 = vmatpush1.bf16.msra.mxu1 %v6627_v31  ;;  %2947 = vmatpush1.bf16.msra.mxu0 %v6633_v43 }
 0x758   :  { %2907 = vmatprep.subr.bf16.mxu1 %v6639_v16  ;;  %2948 = vmatprep.subr.bf16.mxu0 %v6645_v30 }
 0x759   :  { %2937 = vmatprep.mubr.bf16.mxu1 %v7727_v7  ;;  %2978 = vmatprep.mubr.bf16.mxu0 %v7727_v7 }
 0x75b   :  { %2908 = vmatpush1.bf16.msra.mxu1 %v6653_v21  ;;  %2949 = vmatpush1.bf16.msra.mxu0 %v6659_v13 }
 0x75c   :  { %2909 = vmatprep.subr.bf16.mxu1 %v6665_v10  ;;  %2950 = vmatprep.subr.bf16.mxu0 %v6671_v56 }
 0x75f   :  { %2910 = vmatpush1.bf16.msra.mxu1 %v6677_v57  ;;  %2951 = vmatpush1.bf16.msra.mxu0 %v6683_v11 }
 0x760   :  { %2911 = vmatprep.subr.bf16.mxu1 %v6689_v9  ;;  %2952 = vmatprep.subr.bf16.mxu0 %v6695_v26 }
 0x763   :  { %2912 = vmatpush1.bf16.msra.mxu1 %v6701_v34  ;;  %2953 = vmatpush1.bf16.msra.mxu0 %v6707_v6 }
 0x764   :  { %2913 = vmatprep.subr.bf16.mxu1 %v6713_v38  ;;  %2954 = vmatprep.subr.bf16.mxu0 %v6719_v39 }
 0x767   :  { %2914 = vmatpush1.bf16.msra.mxu1 %v6725_v40  ;;  %2955 = vmatpush1.bf16.msra.mxu0 %v6731_v41 }
 0x768   :  { %2915 = vmatprep.subr.bf16.mxu1 %v6737_v42  ;;  %2956 = vmatprep.subr.bf16.mxu0 %v6743_v45 }
 0x76b   :  { %2916 = vmatpush1.bf16.msra.mxu1 %v6749_v52  ;;  %2957 = vmatpush1.bf16.msra.mxu0 %v6755_v49 }
 0x76c   :  { %2917 = vmatprep.subr.bf16.mxu1 %v6761_v59  ;;  %2958 = vmatprep.subr.bf16.mxu0 %v6767_v46 }
 0x76f   :  { %2918 = vmatpush1.bf16.msra.mxu1 %v6773_v47  ;;  %2959 = vmatpush1.bf16.msra.mxu0 %v6779_v50 }
 0x770   :  { %2919 = vmatprep.subr.bf16.mxu1 %v6785_v58  ;;  %2960 = vmatprep.subr.bf16.mxu0 %v6791_v61 }
 0x773   :  { %2920 = vmatpush1.bf16.msra.mxu1 %v6797_v18  ;;  %2961 = vmatpush1.bf16.msra.mxu0 %v6803_v15 }
 0x774   :  { %3004 = vmatprep.subr.bf16.mxu1 %v6809_v63  ;;  %3045 = vmatprep.subr.bf16.mxu0 %v6815_v51 }
 0x776   :  { %2938 = vmatmul.mubr.bf16.vlgmr.msra.gmra.mxu1 %v6620_v25  ;;  %2979 = vmatmul.mubr.bf16.vlgmr.msra.gmra.mxu0 %v6620_v25  ;;  %v6957_v25 = vld [vmem:[%s7417_s2 + $0x324] ss:$16 sps:$4 sm:$0xff]  }
 0x777   :  { %3005 = vmatpush1.bf16.msra.mxu1 %v6823_v19  ;;  %3046 = vmatpush1.bf16.msra.mxu0 %v6829_v5  ;;  %8044 = vst [vmem:[#allocation39_spill] sm:$0xff] %v6957_v25 }
 0x778   :  { %3006 = vmatprep.subr.bf16.mxu1 %v6835_v12  ;;  %3047 = vmatprep.subr.bf16.mxu0 %v6841_v17 }
 0x779   :  { %3036 = vmatprep.mubr.bf16.mxu1 %v7727_v7  ;;  %3077 = vmatprep.mubr.bf16.mxu0 %v7727_v7 }
 0x77b   :  { %3007 = vmatpush1.bf16.msra.mxu1 %v6849_v28  ;;  %3048 = vmatpush1.bf16.msra.mxu0 %v6855_v0 }
 0x77c   :  { %3008 = vmatprep.subr.bf16.mxu1 %v6861_v54  ;;  %3049 = vmatprep.subr.bf16.mxu0 %v6867_v53 }
 0x77f   :  { %3009 = vmatpush1.bf16.msra.mxu1 %v6873_v24  ;;  %3050 = vmatpush1.bf16.msra.mxu0 %v6879_v55 }
 0x780   :  { %3010 = vmatprep.subr.bf16.mxu1 %v6885_v14  ;;  %3051 = vmatprep.subr.bf16.mxu0 %v6891_v33 }
 0x783   :  { %3011 = vmatpush1.bf16.msra.mxu1 %v6897_v62  ;;  %3052 = vmatpush1.bf16.msra.mxu0 %v6903_v29 }
 0x784   :  { %3012 = vmatprep.subr.bf16.mxu1 %v6909_v4  ;;  %3053 = vmatprep.subr.bf16.mxu0 %v6915_v44 }
 0x787   :  { %3013 = vmatpush1.bf16.msra.mxu1 %v6921_v37  ;;  %3054 = vmatpush1.bf16.msra.mxu0 %v6927_v2 }
 0x788   :  { %3014 = vmatprep.subr.bf16.mxu1 %v6933_v23  ;;  %3055 = vmatprep.subr.bf16.mxu0 %v6939_v36  ;;  %v6963_v36 = vld [vmem:[%s7417_s2 + $0x32c] ss:$16 sps:$4 sm:$0xff]  }
 0x789   :  { %8045 = vst [vmem:[#allocation40_spill] sm:$0xff] %v6963_v36 }
 0x78b   :  { %3015 = vmatpush1.bf16.msra.mxu1 %v6945_v60  ;;  %3056 = vmatpush1.bf16.msra.mxu0 %v6951_v27  ;;  %v6969_v60 = vld [vmem:[%s7417_s2 + $0x320] ss:$16 sps:$4 sm:$0xff]   ;;  %v6975_v27 = vld [vmem:[%s7417_s2 + $0x328] ss:$16 sps:$4 sm:$0xff]  }
 0x78c   :  { %3016 = vmatprep.subr.bf16.mxu1 %v6957_v25  ;;  %3057 = vmatprep.subr.bf16.mxu0 %v6963_v36  ;;  %8046 = vst [vmem:[#allocation41_spill] sm:$0xff] %v6969_v60  ;;  %8047 = vst [vmem:[#allocation42_spill] sm:$0xff] %v6975_v27  ;;  %v6981_v25 = vld [vmem:[%s7417_s2 + $0x304] ss:$16 sps:$4 sm:$0xff]   ;;  %v6987_v36 = vld [vmem:[%s7417_s2 + $0x30c] ss:$16 sps:$4 sm:$0xff]  }
 0x78d   :  { %8048 = vst [vmem:[#allocation57_spill] sm:$0xff] %v6981_v25  ;;  %8049 = vst [vmem:[#allocation58_spill] sm:$0xff] %v6987_v36 }
 0x78f   :  { %3017 = vmatpush1.bf16.msra.mxu1 %v6969_v60  ;;  %3058 = vmatpush1.bf16.msra.mxu0 %v6975_v27  ;;  %v6993_v60 = vld [vmem:[%s7417_s2 + $0x300] ss:$16 sps:$4 sm:$0xff]   ;;  %v6999_v27 = vld [vmem:[%s7417_s2 + $0x308] ss:$16 sps:$4 sm:$0xff]  }
 0x790   :  { %3018 = vmatprep.subr.bf16.mxu1 %v6981_v25  ;;  %3059 = vmatprep.subr.bf16.mxu0 %v6987_v36  ;;  %8050 = vst [vmem:[#allocation59_spill] sm:$0xff] %v6993_v60  ;;  %8051 = vst [vmem:[#allocation60_spill] sm:$0xff] %v6999_v27  ;;  %v7005_v25 = vld [vmem:[%s7417_s2 + $0x2e4] ss:$16 sps:$4 sm:$0xff]   ;;  %v7011_v36 = vld [vmem:[%s7417_s2 + $0x2ec] ss:$16 sps:$4 sm:$0xff]  }
 0x791   :  { %8052 = vst [vmem:[#allocation61_spill] sm:$0xff] %v7005_v25  ;;  %8053 = vst [vmem:[#allocation62_spill] sm:$0xff] %v7011_v36 }
 0x793   :  { %3019 = vmatpush1.bf16.msra.mxu1 %v6993_v60  ;;  %3060 = vmatpush1.bf16.msra.mxu0 %v6999_v27 }
 0x794   :  { %3111 = vmatprep.subr.bf16.mxu1 %v7005_v25  ;;  %3152 = vmatprep.subr.bf16.mxu0 %v7011_v36 }
 0x7f2   :  { %v2727_v60 = vpop.f32.mrf.mxu1  ;;  %v2768_v23 = vpop.f32.mrf.mxu0 }
 0x7f3   :  { %v2728_v62 = vadd.f32 %v2727_v60, %v8022_v20  ;;  %v2769_v17 = vadd.f32 %v2768_v23, %v7854_v8 }
 0x7f4   :  { %v2729_v2 = vpop.f32.mrf.mxu1  ;;  %v2770_v37 = vpop.f32.mrf.mxu0 }
 0x7f5   :  { %v2730_v25 = vadd.f32 %v2729_v2, %v8023_v1  ;;  %v2771_v60 = vadd.f32 %v2770_v37, %v7961_v3 }
 0x7f6   :  { %v2731_v44 = vpop.f32.mrf.mxu1  ;;  %v2772_v27 = vpop.f32.mrf.mxu0 }
 0x7f8   :  { %v2732_v4 = vpop.f32.mrf.mxu1  ;;  %v2773_v29 = vpop.f32.mrf.mxu0 }
 0x816   :  { %v2834_v33 = vpop.f32.mrf.mxu1  ;;  %v2875_v14 = vpop.f32.mrf.mxu0 }
 0x817   :  { %v2835_v55 = vadd.f32 %v2834_v33, %v2728_v62  ;;  %v2876_v29 = vadd.f32 %v2875_v14, %v2769_v17 }
 0x818   :  { %v2836_v24 = vpop.f32.mrf.mxu1  ;;  %v2877_v53 = vpop.f32.mrf.mxu0 }
 0x819   :  { %v2882_v54 = vmul.f32 0.5, %v2835_v55  ;;  %v2837_v0 = vadd.f32 %v2836_v24, %v2730_v25  ;;  %v2878_v20 = vadd.f32 %v2877_v53, %v2771_v60 }
 0x81a   :  { %v2838_v36 = vpop.f32.mrf.mxu1  ;;  %v2879_v28 = vpop.f32.mrf.mxu0 }
 0x81b   :  { %4473 = vtanh.f32 %v2882_v54  ;;  %v2886_v44 = vmul.f32 0.5, %v2837_v0  ;;  %v2891_v2 = vmul.f32 0.5, %v2878_v20  ;;  %v2901_v20 = vld [vmem:[#allocation2 + $0x8] sm:$0x30] }
 0x81c   :  { %v2839_v27 = vpop.f32.mrf.mxu1  ;;  %v2880_v4 = vpop.f32.mrf.mxu0 }
 0x81d   :  { %4475 = vtanh.f32 %v2886_v44 }
 0x81e   :  { %4477 = vtanh.f32 %v2876_v29 }
 0x81f   :  { %4479 = vtanh.f32 %v2891_v2 }
 0x828   :  { %v4474_v33 = vpop.eup %4473 }
 0x829   :  { %v2884_v62 = vmul.f32 0.5, %v4474_v33 }
 0x82a   :  { %v4476_v1 = vpop.eup %4475 }
 0x82b   :  { %v2885_v55 = vadd.f32 0.5, %v2884_v62  ;;  %v2888_v24 = vmul.f32 0.5, %v4476_v1  ;;  %v4478_v36 = vpop.eup %4477  ;;  %v2902_v1 = vld [vmem:[#allocation2 + $0x20] sm:$0x30] }
 0x82c   :  { %v4480_v53 = vpop.eup %4479 }
 0x82d   :  { %v2889_v28 = vadd.f32 0.5, %v2888_v24  ;;  %v2896_v0 = vmul.f32 %v4478_v36, %v2885_v55  ;;  %v2893_v2 = vmul.f32 0.5, %v4480_v53  ;;  %v2903_v36 = vld [vmem:[#allocation2 + $0x28] sm:$0x30]  ;;  %v7031_v53 = vld [vmem:[%s7417_s2 + $0x2e8] ss:$16 sps:$4 sm:$0xff]  }
 0x82f   :  { %v2895_v54 = vmul.f32 %v2889_v28, %v6569_v35 }
 0x831   :  { %v7019_v23 = vadd.f32 %v2896_v0, %v2895_v54  ;;  %v2894_v54 = vadd.f32 0.5, %v2893_v2  ;;  %v7069_v2 = vld [vmem:[%s7417_s2 + $0x2ac] ss:$16 sps:$4 sm:$0xff]  }
 0x833   :  { %8054 = vst [vmem:[#allocation4_spill] sm:$0xff] %v7019_v23  ;;  %4481 = vtanh.f32 %v7019_v23 }
 0x836   :  { %v2939_v17 = vpop.f32.mrf.mxu1  ;;  %v2980_v14 = vpop.f32.mrf.mxu0 }
 0x837   :  { %v2991_v37 = vrot.slane %v2939_v17, 4  ;;  %v2993_v35 = vrot.slane %v2980_v14, 4  ;;  %v7025_v14 = vld [vmem:[%s7417_s2 + $0x2e0] ss:$16 sps:$4 sm:$0xff]  }
 0x838   :  { %v2941_v25 = vpop.f32.mrf.mxu1  ;;  %v2982_v44 = vpop.f32.mrf.mxu0 }
 0x839   :  { %v2999_v27 = vadd.f32 %v2991_v37, %v2901_v20  ;;  %v2992_v4 = vrot.slane %v2941_v25, 4  ;;  %v3001_v0 = vadd.f32 %v2993_v35, %v2903_v36  ;;  %v2994_v3 = vrot.slane %v2982_v44, 4  ;;  %v2904_v20 = vld [vmem:[#allocation2 + $0x38] sm:$0x30] }
 0x83a   :  { %v2943_v29 = vpop.f32.mrf.mxu1  ;;  %v2984_v60 = vpop.f32.mrf.mxu0  ;;  %v3100_v36 = vrot.slane %v6589_v32, 6  ;;  %v7100_v32 = vld [vmem:[%s7417_s2 + $0x280] ss:$16 sps:$4 sm:$0xff]  }
 0x83b   :  { %v3086_v33 = vmul.f32 0.5, %v2999_v27  ;;  %v3000_v62 = vadd.f32 %v2992_v4, %v2902_v1  ;;  %v3002_v25 = vadd.f32 %v2994_v3, %v2904_v20  ;;  %v7037_v3 = vld [vmem:[%s7417_s2 + $0x2c4] ss:$16 sps:$4 sm:$0xff]   ;;  %v7051_v4 = vld [vmem:[%s7417_s2 + $0x2c0] ss:$16 sps:$4 sm:$0xff]  }
 0x83c   :  { %v2944_v55 = vpop.f32.mrf.mxu1  ;;  %v2985_v24 = vpop.f32.mrf.mxu0  ;;  %v7057_v1 = vld [vmem:[%s7417_s2 + $0x2c8] ss:$16 sps:$4 sm:$0xff]   ;;  %v7063_v60 = vld [vmem:[%s7417_s2 + $0x2a4] ss:$16 sps:$4 sm:$0xff]  }
 0x83d   :  { %4483 = vtanh.f32 %v3086_v33  ;;  %v3090_v28 = vmul.f32 0.5, %v3000_v62  ;;  %v3095_v44 = vmul.f32 0.5, %v3002_v25  ;;  %v7075_v55 = vld [vmem:[%s7417_s2 + $0x2a0] ss:$16 sps:$4 sm:$0xff]   ;;  %v7081_v24 = vld [vmem:[%s7417_s2 + $0x2a8] ss:$16 sps:$4 sm:$0xff]  }
 0x83e   :  { %v7106_v25 = vld [vmem:[%s7417_s2 + $0x288] ss:$16 sps:$4 sm:$0xff]  }
 0x83f   :  { %4485 = vtanh.f32 %v3090_v28 }
 0x840   :  { %v4482_v17 = vpop.eup %4481  ;;  %4487 = vtanh.f32 %v3001_v0  ;;  %v7094_v0 = vld [vmem:[%s7417_s2 + $0x28c] ss:$16 sps:$4 sm:$0xff]  }
 0x841   :  { %v2899_v23 = vmul.f32 %v4482_v17, %v2894_v54  ;;  %4489 = vtanh.f32 %v3095_v44  ;;  %v7088_v54 = vld [vmem:[%s7417_s2 + $0x284] ss:$16 sps:$4 sm:$0xff]  }
 0x843   :  { %2900 = vst [vmem:[#allocation3 + $0xa] sm:$0x3] %v2899_v23  ;;  %v3003_v37 = vpack.c.bf16 %v2899_v23, %v2899_v23  ;;  %v7043_v23 = vld [vmem:[%s7417_s2 + $0x2cc] ss:$16 sps:$4 sm:$0xff]  }
 0x845   :  { %3037 = vmatmul.mubr.bf16.vlgmr.msra.gmra.mxu1 %v3003_v37  ;;  %3078 = vmatmul.mubr.bf16.vlgmr.msra.gmra.mxu0 %v3003_v37 }
 0x846   :  { %3112 = vmatpush1.bf16.msra.mxu1 %v7025_v14  ;;  %3153 = vmatpush1.bf16.msra.mxu0 %v7031_v53 }
 0x847   :  { %3113 = vmatprep.subr.bf16.mxu1 %v7037_v3  ;;  %3154 = vmatprep.subr.bf16.mxu0 %v7043_v23 }
 0x848   :  { %3143 = vmatprep.mubr.bf16.mxu1 %v7727_v7  ;;  %3184 = vmatprep.mubr.bf16.mxu0 %v7727_v7 }
 0x84a   :  { %v4484_v27 = vpop.eup %4483  ;;  %3114 = vmatpush1.bf16.msra.mxu1 %v7051_v4  ;;  %3155 = vmatpush1.bf16.msra.mxu0 %v7057_v1 }
 0x84b   :  { %v3088_v29 = vmul.f32 0.5, %v4484_v27  ;;  %3115 = vmatprep.subr.bf16.mxu1 %v7063_v60  ;;  %3156 = vmatprep.subr.bf16.mxu0 %v7069_v2  ;;  %v7114_v27 = vld [vmem:[%s7417_s2 + $0x264] ss:$16 sps:$4 sm:$0xff]  }
 0x84c   :  { %v4486_v33 = vpop.eup %4485 }
 0x84d   :  { %v3089_v35 = vadd.f32 0.5, %v3088_v29  ;;  %v3092_v62 = vmul.f32 0.5, %v4486_v33  ;;  %v4488_v17 = vpop.eup %4487  ;;  %v7120_v29 = vld [vmem:[%s7417_s2 + $0x26c] ss:$16 sps:$4 sm:$0xff]   ;;  %v7127_v33 = vld [vmem:[%s7417_s2 + $0x260] ss:$16 sps:$4 sm:$0xff]  }
 0x84e   :  { %3116 = vmatpush1.bf16.msra.mxu1 %v7075_v55  ;;  %3157 = vmatpush1.bf16.msra.mxu0 %v7081_v24 }
 0x84f   :  { %v3093_v28 = vadd.f32 0.5, %v3092_v62  ;;  %3117 = vmatprep.subr.bf16.mxu1 %v7088_v54  ;;  %3158 = vmatprep.subr.bf16.mxu0 %v7094_v0  ;;  %v3103_v20 = vmul.f32 %v4488_v17, %v3089_v35  ;;  %v7133_v35 = vld [vmem:[%s7417_s2 + $0x268] ss:$16 sps:$4 sm:$0xff]   ;;  %v7139_v62 = vld [vmem:[%s7417_s2 + $0x244] ss:$16 sps:$4 sm:$0xff]  }
 0x850   :  { %8055 = vst [vmem:[#allocation5_spill] sm:$0xff] %v7133_v35  ;;  %8056 = vst [vmem:[#allocation7_spill] sm:$0xff] %v7139_v62  ;;  %v7151_v17 = vld [vmem:[%s7417_s2 + $0x240] ss:$16 sps:$4 sm:$0xff]  }
 0x851   :  { %v3102_v37 = vmul.f32 %v3100_v36, %v3093_v28  ;;  %v7145_v28 = vld [vmem:[%s7417_s2 + $0x24c] ss:$16 sps:$4 sm:$0xff]   ;;  %v4490_v36 = vpop.eup %4489  ;;  %8058 = vst [vmem:[#allocation8_spill] sm:$0xff] %v7151_v17 }
 0x852   :  { %3118 = vmatpush1.bf16.msra.mxu1 %v7100_v32  ;;  %3159 = vmatpush1.bf16.msra.mxu0 %v7106_v25  ;;  %8057 = vst [vmem:[#allocation6_spill] sm:$0xff] %v7145_v28 }
 0x853   :  { %v7109_v44 = vadd.f32 %v3103_v20, %v3102_v37  ;;  %3119 = vmatprep.subr.bf16.mxu1 %v7114_v27  ;;  %3160 = vmatprep.subr.bf16.mxu0 %v7120_v29  ;;  %v7157_v37 = vld [vmem:[%s7417_s2 + $0x248] ss:$16 sps:$4 sm:$0xff]   ;;  %v7163_v20 = vld [vmem:[%s7417_s2 + $0x224] ss:$16 sps:$4 sm:$0xff]  }
 0x854   :  { %8059 = vst [vmem:[#allocation9_spill] sm:$0xff] %v7157_v37  ;;  %8060 = vst [vmem:[#allocation11_spill] sm:$0xff] %v7163_v20 }
 0x855   :  { %4491 = vtanh.f32 %v7109_v44 }
 0x856   :  { %3120 = vmatpush1.bf16.msra.mxu1 %v7127_v33  ;;  %3161 = vmatpush1.bf16.msra.mxu0 %v7133_v35 }
 0x857   :  { %3121 = vmatprep.subr.bf16.mxu1 %v7139_v62  ;;  %3162 = vmatprep.subr.bf16.mxu0 %v7145_v28  ;;  %v7169_v28 = vld [vmem:[%s7417_s2 + $0x22c] ss:$16 sps:$4 sm:$0xff]   ;;  %v7175_v62 = vld [vmem:[%s7417_s2 + $0x220] ss:$16 sps:$4 sm:$0xff]  }
 0x858   :  { %8061 = vst [vmem:[#allocation10_spill] sm:$0xff] %v7169_v28  ;;  %8062 = vst [vmem:[#allocation12_spill] sm:$0xff] %v7175_v62 }
 0x85a   :  { %3122 = vmatpush1.bf16.msra.mxu1 %v7151_v17  ;;  %3163 = vmatpush1.bf16.msra.mxu0 %v7157_v37  ;;  %v3097_v17 = vmul.f32 0.5, %v4490_v36  ;;  %v7181_v37 = vld [vmem:[%s7417_s2 + $0x228] ss:$16 sps:$4 sm:$0xff]   ;;  %v7193_v36 = vld [vmem:[%s7417_s2 + $0x20c] ss:$16 sps:$4 sm:$0xff]  }
 0x85b   :  { %3123 = vmatprep.subr.bf16.mxu1 %v7163_v20  ;;  %3164 = vmatprep.subr.bf16.mxu0 %v7169_v28  ;;  %8063 = vst [vmem:[#allocation13_spill] sm:$0xff] %v7181_v37  ;;  %v7187_v20 = vld [vmem:[%s7417_s2 + $0x204] ss:$16 sps:$4 sm:$0xff]   ;;  %8065 = vst [vmem:[#allocation14_spill] sm:$0xff] %v7193_v36 }
 0x85c   :  { %8064 = vst [vmem:[#allocation15_spill] sm:$0xff] %v7187_v20 }
 0x85e   :  { %3124 = vmatpush1.bf16.msra.mxu1 %v7175_v62  ;;  %3165 = vmatpush1.bf16.msra.mxu0 %v7181_v37  ;;  %v3098_v62 = vadd.f32 0.5, %v3097_v17  ;;  %v7199_v37 = vld [vmem:[%s7417_s2 + $0x200] ss:$16 sps:$4 sm:$0xff]  }
 0x85f   :  { %3125 = vmatprep.subr.bf16.mxu1 %v7187_v20  ;;  %3166 = vmatprep.subr.bf16.mxu0 %v7193_v36  ;;  %v7205_v20 = vld [vmem:[%s7417_s2 + $0x208] ss:$16 sps:$4 sm:$0xff]  }
 0x862   :  { %v4492_v28 = vpop.eup %4491  ;;  %3126 = vmatpush1.bf16.msra.mxu1 %v7199_v37  ;;  %3167 = vmatpush1.bf16.msra.mxu0 %v7205_v20 }
 0x863   :  { %3216 = vmatprep.subr.bf16.mxu1 %v6611_v22  ;;  %3257 = vmatprep.subr.bf16.mxu0 %v6617_v48  ;;  %v3106_v17 = vmul.f32 %v4492_v28, %v3098_v62  ;;  %v8066_v22 = vld [vmem:[#allocation56_spill] sm:$0xff]  ;;  %v8067_v48 = vld [vmem:[#allocation43_spill] sm:$0xff] }
 0x865   :  { %v3107_v36 = vpack.c.bf16 %v3106_v17, %v3106_v17  ;;  %v8096_v17 = vld [vmem:[#allocation64_spill] sm:$0xff] }
 0x867   :  { %v3109_v35 = vrot.slane %v3107_v36, 2 }
 0x869   :  { %3144 = vmatmul.mubr.bf16.vlgmr.msra.gmra.mxu1 %v3109_v35  ;;  %3185 = vmatmul.mubr.bf16.vlgmr.msra.gmra.mxu0 %v3109_v35 }
 0x86a   :  { %3217 = vmatpush1.bf16.msra.mxu1 %v6627_v31  ;;  %3258 = vmatpush1.bf16.msra.mxu0 %v6633_v43  ;;  %v8068_v31 = vld [vmem:[#allocation44_spill] sm:$0xff]  ;;  %v8069_v43 = vld [vmem:[#allocation45_spill] sm:$0xff] }
 0x86b   :  { %3218 = vmatprep.subr.bf16.mxu1 %v6639_v16  ;;  %3259 = vmatprep.subr.bf16.mxu0 %v6645_v30  ;;  %v8070_v16 = vld [vmem:[#allocation46_spill] sm:$0xff]  ;;  %v8071_v30 = vld [vmem:[#allocation47_spill] sm:$0xff] }
 0x86c   :  { %3248 = vmatprep.mubr.bf16.mxu1 %v7727_v7  ;;  %3289 = vmatprep.mubr.bf16.mxu0 %v7727_v7 }
 0x86e   :  { %3219 = vmatpush1.bf16.msra.mxu1 %v6653_v21  ;;  %3260 = vmatpush1.bf16.msra.mxu0 %v6659_v13  ;;  %v8072_v21 = vld [vmem:[#allocation48_spill] sm:$0xff]  ;;  %v8073_v13 = vld [vmem:[#allocation49_spill] sm:$0xff] }
 0x86f   :  { %3220 = vmatprep.subr.bf16.mxu1 %v6665_v10  ;;  %3261 = vmatprep.subr.bf16.mxu0 %v6671_v56  ;;  %v8074_v10 = vld [vmem:[#allocation50_spill] sm:$0xff]  ;;  %v8075_v56 = vld [vmem:[#allocation51_spill] sm:$0xff] }
 0x872   :  { %3221 = vmatpush1.bf16.msra.mxu1 %v6677_v57  ;;  %3262 = vmatpush1.bf16.msra.mxu0 %v6683_v11  ;;  %v8076_v57 = vld [vmem:[#allocation52_spill] sm:$0xff]  ;;  %v8077_v11 = vld [vmem:[#allocation53_spill] sm:$0xff] }
 0x873   :  { %3222 = vmatprep.subr.bf16.mxu1 %v6689_v9  ;;  %3263 = vmatprep.subr.bf16.mxu0 %v6695_v26  ;;  %v8078_v9 = vld [vmem:[#allocation54_spill] sm:$0xff]  ;;  %v8079_v26 = vld [vmem:[#allocation33_spill] sm:$0xff] }
 0x876   :  { %3223 = vmatpush1.bf16.msra.mxu1 %v6701_v34  ;;  %3264 = vmatpush1.bf16.msra.mxu0 %v6707_v6  ;;  %v8080_v34 = vld [vmem:[#allocation34_spill] sm:$0xff]  ;;  %v8081_v6 = vld [vmem:[#allocation35_spill] sm:$0xff] }
 0x877   :  { %3224 = vmatprep.subr.bf16.mxu1 %v6713_v38  ;;  %3265 = vmatprep.subr.bf16.mxu0 %v6719_v39  ;;  %v8082_v38 = vld [vmem:[#allocation36_spill] sm:$0xff]  ;;  %v8083_v39 = vld [vmem:[#allocation37_spill] sm:$0xff] }
 0x87a   :  { %3225 = vmatpush1.bf16.msra.mxu1 %v6725_v40  ;;  %3266 = vmatpush1.bf16.msra.mxu0 %v6731_v41  ;;  %v8084_v40 = vld [vmem:[#allocation38_spill] sm:$0xff]  ;;  %v8085_v41 = vld [vmem:[#allocation39_spill] sm:$0xff] }
 0x87b   :  { %3226 = vmatprep.subr.bf16.mxu1 %v6737_v42  ;;  %3267 = vmatprep.subr.bf16.mxu0 %v6743_v45  ;;  %v8086_v42 = vld [vmem:[#allocation40_spill] sm:$0xff]  ;;  %v8087_v45 = vld [vmem:[#allocation41_spill] sm:$0xff] }
 0x87e   :  { %3227 = vmatpush1.bf16.msra.mxu1 %v6749_v52  ;;  %3268 = vmatpush1.bf16.msra.mxu0 %v6755_v49  ;;  %v8088_v52 = vld [vmem:[#allocation42_spill] sm:$0xff]  ;;  %v8089_v49 = vld [vmem:[#allocation57_spill] sm:$0xff] }
 0x87f   :  { %3228 = vmatprep.subr.bf16.mxu1 %v6761_v59  ;;  %3269 = vmatprep.subr.bf16.mxu0 %v6767_v46  ;;  %v8090_v59 = vld [vmem:[#allocation58_spill] sm:$0xff]  ;;  %v8091_v46 = vld [vmem:[#allocation59_spill] sm:$0xff] }
 0x882   :  { %3229 = vmatpush1.bf16.msra.mxu1 %v6773_v47  ;;  %3270 = vmatpush1.bf16.msra.mxu0 %v6779_v50  ;;  %v8092_v47 = vld [vmem:[#allocation60_spill] sm:$0xff]  ;;  %v8093_v50 = vld [vmem:[#allocation61_spill] sm:$0xff] }
 0x883   :  { %3230 = vmatprep.subr.bf16.mxu1 %v6785_v58  ;;  %3271 = vmatprep.subr.bf16.mxu0 %v6791_v61  ;;  %v8094_v58 = vld [vmem:[#allocation62_spill] sm:$0xff] }
 0x886   :  { %3231 = vmatpush1.bf16.msra.mxu1 %v6797_v18  ;;  %3272 = vmatpush1.bf16.msra.mxu0 %v6803_v15 }
 0x887   :  { %3315 = vmatprep.subr.bf16.mxu1 %v6809_v63  ;;  %3356 = vmatprep.subr.bf16.mxu0 %v6815_v51 }
 0x889   :  { %3249 = vmatmul.mubr.bf16.vlgmr.msra.gmra.mxu1 %v3109_v35  ;;  %3290 = vmatmul.mubr.bf16.vlgmr.msra.gmra.mxu0 %v3109_v35  ;;  %v8095_v35 = vld [vmem:[#allocation63_spill] sm:$0xff] }
 0x88a   :  { %3316 = vmatpush1.bf16.msra.mxu1 %v6823_v19  ;;  %3357 = vmatpush1.bf16.msra.mxu0 %v6829_v5 }
 0x88b   :  { %3317 = vmatprep.subr.bf16.mxu1 %v6835_v12  ;;  %3358 = vmatprep.subr.bf16.mxu0 %v8066_v22 }
 0x88c   :  { %3347 = vmatprep.mubr.bf16.mxu1 %v7727_v7  ;;  %3388 = vmatprep.mubr.bf16.mxu0 %v7727_v7 }
 0x88e   :  { %3318 = vmatpush1.bf16.msra.mxu1 %v8067_v48  ;;  %3359 = vmatpush1.bf16.msra.mxu0 %v8068_v31 }
 0x88f   :  { %3319 = vmatprep.subr.bf16.mxu1 %v8069_v43  ;;  %3360 = vmatprep.subr.bf16.mxu0 %v8070_v16 }
 0x892   :  { %3320 = vmatpush1.bf16.msra.mxu1 %v8071_v30  ;;  %3361 = vmatpush1.bf16.msra.mxu0 %v8072_v21 }
 0x893   :  { %3321 = vmatprep.subr.bf16.mxu1 %v8073_v13  ;;  %3362 = vmatprep.subr.bf16.mxu0 %v8074_v10 }
 0x896   :  { %3322 = vmatpush1.bf16.msra.mxu1 %v8075_v56  ;;  %3363 = vmatpush1.bf16.msra.mxu0 %v8076_v57 }
 0x897   :  { %3323 = vmatprep.subr.bf16.mxu1 %v8077_v11  ;;  %3364 = vmatprep.subr.bf16.mxu0 %v8078_v9 }
 0x89a   :  { %3324 = vmatpush1.bf16.msra.mxu1 %v8079_v26  ;;  %3365 = vmatpush1.bf16.msra.mxu0 %v8080_v34  ;;  %v8097_v26 = vld [vmem:[#allocation66_spill] sm:$0xff] }
 0x89b   :  { %3325 = vmatprep.subr.bf16.mxu1 %v8081_v6  ;;  %3366 = vmatprep.subr.bf16.mxu0 %v8082_v38 }
 0x89e   :  { %3326 = vmatpush1.bf16.msra.mxu1 %v8083_v39  ;;  %3367 = vmatpush1.bf16.msra.mxu0 %v8084_v40 }
 0x89f   :  { %3327 = vmatprep.subr.bf16.mxu1 %v8085_v41  ;;  %3368 = vmatprep.subr.bf16.mxu0 %v8086_v42 }
 0x8a2   :  { %3328 = vmatpush1.bf16.msra.mxu1 %v8087_v45  ;;  %3369 = vmatpush1.bf16.msra.mxu0 %v8088_v52 }
 0x8a3   :  { %3329 = vmatprep.subr.bf16.mxu1 %v8089_v49  ;;  %3370 = vmatprep.subr.bf16.mxu0 %v8090_v59  ;;  %v8098_v59 = vld [vmem:[#allocation4_spill] sm:$0xff] }
 0x8a6   :  { %3330 = vmatpush1.bf16.msra.mxu1 %v8091_v46  ;;  %3371 = vmatpush1.bf16.msra.mxu0 %v8092_v47 }
 0x8a7   :  { %3422 = vmatprep.subr.bf16.mxu1 %v8093_v50  ;;  %3463 = vmatprep.subr.bf16.mxu0 %v8094_v58 }
 0x905   :  { %v3038_v61 = vpop.f32.mrf.mxu1  ;;  %v3079_v18 = vpop.f32.mrf.mxu0 }
 0x906   :  { %v3039_v62 = vadd.f32 %v3038_v61, %v8095_v35  ;;  %v3080_v10 = vadd.f32 %v3079_v18, %v7854_v8 }
 0x907   :  { %v3040_v15 = vpop.f32.mrf.mxu1  ;;  %v3081_v63 = vpop.f32.mrf.mxu0 }
 0x908   :  { %v3041_v22 = vadd.f32 %v3040_v15, %v8096_v17  ;;  %v3082_v34 = vadd.f32 %v3081_v63, %v8097_v26  ;;  %v3212_v63 = vld [vmem:[#allocation2 + $0x8] sm:$0xc0] }
 0x909   :  { %v3042_v51 = vpop.f32.mrf.mxu1  ;;  %v3083_v19 = vpop.f32.mrf.mxu0 }
 0x90b   :  { %v3043_v5 = vpop.f32.mrf.mxu1  ;;  %v3084_v12 = vpop.f32.mrf.mxu0 }
 0x929   :  { %v3145_v28 = vpop.f32.mrf.mxu1  ;;  %v3186_v36 = vpop.f32.mrf.mxu0 }
 0x92a   :  { %v3146_v48 = vadd.f32 %v3145_v28, %v3039_v62  ;;  %v3187_v9 = vadd.f32 %v3186_v36, %v3080_v10  ;;  %v3213_v62 = vld [vmem:[#allocation2 + $0x20] sm:$0xc0] }
 0x92b   :  { %v3147_v31 = vpop.f32.mrf.mxu1  ;;  %v3188_v43 = vpop.f32.mrf.mxu0 }
 0x92c   :  { %v3193_v16 = vmul.f32 0.5, %v3146_v48  ;;  %v3148_v30 = vadd.f32 %v3147_v31, %v3041_v22  ;;  %v3189_v6 = vadd.f32 %v3188_v43, %v3082_v34 }
 0x92d   :  { %v3149_v21 = vpop.f32.mrf.mxu1  ;;  %v3190_v13 = vpop.f32.mrf.mxu0 }
 0x92e   :  { %4493 = vtanh.f32 %v3193_v16  ;;  %v3197_v56 = vmul.f32 0.5, %v3148_v30  ;;  %v3202_v38 = vmul.f32 0.5, %v3189_v6  ;;  %v3214_v13 = vld [vmem:[#allocation2 + $0x28] sm:$0xc0]  ;;  %v3215_v6 = vld [vmem:[#allocation2 + $0x38] sm:$0xc0] }
 0x92f   :  { %v3150_v57 = vpop.f32.mrf.mxu1  ;;  %v3191_v11 = vpop.f32.mrf.mxu0 }
 0x930   :  { %4495 = vtanh.f32 %v3197_v56 }
 0x931   :  { %4497 = vtanh.f32 %v3187_v9 }
 0x932   :  { %4499 = vtanh.f32 %v3202_v38 }
 0x93b   :  { %v4494_v39 = vpop.eup %4493 }
 0x93c   :  { %v3195_v40 = vmul.f32 0.5, %v4494_v39 }
 0x93d   :  { %v4496_v41 = vpop.eup %4495 }
 0x93e   :  { %v3196_v42 = vadd.f32 0.5, %v3195_v40  ;;  %v3199_v45 = vmul.f32 0.5, %v4496_v41  ;;  %v4498_v49 = vpop.eup %4497 }
 0x93f   :  { %v4500_v15 = vpop.eup %4499 }
 0x940   :  { %v3200_v52 = vadd.f32 0.5, %v3199_v45  ;;  %v3207_v47 = vmul.f32 %v4498_v49, %v3196_v42  ;;  %v3204_v22 = vmul.f32 0.5, %v4500_v15  ;;  %v8106_v42 = vld [vmem:[#allocation12_spill] sm:$0xff]  ;;  %v8107_v45 = vld [vmem:[#allocation13_spill] sm:$0xff]  ;;  %v4350_v15 = vld [vmem:[%s7416_s3 + $0x60] sm:$0xff]  }
 0x942   :  { %v3206_v46 = vmul.f32 %v3200_v52, %v8098_v59  ;;  %v3205_v10 = vadd.f32 0.5, %v3204_v22  ;;  %v8109_v52 = vld [vmem:[#allocation14_spill] sm:$0xff]  ;;  %v4359_v22 = vld [vmem:[%s7416_s3 + $0x98] sm:$0xff]  }
 0x944   :  { %v7283_v50 = vadd.f32 %v3207_v47, %v3206_v46  ;;  %v8110_v47 = vmov 0.0  }
 0x946   :  { %4501 = vtanh.f32 %v7283_v50 }
 0x949   :  { %v3250_v58 = vpop.f32.mrf.mxu1  ;;  %v3291_v61 = vpop.f32.mrf.mxu0 }
 0x94a   :  { %v3302_v18 = vrot.slane %v3250_v58, 2  ;;  %v3304_v31 = vrot.slane %v3291_v61, 2 }
 0x94b   :  { %v3252_v51 = vpop.f32.mrf.mxu1  ;;  %v3293_v19 = vpop.f32.mrf.mxu0 }
 0x94c   :  { %v3310_v5 = vadd.f32 %v3302_v18, %v3212_v63  ;;  %v3303_v12 = vrot.slane %v3252_v51, 2  ;;  %v3312_v56 = vadd.f32 %v3304_v31, %v3214_v13  ;;  %v3305_v9 = vrot.slane %v3293_v19, 2  ;;  %v4349_v18 = vld [vmem:[%s7416_s3 + $0x68] sm:$0xff]   ;;  %v4351_v63 = vld [vmem:[%s7416_s3 + $0x58] sm:$0xff]   ;;  %v4352_v51 = vld [vmem:[%s7416_s3 + $0x50] sm:$0xff]  }
 0x94d   :  { %v3254_v28 = vpop.f32.mrf.mxu1  ;;  %v3295_v36 = vpop.f32.mrf.mxu0  ;;  %v4353_v19 = vld [vmem:[%s7416_s3 + $0x48] sm:$0xff]  }
 0x94e   :  { %v3397_v48 = vmul.f32 0.5, %v3310_v5  ;;  %v3311_v43 = vadd.f32 %v3303_v12, %v3213_v62  ;;  %v3313_v38 = vadd.f32 %v3305_v9, %v3215_v6  ;;  %v4354_v5 = vld [vmem:[%s7416_s3 + $0x40] sm:$0xff]   ;;  %v4355_v12 = vld [vmem:[%s7416_s3 + $0xb8] sm:$0xff]   ;;  %v4356_v62 = vld [vmem:[%s7416_s3 + $0xb0] sm:$0xff]  }
 0x94f   :  { %v3255_v16 = vpop.f32.mrf.mxu1  ;;  %v3296_v30 = vpop.f32.mrf.mxu0  ;;  %v4357_v28 = vld [vmem:[%s7416_s3 + $0xa8] sm:$0xff]   ;;  %v4358_v36 = vld [vmem:[%s7416_s3 + $0xa0] sm:$0xff]  }
 0x950   :  { %4503 = vtanh.f32 %v3397_v48  ;;  %v3401_v21 = vmul.f32 0.5, %v3311_v43  ;;  %v3406_v39 = vmul.f32 0.5, %v3313_v38 }
 0x952   :  { %4505 = vtanh.f32 %v3401_v21 }
 0x953   :  { %v4502_v57 = vpop.eup %4501  ;;  %4507 = vtanh.f32 %v3312_v56 }
 0x954   :  { %v3210_v11 = vmul.f32 %v4502_v57, %v3205_v10  ;;  %4509 = vtanh.f32 %v3406_v39 }
 0x956   :  { %3211 = vst [vmem:[#allocation3 + $0xc] sm:$0x3] %v3210_v11  ;;  %v3314_v34 = vpack.c.bf16 %v3210_v11, %v3210_v11 }
 0x958   :  { %3348 = vmatmul.mubr.bf16.vlgmr.msra.gmra.mxu1 %v3314_v34  ;;  %3389 = vmatmul.mubr.bf16.vlgmr.msra.gmra.mxu0 %v3314_v34 }
 0x959   :  { %3423 = vmatpush1.bf16.msra.mxu1 %v7025_v14  ;;  %3464 = vmatpush1.bf16.msra.mxu0 %v7031_v53 }
 0x95a   :  { %3424 = vmatprep.subr.bf16.mxu1 %v7037_v3  ;;  %3465 = vmatprep.subr.bf16.mxu0 %v7043_v23  ;;  %v3411_v23 = vrot.slane %v7109_v44, 6  ;;  %v8104_v44 = vld [vmem:[#allocation11_spill] sm:$0xff] }
 0x95b   :  { %3454 = vmatprep.mubr.bf16.mxu1 %v7727_v7  ;;  %3495 = vmatprep.mubr.bf16.mxu0 %v7727_v7 }
 0x95d   :  { %v4504_v40 = vpop.eup %4503  ;;  %3425 = vmatpush1.bf16.msra.mxu1 %v7051_v4  ;;  %3466 = vmatpush1.bf16.msra.mxu0 %v7057_v1 }
 0x95e   :  { %v3399_v41 = vmul.f32 0.5, %v4504_v40  ;;  %3426 = vmatprep.subr.bf16.mxu1 %v7063_v60  ;;  %3467 = vmatprep.subr.bf16.mxu0 %v7069_v2 }
 0x95f   :  { %v4506_v14 = vpop.eup %4505 }
 0x960   :  { %v3400_v53 = vadd.f32 0.5, %v3399_v41  ;;  %v3403_v3 = vmul.f32 0.5, %v4506_v14  ;;  %v4508_v4 = vpop.eup %4507 }
 0x961   :  { %3427 = vmatpush1.bf16.msra.mxu1 %v7075_v55  ;;  %3468 = vmatpush1.bf16.msra.mxu0 %v7081_v24  ;;  %v8099_v55 = vld [vmem:[#allocation5_spill] sm:$0xff]  ;;  %v8100_v24 = vld [vmem:[#allocation7_spill] sm:$0xff] }
 0x962   :  { %v3404_v7 = vadd.f32 0.5, %v3403_v3  ;;  %3428 = vmatprep.subr.bf16.mxu1 %v7088_v54  ;;  %3469 = vmatprep.subr.bf16.mxu0 %v7094_v0  ;;  %v3414_v60 = vmul.f32 %v4508_v4, %v3400_v53  ;;  %v8101_v54 = vld [vmem:[#allocation6_spill] sm:$0xff]  ;;  %v4510_v0 = vpop.eup %4509 }
 0x964   :  { %v3413_v1 = vmul.f32 %v3411_v23, %v3404_v7 }
 0x965   :  { %3429 = vmatpush1.bf16.msra.mxu1 %v7100_v32  ;;  %3470 = vmatpush1.bf16.msra.mxu0 %v7106_v25  ;;  %v8102_v32 = vld [vmem:[#allocation8_spill] sm:$0xff]  ;;  %v8103_v25 = vld [vmem:[#allocation9_spill] sm:$0xff] }
 0x966   :  { %v3415_v2 = vadd.f32 %v3414_v60, %v3413_v1  ;;  %3430 = vmatprep.subr.bf16.mxu1 %v7114_v27  ;;  %3471 = vmatprep.subr.bf16.mxu0 %v7120_v29  ;;  %v8105_v27 = vld [vmem:[#allocation10_spill] sm:$0xff]  ;;  %v3408_v29 = vmul.f32 0.5, %v4510_v0 }
 0x968   :  { %4511 = vtanh.f32 %v3415_v2  ;;  %4055 = vst [vmem:[%s7421_s6 - $0x2] sm:$0xc0] %v3415_v2  ;;  %v3409_v49 = vadd.f32 0.5, %v3408_v29 }
 0x969   :  { %3431 = vmatpush1.bf16.msra.mxu1 %v7127_v33  ;;  %3472 = vmatpush1.bf16.msra.mxu0 %v8099_v55  ;;  %v8108_v33 = vld [vmem:[#allocation15_spill] sm:$0xff] }
 0x96a   :  { %3432 = vmatprep.subr.bf16.mxu1 %v8100_v24  ;;  %3473 = vmatprep.subr.bf16.mxu0 %v8101_v54 }
 0x96d   :  { %3433 = vmatpush1.bf16.msra.mxu1 %v8102_v32  ;;  %3474 = vmatpush1.bf16.msra.mxu0 %v8103_v25 }
 0x96e   :  { %3434 = vmatprep.subr.bf16.mxu1 %v8104_v44  ;;  %3475 = vmatprep.subr.bf16.mxu0 %v8105_v27 }
 0x971   :  { %3435 = vmatpush1.bf16.msra.mxu1 %v8106_v42  ;;  %3476 = vmatpush1.bf16.msra.mxu0 %v8107_v45 }
 0x972   :  { %3436 = vmatprep.subr.bf16.mxu1 %v8108_v33  ;;  %3477 = vmatprep.subr.bf16.mxu0 %v8109_v52  ;;  %v3523_v33 = vld [vmem:[#allocation3] sm:$0xff] }
 0x975   :  { %v4512_v59 = vpop.eup %4511  ;;  %3437 = vmatpush1.bf16.msra.mxu1 %v7199_v37  ;;  %3478 = vmatpush1.bf16.msra.mxu0 %v7205_v20  ;;  %v4347_v37 = vld [vmem:[%s7416_s3 + $0x78] sm:$0xff]   ;;  %v4348_v20 = vld [vmem:[%s7416_s3 + $0x70] sm:$0xff]  }
 0x976   :  { %v3417_v46 = vmul.f32 %v4512_v59, %v3409_v49  ;;  %4104 = vmatprep.subr.bf16.mxu1 %v8110_v47  ;;  %4124 = vmatprep.subr.bf16.mxu0 %v8110_v47  ;;  %v4360_v49 = vld [vmem:[%s7416_s3 + $0x90] sm:$0xff]   ;;  %v4361_v59 = vld [vmem:[%s7416_s3 + $0x88] sm:$0xff]  }
 0x978   :  { %3749 = vst [vmem:[%s7421_s6 - $0x6] sm:$0xc0] %v3417_v46  ;;  %v3418_v58 = vpack.c.bf16 %v3417_v46, %v3417_v46  ;;  %v4362_v46 = vld [vmem:[%s7416_s3 + $0x80] sm:$0xff]  }
 0x97a   :  { %v3420_v61 = vrot.slane %v3418_v58, 3  ;;  %v3543_v58 = vld [vmem:[%s7419_s4 + $0x3] ss:$0 sm:$0xff] }
 0x97c   :  { %3455 = vmatmul.mubr.bf16.vlgmr.msra.gmra.mxu1 %v3420_v61  ;;  %3496 = vmatmul.mubr.bf16.vlgmr.msra.gmra.mxu0 %v3420_v61 }
 0x97d   :  { %4120 = vmatprep.mubr.msk.bf16.mxu1 %vm4716_vm0, %v8110_v47  ;;  %4140 = vmatprep.mubr.msk.bf16.mxu0 %vm4716_vm0, %v8110_v47 }
 0x97e   :  { %4105 = vmatpush3.bf16.msra.mxu1 %v4347_v37  ;;  %4125 = vmatpush3.bf16.msra.mxu0 %v4355_v12 }
 0x97f   :  { %4106 = vmatprep.subr.bf16.mxu1 %v8110_v47  ;;  %4126 = vmatprep.subr.bf16.mxu0 %v8110_v47 }
 0x982   :  { %4107 = vmatpush3.bf16.msra.mxu1 %v4348_v20  ;;  %4127 = vmatpush3.bf16.msra.mxu0 %v4356_v62  ;;  %v3657_v62 = vld [vmem:[%s7419_s4 + $0x4] ss:$0 sm:$0xff] }
 0x983   :  { %4108 = vmatprep.subr.bf16.mxu1 %v8110_v47  ;;  %4128 = vmatprep.subr.bf16.mxu0 %v8110_v47 }
 0x986   :  { %4109 = vmatpush3.bf16.msra.mxu1 %v4349_v18  ;;  %4129 = vmatpush3.bf16.msra.mxu0 %v4357_v28 }
 0x987   :  { %4110 = vmatprep.subr.bf16.mxu1 %v8110_v47  ;;  %4130 = vmatprep.subr.bf16.mxu0 %v8110_v47 }
 0x98a   :  { %4111 = vmatpush3.bf16.msra.mxu1 %v4350_v15  ;;  %4131 = vmatpush3.bf16.msra.mxu0 %v4358_v36 }
 0x98b   :  { %4112 = vmatprep.subr.bf16.mxu1 %v8110_v47  ;;  %4132 = vmatprep.subr.bf16.mxu0 %v8110_v47 }
 0x98e   :  { %4113 = vmatpush3.bf16.msra.mxu1 %v4351_v63  ;;  %4133 = vmatpush3.bf16.msra.mxu0 %v4359_v22 }
 0x98f   :  { %4114 = vmatprep.subr.bf16.mxu1 %v8110_v47  ;;  %4134 = vmatprep.subr.bf16.mxu0 %v8110_v47 }
 0x992   :  { %4115 = vmatpush3.bf16.msra.mxu1 %v4352_v51  ;;  %4135 = vmatpush3.bf16.msra.mxu0 %v4360_v49 }
 0x993   :  { %4116 = vmatprep.subr.bf16.mxu1 %v8110_v47  ;;  %4136 = vmatprep.subr.bf16.mxu0 %v8110_v47 }
 0x996   :  { %4117 = vmatpush3.bf16.msra.mxu1 %v4353_v19  ;;  %4137 = vmatpush3.bf16.msra.mxu0 %v4361_v59 }
 0x997   :  { %4118 = vmatprep.subr.bf16.mxu1 %v8110_v47  ;;  %4138 = vmatprep.subr.bf16.mxu0 %v8110_v47 }
 0x99a   :  { %4119 = vmatpush3.bf16.msra.mxu1 %v4354_v5  ;;  %4139 = vmatpush3.bf16.msra.mxu0 %v4362_v46 }
 0xa18   :  { %v3349_v48 = vpop.f32.mrf.mxu1  ;;  %v3390_v31 = vpop.f32.mrf.mxu0 }
 0xa19   :  { %v3350_v56 = vadd.f32 %v3349_v48, %v8095_v35  ;;  %v3391_v53 = vadd.f32 %v3390_v31, %v7854_v8 }
 0xa1a   :  { %v3351_v43 = vpop.f32.mrf.mxu1  ;;  %v3392_v16 = vpop.f32.mrf.mxu0 }
 0xa1b   :  { %v3352_v9 = vadd.f32 %v3351_v43, %v8096_v17  ;;  %v3393_v35 = vadd.f32 %v3392_v16, %v8097_v26 }
 0xa1c   :  { %v3353_v30 = vpop.f32.mrf.mxu1  ;;  %v3394_v21 = vpop.f32.mrf.mxu0 }
 0xa1e   :  { %v3354_v13 = vpop.f32.mrf.mxu1  ;;  %v3395_v10 = vpop.f32.mrf.mxu0 }
 0xa3c   :  { %v3456_v57 = vpop.f32.mrf.mxu1  ;;  %v3497_v11 = vpop.f32.mrf.mxu0 }
 0xa3d   :  { %v3457_v34 = vadd.f32 %v3456_v57, %v3350_v56  ;;  %v3498_v4 = vadd.f32 %v3497_v11, %v3391_v53 }
 0xa3e   :  { %v3458_v6 = vpop.f32.mrf.mxu1  ;;  %v3499_v38 = vpop.f32.mrf.mxu0 }
 0xa3f   :  { %v3504_v39 = vmul.f32 0.5, %v3457_v34  ;;  %v3459_v40 = vadd.f32 %v3458_v6, %v3352_v9  ;;  %v3500_v1 = vadd.f32 %v3499_v38, %v3393_v35 }
 0xa40   :  { %v3460_v41 = vpop.f32.mrf.mxu1  ;;  %v3501_v14 = vpop.f32.mrf.mxu0 }
 0xa41   :  { %4513 = vtanh.f32 %v3504_v39  ;;  %v3508_v3 = vmul.f32 0.5, %v3459_v40  ;;  %v3513_v17 = vmul.f32 0.5, %v3500_v1 }
 0xa42   :  { %v3461_v7 = vpop.f32.mrf.mxu1  ;;  %v3502_v23 = vpop.f32.mrf.mxu0 }
 0xa43   :  { %4515 = vtanh.f32 %v3508_v3 }
 0xa44   :  { %4517 = vtanh.f32 %v3498_v4 }
 0xa45   :  { %4519 = vtanh.f32 %v3513_v17 }
 0xa4e   :  { %v4514_v60 = vpop.eup %4513 }
 0xa4f   :  { %v3506_v2 = vmul.f32 0.5, %v4514_v60 }
 0xa50   :  { %v4516_v55 = vpop.eup %4515 }
 0xa51   :  { %v3507_v24 = vadd.f32 0.5, %v3506_v2  ;;  %v3510_v54 = vmul.f32 0.5, %v4516_v55  ;;  %v4518_v32 = vpop.eup %4517 }
 0xa52   :  { %v4520_v26 = vpop.eup %4519 }
 0xa53   :  { %v3511_v0 = vadd.f32 0.5, %v3510_v54  ;;  %v3518_v25 = vmul.f32 %v4518_v32, %v3507_v24  ;;  %v3515_v27 = vmul.f32 0.5, %v4520_v26 }
 0xa55   :  { %v3517_v8 = vmul.f32 %v3511_v0, %v7283_v50  ;;  %v3516_v29 = vadd.f32 0.5, %v3515_v27 }
 0xa57   :  { %v3519_v44 = vadd.f32 %v3518_v25, %v3517_v8 }
 0xa59   :  { %4521 = vtanh.f32 %v3519_v44  ;;  %4056 = vst [vmem:[%s7421_s6 + $0x6] sm:$0x3] %v3519_v44 }
 0xa66   :  { %v4522_v42 = vpop.eup %4521 }
 0xa67   :  { %v3521_v45 = vmul.f32 %v4522_v42, %v3516_v29 }
 0xa69   :  { %3522 = vst [vmem:[#allocation3 + $0xe] sm:$0x3] %v3521_v45  ;;  %4054 = vst [vmem:[%s7421_s6 + $0x2] sm:$0x3] %v3521_v45 }
 0xa70   :  { %v3524_v52 = vld [vmem:[#allocation3 + $0x8] sm:$0xff] }
 0xa71   :  { %v3542_v50 = vpack.c.bf16 %v3524_v52, %v3523_v33 }
 0xa73   :  { %4121 = vmatmul.mubr.bf16.vlgmr.msra.gmra.mxu1 %v3542_v50 }
 0xb33   :  { %v3626_v61 = vpop.f32.mrf.mxu1 }
 0xb34   :  { %v3627_v37 = vadd.f32 %v3626_v61, %v3543_v58 }
 0xb35   :  { %v4122_v20 = vpop.f32.mrf.mxu1 }
 0xb36   :  { %v3635_v15 = vmul.f32 0.1, %v3627_v37  ;;  %vm3633_vm1 = vcmp.gt.f32.partialorder %v3627_v37, 0.0 }
 0xb37   :  { %v3629_v18 = vpop.f32.mrf.mxu1 }
 0xb38   :  { %v3630_v63 = vadd.f32 %v3629_v18, %v3543_v58  ;;  %v3637_v47 = vsel %vm3633_vm1, %v3627_v37, %v3635_v15 }
 0xb39   :  { %v4123_v51 = vpop.f32.mrf.mxu1 }
 0xb3a   :  { %vm3634_vm2 = vcmp.gt.f32.partialorder %v3630_v63, 0.0  ;;  %v3636_v19 = vmul.f32 0.1, %v3630_v63 }
 0xb3c   :  { %v3638_v5 = vsel %vm3634_vm2, %v3630_v63, %v3636_v19 }
 0xb3d   :  { %v3656_v12 = vpack.c.bf16 %v3638_v5, %v3637_v47 }
 0xb3f   :  { %4141 = vmatmul.mubr.bf16.vlgmr.msra.gmra.mxu0 %v3656_v12 }
 0xbff   :  { %v3740_v28 = vpop.f32.mrf.mxu0 }
 0xc00   :  { %v3741_v36 = vadd.f32 %v3740_v28, %v3657_v62 }
 0xc01   :  { %v4142_v22 = vpop.f32.mrf.mxu0 }
 0xc02   :  { %3747 = vst [vmem:[%s7422_s5] sm:$0xff] %v3741_v36 }
 0xc03   :  { %v3743_v48 = vpop.f32.mrf.mxu0 }
 0xc04   :  { %v3744_v31 = vadd.f32 %v3743_v48, %v3657_v62 }
 0xc05   :  { %v4143_v43 = vpop.f32.mrf.mxu0 }
 0xc06   :  { %3748 = vst [vmem:[%s7422_s5 + $0x8] sm:$0xff] %v3744_v31 }

</bundles_post_ra>
